<compile_context>
chip_gen: v6e
topology: v6e:2x2x1
jax: 0.10.0
libtpu: 0.0.40
codegen_flags: <defaults>
</compile_context>

<pallas_src>
import math
import functools

import jax
import jax.numpy as jnp
from jax.experimental import pallas as pl
from jax.experimental.pallas import tpu as pltpu


VMEM_LIMIT = 48 * 1024 * 1024  # fits v7x's 64 MiB physical, raises v5e/v6e default


# ----------------------------------------------------------------------------
# Tiling helpers
# ----------------------------------------------------------------------------
def _divisor_tile(n, cap, steps):
    """Largest divisor of n that is <= cap, preferring aligned multiples."""
    cap = min(cap, n)
    for step in steps:
        t = (cap // step) * step
        while t >= step:
            if n % t == 0:
                return t
            t -= step
    return n


def _row_tile(m, cap=256):
    return _divisor_tile(m, cap, steps=(8, 1))


def _col_tile(n, cap=2048):
    return _divisor_tile(n, cap, steps=(256, 128, 8, 1))


# ----------------------------------------------------------------------------
# Pallas kernels
# ----------------------------------------------------------------------------
def _linear_kernel(x_ref, w_ref, b_ref, o_ref):
    # bf16 operands -> MXU, f32 accumulation, f32 bias add, cast to out dtype.
    o_ref[...] = (
        jnp.dot(x_ref[...].astype(jnp.bfloat16), w_ref[...],
                preferred_element_type=jnp.float32)
        + b_ref[...]
    ).astype(o_ref.dtype)


def linear(x, w_bf16, b, out_dtype=jnp.float32):
    """x: (M, K) @ w: (K, N) bf16 + b: (N,) f32 -> (M, N) out_dtype.
    Grid is (N tiles, M tiles): the weight block index depends only on the
    OUTER axis, so each W column tile is streamed from HBM exactly once and
    the (small) x tile is re-fetched on the inner axis."""
    M, K = x.shape
    N = w_bf16.shape[1]
    TM, TN = _row_tile(M), _col_tile(N)
    return pl.pallas_call(
        _linear_kernel,
        out_shape=jax.ShapeDtypeStruct((M, N), out_dtype),
        grid=(N // TN, M // TM),
        in_specs=[
            pl.BlockSpec((TM, K), lambda j, i: (i, 0)),
            pl.BlockSpec((K, TN), lambda j, i: (0, j)),
            pl.BlockSpec((1, TN), lambda j, i: (0, j)),
        ],
        out_specs=pl.BlockSpec((TM, TN), lambda j, i: (i, j)),
        compiler_params=pltpu.CompilerParams(
            dimension_semantics=("parallel", "parallel"),
            vmem_limit_bytes=VMEM_LIMIT),
    )(x, w_bf16, b.reshape(1, N))


def _norm_qkv_kernel(x_ref, g_ref, bln_ref, qw_ref, qb_ref, kvw_ref, kvb_ref,
                     q_out, kv_out, *, eps):
    # pre-LayerNorm (f32) fused with Q and KV projections; outputs in bf16.
    x = x_ref[...]
    mu = jnp.mean(x, axis=-1, keepdims=True)
    var = jnp.mean((x - mu) ** 2, axis=-1, keepdims=True)
    xn = ((x - mu) * jax.lax.rsqrt(var + eps) * g_ref[...] + bln_ref[...]
          ).astype(jnp.bfloat16)
    q_out[...] = (jnp.dot(xn, qw_ref[...], preferred_element_type=jnp.float32)
                  + qb_ref[...]).astype(q_out.dtype)
    kv_out[...] = (jnp.dot(xn, kvw_ref[...], preferred_element_type=jnp.float32)
                   + kvb_ref[...]).astype(kv_out.dtype)


def norm_qkv(x2d, norm_p, attn_p, eps=1e-5):
    """LN(x) -> (Q bf16 (M,D), KV bf16 (M,2D)), fully fused (one HBM read of x)."""
    M, D = x2d.shape
    TM = _row_tile(M)
    q, kv = pl.pallas_call(
        functools.partial(_norm_qkv_kernel, eps=eps),
        out_shape=(jax.ShapeDtypeStruct((M, D), jnp.bfloat16),
                   jax.ShapeDtypeStruct((M, 2 * D), jnp.bfloat16)),
        grid=(M // TM,),
        in_specs=[
            pl.BlockSpec((TM, D), lambda i: (i, 0)),
            pl.BlockSpec((1, D), lambda i: (0, 0)),
            pl.BlockSpec((1, D), lambda i: (0, 0)),
            pl.BlockSpec((D, D), lambda i: (0, 0)),
            pl.BlockSpec((1, D), lambda i: (0, 0)),
            pl.BlockSpec((D, 2 * D), lambda i: (0, 0)),
            pl.BlockSpec((1, 2 * D), lambda i: (0, 0)),
        ],
        out_specs=[pl.BlockSpec((TM, D), lambda i: (i, 0)),
                   pl.BlockSpec((TM, 2 * D), lambda i: (i, 0))],
        compiler_params=pltpu.CompilerParams(
            dimension_semantics=("parallel",),
            vmem_limit_bytes=VMEM_LIMIT),
    )(x2d, norm_p["g"].reshape(1, D), norm_p["b"].reshape(1, D),
      attn_p["q_w"], attn_p["q_b"].reshape(1, D),
      attn_p["kv_w"], attn_p["kv_b"].reshape(1, 2 * D))
    return q, kv


def _norm_proj_kernel(x_ref, g_ref, bln_ref, w_ref, b_ref, o_ref, *, eps):
    # pre-LayerNorm (f32) fused with a single projection; bf16 output.
    x = x_ref[...]
    mu = jnp.mean(x, axis=-1, keepdims=True)
    var = jnp.mean((x - mu) ** 2, axis=-1, keepdims=True)
    xn = ((x - mu) * jax.lax.rsqrt(var + eps) * g_ref[...] + bln_ref[...]
          ).astype(jnp.bfloat16)
    o_ref[...] = (jnp.dot(xn, w_ref[...], preferred_element_type=jnp.float32)
                  + b_ref[...]).astype(o_ref.dtype)


def norm_proj(x2d, norm_p, w_bf16, b, eps=1e-5, out_dtype=jnp.bfloat16):
    """LayerNorm(x) @ W + b, fused.  x: (M, D) -> (M, N) out_dtype."""
    M, D = x2d.shape
    N = w_bf16.shape[1]
    TM = _row_tile(M)
    return pl.pallas_call(
        functools.partial(_norm_proj_kernel, eps=eps),
        out_shape=jax.ShapeDtypeStruct((M, N), out_dtype),
        grid=(M // TM,),
        in_specs=[
            pl.BlockSpec((TM, D), lambda i: (i, 0)),
            pl.BlockSpec((1, D), lambda i: (0, 0)),
            pl.BlockSpec((1, D), lambda i: (0, 0)),
            pl.BlockSpec((D, N), lambda i: (0, 0)),
            pl.BlockSpec((1, N), lambda i: (0, 0)),
        ],
        out_specs=pl.BlockSpec((TM, N), lambda i: (i, 0)),
        compiler_params=pltpu.CompilerParams(
            dimension_semantics=("parallel",),
            vmem_limit_bytes=VMEM_LIMIT),
    )(x2d, norm_p["g"].reshape(1, D), norm_p["b"].reshape(1, D),
      w_bf16, b.reshape(1, N))


def _norm_ffn_res_kernel(x_ref, g_ref, bln_ref, w1_ref, b1_ref, w2_ref, b2_ref,
                         o_ref, *, eps):
    # x + FFN(LayerNorm(x)) fused: LN, linear, ReLU, linear, residual add.
    x = x_ref[...]
    mu = jnp.mean(x, axis=-1, keepdims=True)
    var = jnp.mean((x - mu) ** 2, axis=-1, keepdims=True)
    xn = ((x - mu) * jax.lax.rsqrt(var + eps) * g_ref[...] + bln_ref[...]
          ).astype(jnp.bfloat16)
    h = jnp.dot(xn, w1_ref[...], preferred_element_type=jnp.float32) + b1_ref[...]
    h = jnp.maximum(h, 0.0)                      # ReLU in f32
    y = jnp.dot(h.astype(jnp.bfloat16), w2_ref[...],
                preferred_element_type=jnp.float32) + b2_ref[...]
    o_ref[...] = x + y                           # residual


def norm_ffn_residual(x, norm_p, ff_p, eps=1e-5):
    """x + FFN(LN(x)).  x: (B, L, D) -> (B, L, D).  Row tile capped at 128 so
    the (TM, F) f32 intermediate + resident W1/W2 stay inside v7x's VMEM."""
    B, L, D = x.shape
    M = B * L
    F = ff_p["w1"].shape[1]
    TM = _row_tile(M, cap=128)
    out = pl.pallas_call(
        functools.partial(_norm_ffn_res_kernel, eps=eps),
        out_shape=jax.ShapeDtypeStruct((M, D), jnp.float32),
        grid=(M // TM,),
        in_specs=[
            pl.BlockSpec((TM, D), lambda i: (i, 0)),
            pl.BlockSpec((1, D), lambda i: (0, 0)),
            pl.BlockSpec((1, D), lambda i: (0, 0)),
            pl.BlockSpec((D, F), lambda i: (0, 0)),
            pl.BlockSpec((1, F), lambda i: (0, 0)),
            pl.BlockSpec((F, D), lambda i: (0, 0)),
            pl.BlockSpec((1, D), lambda i: (0, 0)),
        ],
        out_specs=pl.BlockSpec((TM, D), lambda i: (i, 0)),
        compiler_params=pltpu.CompilerParams(
            dimension_semantics=("parallel",),
            vmem_limit_bytes=VMEM_LIMIT),
    )(x.reshape(M, D), norm_p["g"].reshape(1, D), norm_p["b"].reshape(1, D),
      ff_p["w1"], ff_p["b1"].reshape(1, F), ff_p["w2"], ff_p["b2"].reshape(1, D))
    return out.reshape(B, L, D)


def _layernorm_kernel(x_ref, g_ref, b_ref, o_ref, *, eps):
    x = x_ref[...]
    mu = jnp.mean(x, axis=-1, keepdims=True)
    var = jnp.mean((x - mu) ** 2, axis=-1, keepdims=True)
    o_ref[...] = (x - mu) * jax.lax.rsqrt(var + eps) * g_ref[...] + b_ref[...]


def layer_norm3(x, norm_p, eps=1e-5):
    """Final layer norm over last dim. x: (B, L, D)."""
    B, L, D = x.shape
    M = B * L
    TM = _row_tile(M)
    out = pl.pallas_call(
        functools.partial(_layernorm_kernel, eps=eps),
        out_shape=jax.ShapeDtypeStruct((M, D), jnp.float32),
        grid=(M // TM,),
        in_specs=[
            pl.BlockSpec((TM, D), lambda i: (i, 0)),
            pl.BlockSpec((1, D), lambda i: (0, 0)),
            pl.BlockSpec((1, D), lambda i: (0, 0)),
        ],
        out_specs=pl.BlockSpec((TM, D), lambda i: (i, 0)),
        compiler_params=pltpu.CompilerParams(
            dimension_semantics=("parallel",),
            vmem_limit_bytes=VMEM_LIMIT),
    )(x.reshape(M, D), norm_p["g"].reshape(1, D), norm_p["b"].reshape(1, D))
    return out.reshape(B, L, D)


def _attn_kernel(q_ref, kv_ref, bias_ref, wo_ref, bo_ref, res_ref, o_ref,
                 *, num_heads, causal):
    """Per-(batch, q-tile) multi-head attention + out-proj + residual add.
    q_ref: (TQ, D) bf16 (softmax scale pre-folded into W_q),
    kv_ref: (Lk, 2D) bf16, bias_ref: (1, Lk) f32 additive pad bias,
    wo_ref: (D, D) bf16, bo_ref/res_ref/o_ref: f32."""
    TQ, D = q_ref.shape
    Lk = kv_ref.shape[0]
    dk = D // num_heads
    q = q_ref[...]                         # bf16 (TQ, D)
    kv = kv_ref[...]                       # bf16 (Lk, 2D)
    bias = bias_ref[...]                   # f32 (1, Lk) additive pad bias

    if causal:
        q_start = pl.program_id(1) * TQ
        row = jax.lax.broadcasted_iota(jnp.int32, (TQ, Lk), 0) + q_start
        col = jax.lax.broadcasted_iota(jnp.int32, (TQ, Lk), 1)
        bias = bias + jnp.where(col > row, jnp.float32(-1e9), jnp.float32(0.0))

    # residual + out-proj bias added exactly once; heads accumulate into acc.
    acc = res_ref[...] + bo_ref[...]                       # (TQ, D) f32
    for h in range(num_heads):             # static unroll over heads (H small)
        lo, hi = h * dk, (h + 1) * dk
        qh = q[:, lo:hi]                                   # (TQ, dk) bf16
        kh = kv[:, lo:hi]                                  # (Lk, dk) bf16
        vh = kv[:, D + lo:D + hi]                          # (Lk, dk) bf16
        s = jax.lax.dot_general(qh, kh, (((1,), (1,)), ((), ())),
                                preferred_element_type=jnp.float32)
        s = s + bias                                       # pad (+causal) bias
        s = s - jnp.max(s, axis=-1, keepdims=True)
        p = jnp.exp(s)
        denom = jnp.sum(p, axis=-1, keepdims=True)
        p = p * pl.reciprocal(denom, approx=True)          # EUP, not VALU divide
        ctx = jnp.dot(p.astype(jnp.bfloat16), vh,
                      preferred_element_type=jnp.float32)  # (TQ, dk) f32
        # per-head out-projection accumulation (sublane-sliced W_o, no concat)
        acc = acc + jnp.dot(ctx.astype(jnp.bfloat16), wo_ref[lo:hi, :],
                            preferred_element_type=jnp.float32)
    o_ref[...] = acc


def attention_block(q, kv, pad_bias, wo_bf16, bo, residual, num_heads, causal):
    """q: (B,Lq,D) bf16, kv: (B,Lk,2D) bf16, pad_bias: (B,1,Lk) f32 additive,
    residual: (B,Lq,D) f32.  Returns residual + W_o @ MHA(q, k, v)."""
    B, Lq, D = q.shape
    Lk = kv.shape[1]
    TQ = _row_tile(Lq, cap=256)
    return pl.pallas_call(
        functools.partial(_attn_kernel, num_heads=num_heads, causal=causal),
        out_shape=jax.ShapeDtypeStruct((B, Lq, D), jnp.float32),
        grid=(B, Lq // TQ),
        in_specs=[
            pl.BlockSpec((None, TQ, D), lambda b, i: (b, i, 0)),       # q
            pl.BlockSpec((None, Lk, 2 * D), lambda b, i: (b, 0, 0)),   # kv
            pl.BlockSpec((None, 1, Lk), lambda b, i: (b, 0, 0)),       # pad bias
            pl.BlockSpec((D, D), lambda b, i: (0, 0)),                 # W_o
            pl.BlockSpec((1, D), lambda b, i: (0, 0)),                 # b_o
            pl.BlockSpec((None, TQ, D), lambda b, i: (b, i, 0)),       # residual
        ],
        out_specs=pl.BlockSpec((None, TQ, D), lambda b, i: (b, i, 0)),
        compiler_params=pltpu.CompilerParams(
            dimension_semantics=("parallel", "parallel"),
            vmem_limit_bytes=VMEM_LIMIT),
    )(q, kv, pad_bias, wo_bf16, bo.reshape(1, D), residual)


# ----------------------------------------------------------------------------
# Model forward (glue: embedding gather, PE, free reshapes, tiny bias tensors)
# ----------------------------------------------------------------------------
def encoder_forward(p, src, src_bias, num_heads):
    B, L = src.shape
    D = p["embed"].shape[1]
    x = p["embed"][src] * math.sqrt(D) + p["pe"][:L]   # embedding + PE (glue)
    # dropout = 0.0 (inference) -> identity
    for lp in p["layers"]:
        q, kv = norm_qkv(x.reshape(B * L, D), lp["norm1"], lp["attn"])
        x = attention_block(q.reshape(B, L, D), kv.reshape(B, L, 2 * D),
                            src_bias, lp["attn"]["o_w"], lp["attn"]["o_b"],
                            x, num_heads, causal=False)
        x = norm_ffn_residual(x, lp["norm2"], lp["ff"])
    return layer_norm3(x, p["norm"])


def decoder_forward(p, trg, e_outputs, src_bias, trg_bias, num_heads):
    B, Lt = trg.shape
    Ls = e_outputs.shape[1]
    D = p["embed"].shape[1]
    x = p["embed"][trg] * math.sqrt(D) + p["pe"][:Lt]
    for lp in p["layers"]:
        # masked self-attention: pad bias + in-kernel causal mask
        q, kv = norm_qkv(x.reshape(B * Lt, D), lp["norm1"], lp["attn1"])
        x = attention_block(q.reshape(B, Lt, D), kv.reshape(B, Lt, 2 * D),
                            trg_bias, lp["attn1"]["o_w"], lp["attn1"]["o_b"],
                            x, num_heads, causal=True)
        # cross-attention: Q from norm2(x), fused KV from encoder outputs
        q = norm_proj(x.reshape(B * Lt, D), lp["norm2"],
                      lp["attn2"]["q_w"], lp["attn2"]["q_b"])
        kv = linear(e_outputs.reshape(B * Ls, D),
                    lp["attn2"]["kv_w"], lp["attn2"]["kv_b"],
                    out_dtype=jnp.bfloat16)
        x = attention_block(q.reshape(B, Lt, D), kv.reshape(B, Ls, 2 * D),
                            src_bias, lp["attn2"]["o_w"], lp["attn2"]["o_b"],
                            x, num_heads, causal=False)
        # FFN block (norm3 + FFN + residual, fused)
        x = norm_ffn_residual(x, lp["norm3"], lp["ff"])
    return layer_norm3(x, p["norm"])


def transformer_forward(params, src, trg, src_mask, trg_mask, num_heads):
    """src_mask/trg_mask are (B, 1, L) pad masks; the causal (no-peek) part of
    the decoder self-attention mask is generated inside the attention kernel."""
    src_bias = (1.0 - src_mask.astype(jnp.float32)) * jnp.float32(-1e9)  # (B,1,Ls)
    trg_bias = (1.0 - trg_mask.astype(jnp.float32)) * jnp.float32(-1e9)  # (B,1,Lt)
    e_outputs = encoder_forward(params["encoder"], src, src_bias, num_heads)
    d_output = decoder_forward(params["decoder"], trg, e_outputs,
                               src_bias, trg_bias, num_heads)
    B, Lt, D = d_output.shape
    V = params["out"]["w"].shape[1]
    logits = linear(d_output.reshape(B * Lt, D),
                    params["out"]["w"], params["out"]["b"])
    return logits.reshape(B, Lt, V)


# ----------------------------------------------------------------------------
# Deterministic parameter init (mirrors nn.Linear / nn.Embedding).  K and V
# weights are concatenated so one matmul produces both; the 1/sqrt(d_k)
# attention scale is folded into the Q projection; matmul weights stored bf16.
# ----------------------------------------------------------------------------
def _init_linear_wb(key, fan_in, fan_out):
    kw, kb = jax.random.split(key)
    bound = 1.0 / math.sqrt(fan_in)
    w = jax.random.uniform(kw, (fan_in, fan_out), jnp.float32, -bound, bound)
    b = jax.random.uniform(kb, (fan_out,), jnp.float32, -bound, bound)
    return w, b


def _init_norm(d_model):
    return {"g": jnp.ones((d_model,), jnp.float32),
            "b": jnp.zeros((d_model,), jnp.float32)}


def _init_attn(key, d_model, num_heads):
    ks = jax.random.split(key, 4)
    wq, bq = _init_linear_wb(ks[0], d_model, d_model)
    wk, bk = _init_linear_wb(ks[1], d_model, d_model)
    wv, bv = _init_linear_wb(ks[2], d_model, d_model)
    wo, bo = _init_linear_wb(ks[3], d_model, d_model)
    scale = 1.0 / math.sqrt(d_model // num_heads)   # folded into Q projection
    return {
        "q_w": (wq * scale).astype(jnp.bfloat16), "q_b": bq * scale,
        "kv_w": jnp.concatenate([wk, wv], axis=1).astype(jnp.bfloat16),
        "kv_b": jnp.concatenate([bk, bv], axis=0),
        "o_w": wo.astype(jnp.bfloat16), "o_b": bo,
    }


def _init_ff(key, d_model, d_ff):
    k1, k2 = jax.random.split(key)
    w1, b1 = _init_linear_wb(k1, d_model, d_ff)
    w2, b2 = _init_linear_wb(k2, d_ff, d_model)
    return {"w1": w1.astype(jnp.bfloat16), "b1": b1,
            "w2": w2.astype(jnp.bfloat16), "b2": b2}


def _positional_encoding(max_len, d_model):
    pos = jnp.arange(max_len, dtype=jnp.float32)[:, None]
    i = jnp.arange(0, d_model, 2, dtype=jnp.float32)
    angle = pos / jnp.power(10000.0, i / d_model)
    pe = jnp.zeros((max_len, d_model), jnp.float32)
    pe = pe.at[:, 0::2].set(jnp.sin(angle))
    pe = pe.at[:, 1::2].set(jnp.cos(angle))
    return pe


def init_transformer(key, src_vocab, trg_vocab, d_model, d_ff, num_layers,
                     num_heads, max_len=64):
    keys = jax.random.split(key, 4)

    def stack(k, decoder):
        lks = jax.random.split(k, num_layers)
        layers = []
        for lk in lks:
            sub = jax.random.split(lk, 3)
            if decoder:
                layers.append({
                    "norm1": _init_norm(d_model),
                    "attn1": _init_attn(sub[0], d_model, num_heads),
                    "norm2": _init_norm(d_model),
                    "attn2": _init_attn(sub[1], d_model, num_heads),
                    "norm3": _init_norm(d_model),
                    "ff": _init_ff(sub[2], d_model, d_ff),
                })
            else:
                layers.append({
                    "norm1": _init_norm(d_model),
                    "attn": _init_attn(sub[0], d_model, num_heads),
                    "norm2": _init_norm(d_model),
                    "ff": _init_ff(sub[1], d_model, d_ff),
                })
        return layers

    ek, dk_, ok, emk = keys
    emb_e, emb_d = jax.random.split(emk)
    ow, ob = _init_linear_wb(ok, d_model, trg_vocab)
    pe = _positional_encoding(max_len, d_model)
    return {
        "encoder": {
            "embed": jax.random.normal(emb_e, (src_vocab, d_model), jnp.float32),
            "pe": pe, "layers": stack(ek, decoder=False), "norm": _init_norm(d_model),
        },
        "decoder": {
            "embed": jax.random.normal(emb_d, (trg_vocab, d_model), jnp.float32),
            "pe": pe, "layers": stack(dk_, decoder=True), "norm": _init_norm(d_model),
        },
        "out": {"w": ow.astype(jnp.bfloat16), "b": ob},
    }


# ----------------------------------------------------------------------------
if __name__ == "__main__":
    SRC_VOCAB, TRG_VOCAB = 17, 19
    D_MODEL, D_FF, N_LAYERS, N_HEADS = 32, 64, 2, 4
    DROPOUT = 0.0  # dropout is identity at inference; stored only for parity
    B, LS, LT = 2, 16, 8
    # TODO(synk): for real configs pick D_MODEL / D_FF as multiples of 128 so the
    # 8x128 vregs / MXU tiles are fully utilized; the toy dims here match the spec.

    key = jax.random.PRNGKey(0)
    pkey, skey, tkey = jax.random.split(key, 3)

    params = init_transformer(pkey, SRC_VOCAB, TRG_VOCAB, D_MODEL, D_FF,
                              N_LAYERS, N_HEADS, max_len=64)

    src = jax.random.randint(skey, (B, LS), 1, SRC_VOCAB)
    trg = jax.random.randint(tkey, (B, LT), 1, TRG_VOCAB)
    src = src.at[1, -4:].set(0)   # pad tokens
    trg = trg.at[1, -2:].set(0)

    # (B, 1, L) pad masks; the decoder's causal (no-peek) mask is built
    # inside the attention kernel (no (B, L, L) mask is ever materialized).
    src_mask = (src != 0)[:, None, :]
    trg_mask = (trg != 0)[:, None, :]

    fwd = jax.jit(transformer_forward, static_argnames=("num_heads",))
    out = fwd(params, src, trg, src_mask, trg_mask, N_HEADS)
    out = jax.block_until_ready(out)

    assert out.shape == (B, LT, TRG_VOCAB), out.shape
    assert bool(jnp.all(jnp.isfinite(out)))
    print("KERNEL_OK")
</pallas_src>

<mosaic_0001>
module attributes {stable_mosaic.version = 11 : i64} {
  func.func @_norm_qkv_kernel(%arg0: i32, %arg1: memref<32x32xf32, #tpu.memory_space<vmem>>, %arg2: memref<1x32xf32, #tpu.memory_space<vmem>>, %arg3: memref<1x32xf32, #tpu.memory_space<vmem>>, %arg4: memref<32x32xbf16, #tpu.memory_space<vmem>>, %arg5: memref<1x32xf32, #tpu.memory_space<vmem>>, %arg6: memref<32x64xbf16, #tpu.memory_space<vmem>>, %arg7: memref<1x64xf32, #tpu.memory_space<vmem>>, %arg8: memref<32x32xbf16, #tpu.memory_space<vmem>>, %arg9: memref<32x64xbf16, #tpu.memory_space<vmem>>) attributes {dimension_semantics = [#tpu.dimension_semantics<parallel>], iteration_bounds = array<i64: 1>, scalar_prefetch = 0 : i64, scratch_operands = 0 : i64, tpu.core_type = #tpu.core_type<tc>, window_params = [{transform_indices = @transform_0, window_bounds = array<i64: 32, 32>}, {pipeline_mode = #tpu.pipeline_mode<synchronous>, transform_indices = @transform_1, window_bounds = array<i64: 1, 32>}, {pipeline_mode = #tpu.pipeline_mode<synchronous>, transform_indices = @transform_2, window_bounds = array<i64: 1, 32>}, {pipeline_mode = #tpu.pipeline_mode<synchronous>, transform_indices = @transform_3, window_bounds = array<i64: 32, 32>}, {pipeline_mode = #tpu.pipeline_mode<synchronous>, transform_indices = @transform_4, window_bounds = array<i64: 1, 32>}, {pipeline_mode = #tpu.pipeline_mode<synchronous>, transform_indices = @transform_5, window_bounds = array<i64: 32, 64>}, {pipeline_mode = #tpu.pipeline_mode<synchronous>, transform_indices = @transform_6, window_bounds = array<i64: 1, 64>}, {transform_indices = @transform_7, window_bounds = array<i64: 32, 32>}, {transform_indices = @transform_8, window_bounds = array<i64: 32, 64>}]} {
    %c0 = arith.constant 0 : index
    %c0_0 = arith.constant 0 : index
    %0 = vector.load %arg1[%c0, %c0_0] : memref<32x32xf32, #tpu.memory_space<vmem>>, vector<32x32xf32>
    %cst = arith.constant dense<0.000000e+00> : vector<32xf32>
    %1 = vector.multi_reduction <add>, %0, %cst [1] : vector<32x32xf32> to vector<32xf32>
    %2 = vector.shape_cast %1 : vector<32xf32> to vector<32x1xf32>
    %cst_1 = arith.constant 3.200000e+01 : f32
    %3 = vector.broadcast %cst_1 : f32 to vector<32x1xf32>
    %4 = arith.divf %2, %3 : vector<32x1xf32>
    %5 = vector.broadcast %4 : vector<32x1xf32> to vector<32x32xf32>
    %6 = arith.subf %0, %5 : vector<32x32xf32>
    %7 = arith.mulf %6, %6 : vector<32x32xf32>
    %cst_2 = arith.constant dense<0.000000e+00> : vector<32xf32>
    %8 = vector.multi_reduction <add>, %7, %cst_2 [1] : vector<32x32xf32> to vector<32xf32>
    %9 = vector.shape_cast %8 : vector<32xf32> to vector<32x1xf32>
    %cst_3 = arith.constant 3.200000e+01 : f32
    %10 = vector.broadcast %cst_3 : f32 to vector<32x1xf32>
    %11 = arith.divf %9, %10 : vector<32x1xf32>
    %12 = vector.broadcast %4 : vector<32x1xf32> to vector<32x32xf32>
    %13 = arith.subf %0, %12 : vector<32x32xf32>
    %cst_4 = arith.constant 9.99999974E-6 : f32
    %14 = vector.broadcast %cst_4 : f32 to vector<32x1xf32>
    %15 = arith.addf %11, %14 : vector<32x1xf32>
    %16 = math.rsqrt %15 : vector<32x1xf32>
    %17 = vector.broadcast %16 : vector<32x1xf32> to vector<32x32xf32>
    %18 = arith.mulf %13, %17 : vector<32x32xf32>
    %c0_5 = arith.constant 0 : index
    %c0_6 = arith.constant 0 : index
    %19 = vector.load %arg2[%c0_5, %c0_6] : memref<1x32xf32, #tpu.memory_space<vmem>>, vector<1x32xf32>
    %20 = vector.broadcast %19 : vector<1x32xf32> to vector<32x32xf32>
    %21 = arith.mulf %18, %20 : vector<32x32xf32>
    %c0_7 = arith.constant 0 : index
    %c0_8 = arith.constant 0 : index
    %22 = vector.load %arg3[%c0_7, %c0_8] : memref<1x32xf32, #tpu.memory_space<vmem>>, vector<1x32xf32>
    %23 = vector.broadcast %22 : vector<1x32xf32> to vector<32x32xf32>
    %24 = arith.addf %21, %23 : vector<32x32xf32>
    %25 = arith.truncf %24 : vector<32x32xf32> to vector<32x32xbf16>
    %c0_9 = arith.constant 0 : index
    %c0_10 = arith.constant 0 : index
    %26 = vector.load %arg4[%c0_9, %c0_10] : memref<32x32xbf16, #tpu.memory_space<vmem>>, vector<32x32xbf16>
    %cst_11 = arith.constant dense<0.000000e+00> : vector<32x32xf32>
    %27 = tpu.matmul %25, %26, %cst_11 {dimension_numbers = #tpu.dot_dimension_numbers<[1], [0], [0], [1], [0, 0, 1, 1], [], []>} : vector<32x32xbf16>, vector<32x32xbf16>, vector<32x32xf32> -> vector<32x32xf32>
    %c0_12 = arith.constant 0 : index
    %c0_13 = arith.constant 0 : index
    %28 = vector.load %arg5[%c0_12, %c0_13] : memref<1x32xf32, #tpu.memory_space<vmem>>, vector<1x32xf32>
    %29 = vector.broadcast %28 : vector<1x32xf32> to vector<32x32xf32>
    %30 = arith.addf %27, %29 : vector<32x32xf32>
    %31 = arith.truncf %30 : vector<32x32xf32> to vector<32x32xbf16>
    %c0_14 = arith.constant 0 : index
    %c0_15 = arith.constant 0 : index
    %32 = vector.load %arg8[%c0_14, %c0_15] : memref<32x32xbf16, #tpu.memory_space<vmem>>, vector<32x32xbf16>
    tpu.vector_store %arg8[%c0_14, %c0_15], %31 {strides = array<i32>} : memref<32x32xbf16, #tpu.memory_space<vmem>>, vector<32x32xbf16>,
    %c0_16 = arith.constant 0 : index
    %c0_17 = arith.constant 0 : index
    %33 = vector.load %arg6[%c0_16, %c0_17] : memref<32x64xbf16, #tpu.memory_space<vmem>>, vector<32x64xbf16>
    %cst_18 = arith.constant dense<0.000000e+00> : vector<32x64xf32>
    %34 = tpu.matmul %25, %33, %cst_18 {dimension_numbers = #tpu.dot_dimension_numbers<[1], [0], [0], [1], [0, 0, 1, 1], [], []>} : vector<32x32xbf16>, vector<32x64xbf16>, vector<32x64xf32> -> vector<32x64xf32>
    %c0_19 = arith.constant 0 : index
    %c0_20 = arith.constant 0 : index
    %35 = vector.load %arg7[%c0_19, %c0_20] : memref<1x64xf32, #tpu.memory_space<vmem>>, vector<1x64xf32>
    %36 = vector.broadcast %35 : vector<1x64xf32> to vector<32x64xf32>
    %37 = arith.addf %34, %36 : vector<32x64xf32>
    %38 = arith.truncf %37 : vector<32x64xf32> to vector<32x64xbf16>
    %c0_21 = arith.constant 0 : index
    %c0_22 = arith.constant 0 : index
    %39 = vector.load %arg9[%c0_21, %c0_22] : memref<32x64xbf16, #tpu.memory_space<vmem>>, vector<32x64xbf16>
    tpu.vector_store %arg9[%c0_21, %c0_22], %38 {strides = array<i32>} : memref<32x64xbf16, #tpu.memory_space<vmem>>, vector<32x64xbf16>,
    return
  }
  func.func @transform_0(%arg0: i32) -> (i32, i32) {
    %c0_i32 = arith.constant 0 : i32
    %c0_i32_0 = arith.constant 0 : i32
    return %arg0, %c0_i32 : i32, i32
  }
  func.func @transform_1(%arg0: i32) -> (i32, i32) {
    %c0_i32 = arith.constant 0 : i32
    %c0_i32_0 = arith.constant 0 : i32
    %c0_i32_1 = arith.constant 0 : i32
    return %c0_i32, %c0_i32_0 : i32, i32
  }
  func.func @transform_2(%arg0: i32) -> (i32, i32) {
    %c0_i32 = arith.constant 0 : i32
    %c0_i32_0 = arith.constant 0 : i32
    %c0_i32_1 = arith.constant 0 : i32
    return %c0_i32, %c0_i32_0 : i32, i32
  }
  func.func @transform_3(%arg0: i32) -> (i32, i32) {
    %c0_i32 = arith.constant 0 : i32
    %c0_i32_0 = arith.constant 0 : i32
    %c0_i32_1 = arith.constant 0 : i32
    return %c0_i32, %c0_i32_0 : i32, i32
  }
  func.func @transform_4(%arg0: i32) -> (i32, i32) {
    %c0_i32 = arith.constant 0 : i32
    %c0_i32_0 = arith.constant 0 : i32
    %c0_i32_1 = arith.constant 0 : i32
    return %c0_i32, %c0_i32_0 : i32, i32
  }
  func.func @transform_5(%arg0: i32) -> (i32, i32) {
    %c0_i32 = arith.constant 0 : i32
    %c0_i32_0 = arith.constant 0 : i32
    %c0_i32_1 = arith.constant 0 : i32
    return %c0_i32, %c0_i32_0 : i32, i32
  }
  func.func @transform_6(%arg0: i32) -> (i32, i32) {
    %c0_i32 = arith.constant 0 : i32
    %c0_i32_0 = arith.constant 0 : i32
    %c0_i32_1 = arith.constant 0 : i32
    return %c0_i32, %c0_i32_0 : i32, i32
  }
  func.func @transform_7(%arg0: i32) -> (i32, i32) {
    %c0_i32 = arith.constant 0 : i32
    %c0_i32_0 = arith.constant 0 : i32
    return %arg0, %c0_i32 : i32, i32
  }
  func.func @transform_8(%arg0: i32) -> (i32, i32) {
    %c0_i32 = arith.constant 0 : i32
    %c0_i32_0 = arith.constant 0 : i32
    return %arg0, %c0_i32 : i32, i32
  }
}

module attributes {stable_mosaic.version = 11 : i64} {
  func.func @_attn_kernel(%arg0: i32, %arg1: i32, %arg2: memref<1x16x32xbf16, #tpu.memory_space<vmem>>, %arg3: memref<1x16x64xbf16, #tpu.memory_space<vmem>>, %arg4: memref<1x1x16xf32, #tpu.memory_space<vmem>>, %arg5: memref<32x32xbf16, #tpu.memory_space<vmem>>, %arg6: memref<1x32xf32, #tpu.memory_space<vmem>>, %arg7: memref<1x16x32xf32, #tpu.memory_space<vmem>>, %arg8: memref<1x16x32xf32, #tpu.memory_space<vmem>>) attributes {dimension_semantics = [#tpu.dimension_semantics<parallel>, #tpu.dimension_semantics<parallel>], iteration_bounds = array<i64: 2, 1>, scalar_prefetch = 0 : i64, scratch_operands = 0 : i64, tpu.core_type = #tpu.core_type<tc>, window_params = [{transform_indices = @transform_0, window_bounds = array<i64: 1, 16, 32>}, {transform_indices = @transform_1, window_bounds = array<i64: 1, 16, 64>}, {transform_indices = @transform_2, window_bounds = array<i64: 1, 1, 16>}, {pipeline_mode = #tpu.pipeline_mode<synchronous>, transform_indices = @transform_3, window_bounds = array<i64: 32, 32>}, {pipeline_mode = #tpu.pipeline_mode<synchronous>, transform_indices = @transform_4, window_bounds = array<i64: 1, 32>}, {transform_indices = @transform_5, window_bounds = array<i64: 1, 16, 32>}, {transform_indices = @transform_6, window_bounds = array<i64: 1, 16, 32>}]} {
    %c0 = arith.constant 0 : index
    %c0_0 = arith.constant 0 : index
    %c0_1 = arith.constant 0 : index
    %0 = vector.load %arg2[%c0, %c0_0, %c0_1] : memref<1x16x32xbf16, #tpu.memory_space<vmem>>, vector<1x16x32xbf16>
    %1 = vector.shape_cast %0 : vector<1x16x32xbf16> to vector<16x32xbf16>
    %c0_2 = arith.constant 0 : index
    %c0_3 = arith.constant 0 : index
    %c0_4 = arith.constant 0 : index
    %2 = vector.load %arg3[%c0_2, %c0_3, %c0_4] : memref<1x16x64xbf16, #tpu.memory_space<vmem>>, vector<1x16x64xbf16>
    %3 = vector.shape_cast %2 : vector<1x16x64xbf16> to vector<16x64xbf16>
    %c0_5 = arith.constant 0 : index
    %c0_6 = arith.constant 0 : index
    %c0_7 = arith.constant 0 : index
    %4 = vector.load %arg4[%c0_5, %c0_6, %c0_7] : memref<1x1x16xf32, #tpu.memory_space<vmem>>, vector<1x1x16xf32>
    %5 = vector.shape_cast %4 : vector<1x1x16xf32> to vector<1x16xf32>
    %c0_8 = arith.constant 0 : index
    %c0_9 = arith.constant 0 : index
    %c0_10 = arith.constant 0 : index
    %6 = vector.load %arg7[%c0_8, %c0_9, %c0_10] : memref<1x16x32xf32, #tpu.memory_space<vmem>>, vector<1x16x32xf32>
    %7 = vector.shape_cast %6 : vector<1x16x32xf32> to vector<16x32xf32>
    %c0_11 = arith.constant 0 : index
    %c0_12 = arith.constant 0 : index
    %8 = vector.load %arg6[%c0_11, %c0_12] : memref<1x32xf32, #tpu.memory_space<vmem>>, vector<1x32xf32>
    %9 = vector.broadcast %8 : vector<1x32xf32> to vector<16x32xf32>
    %10 = arith.addf %7, %9 : vector<16x32xf32>
    %11 = vector.extract_strided_slice %1 {offsets = [0, 0], sizes = [16, 8], strides = [1, 1]} : vector<16x32xbf16> to vector<16x8xbf16>
    %12 = vector.extract_strided_slice %3 {offsets = [0, 0], sizes = [16, 8], strides = [1, 1]} : vector<16x64xbf16> to vector<16x8xbf16>
    %13 = vector.extract_strided_slice %3 {offsets = [0, 32], sizes = [16, 8], strides = [1, 1]} : vector<16x64xbf16> to vector<16x8xbf16>
    %cst = arith.constant dense<0.000000e+00> : vector<16x16xf32>
    %14 = tpu.matmul %11, %12, %cst {dimension_numbers = #tpu.dot_dimension_numbers<[1], [1], [0], [0], [0, 0, 1, 0], [], []>} : vector<16x8xbf16>, vector<16x8xbf16>, vector<16x16xf32> -> vector<16x16xf32>
    %15 = vector.broadcast %5 : vector<1x16xf32> to vector<16x16xf32>
    %16 = arith.addf %14, %15 : vector<16x16xf32>
    %cst_13 = arith.constant dense<0xFF800000> : vector<16xf32>
    %17 = vector.multi_reduction <maximumf>, %16, %cst_13 [1] : vector<16x16xf32> to vector<16xf32>
    %18 = vector.shape_cast %17 : vector<16xf32> to vector<16x1xf32>
    %19 = vector.broadcast %18 : vector<16x1xf32> to vector<16x16xf32>
    %20 = arith.subf %16, %19 : vector<16x16xf32>
    %21 = math.exp %20 : vector<16x16xf32>
    %cst_14 = arith.constant dense<0.000000e+00> : vector<16xf32>
    %22 = vector.multi_reduction <add>, %21, %cst_14 [1] : vector<16x16xf32> to vector<16xf32>
    %23 = vector.shape_cast %22 : vector<16xf32> to vector<16x1xf32>
    %24 = tpu.reciprocal %23 {approx = true} : vector<16x1xf32> -> vector<16x1xf32>
    %25 = vector.broadcast %24 : vector<16x1xf32> to vector<16x16xf32>
    %26 = arith.mulf %21, %25 : vector<16x16xf32>
    %27 = arith.truncf %26 : vector<16x16xf32> to vector<16x16xbf16>
    %cst_15 = arith.constant dense<0.000000e+00> : vector<16x8xf32>
    %28 = tpu.matmul %27, %13, %cst_15 {dimension_numbers = #tpu.dot_dimension_numbers<[1], [0], [0], [1], [0, 0, 1, 1], [], []>} : vector<16x16xbf16>, vector<16x8xbf16>, vector<16x8xf32> -> vector<16x8xf32>
    %29 = arith.truncf %28 : vector<16x8xf32> to vector<16x8xbf16>
    %c0_16 = arith.constant 0 : index
    %c0_17 = arith.constant 0 : index
    %30 = vector.load %arg5[%c0_16, %c0_17] : memref<32x32xbf16, #tpu.memory_space<vmem>>, vector<8x32xbf16>
    %cst_18 = arith.constant dense<0.000000e+00> : vector<16x32xf32>
    %31 = tpu.matmul %29, %30, %cst_18 {dimension_numbers = #tpu.dot_dimension_numbers<[1], [0], [0], [1], [0, 0, 1, 1], [], []>} : vector<16x8xbf16>, vector<8x32xbf16>, vector<16x32xf32> -> vector<16x32xf32>
    %32 = arith.addf %10, %31 : vector<16x32xf32>
    %33 = vector.extract_strided_slice %1 {offsets = [0, 8], sizes = [16, 8], strides = [1, 1]} : vector<16x32xbf16> to vector<16x8xbf16>
    %34 = vector.extract_strided_slice %3 {offsets = [0, 8], sizes = [16, 8], strides = [1, 1]} : vector<16x64xbf16> to vector<16x8xbf16>
    %35 = vector.extract_strided_slice %3 {offsets = [0, 40], sizes = [16, 8], strides = [1, 1]} : vector<16x64xbf16> to vector<16x8xbf16>
    %cst_19 = arith.constant dense<0.000000e+00> : vector<16x16xf32>
    %36 = tpu.matmul %33, %34, %cst_19 {dimension_numbers = #tpu.dot_dimension_numbers<[1], [1], [0], [0], [0, 0, 1, 0], [], []>} : vector<16x8xbf16>, vector<16x8xbf16>, vector<16x16xf32> -> vector<16x16xf32>
    %37 = vector.broadcast %5 : vector<1x16xf32> to vector<16x16xf32>
    %38 = arith.addf %36, %37 : vector<16x16xf32>
    %cst_20 = arith.constant dense<0xFF800000> : vector<16xf32>
    %39 = vector.multi_reduction <maximumf>, %38, %cst_20 [1] : vector<16x16xf32> to vector<16xf32>
    %40 = vector.shape_cast %39 : vector<16xf32> to vector<16x1xf32>
    %41 = vector.broadcast %40 : vector<16x1xf32> to vector<16x16xf32>
    %42 = arith.subf %38, %41 : vector<16x16xf32>
    %43 = math.exp %42 : vector<16x16xf32>
    %cst_21 = arith.constant dense<0.000000e+00> : vector<16xf32>
    %44 = vector.multi_reduction <add>, %43, %cst_21 [1] : vector<16x16xf32> to vector<16xf32>
    %45 = vector.shape_cast %44 : vector<16xf32> to vector<16x1xf32>
    %46 = tpu.reciprocal %45 {approx = true} : vector<16x1xf32> -> vector<16x1xf32>
    %47 = vector.broadcast %46 : vector<16x1xf32> to vector<16x16xf32>
    %48 = arith.mulf %43, %47 : vector<16x16xf32>
    %49 = arith.truncf %48 : vector<16x16xf32> to vector<16x16xbf16>
    %cst_22 = arith.constant dense<0.000000e+00> : vector<16x8xf32>
    %50 = tpu.matmul %49, %35, %cst_22 {dimension_numbers = #tpu.dot_dimension_numbers<[1], [0], [0], [1], [0, 0, 1, 1], [], []>} : vector<16x16xbf16>, vector<16x8xbf16>, vector<16x8xf32> -> vector<16x8xf32>
    %51 = arith.truncf %50 : vector<16x8xf32> to vector<16x8xbf16>
    %c8 = arith.constant 8 : index
    %c0_23 = arith.constant 0 : index
    %52 = vector.load %arg5[%c8, %c0_23] : memref<32x32xbf16, #tpu.memory_space<vmem>>, vector<8x32xbf16>
    %cst_24 = arith.constant dense<0.000000e+00> : vector<16x32xf32>
    %53 = tpu.matmul %51, %52, %cst_24 {dimension_numbers = #tpu.dot_dimension_numbers<[1], [0], [0], [1], [0, 0, 1, 1], [], []>} : vector<16x8xbf16>, vector<8x32xbf16>, vector<16x32xf32> -> vector<16x32xf32>
    %54 = arith.addf %32, %53 : vector<16x32xf32>
    %55 = vector.extract_strided_slice %1 {offsets = [0, 16], sizes = [16, 8], strides = [1, 1]} : vector<16x32xbf16> to vector<16x8xbf16>
    %56 = vector.extract_strided_slice %3 {offsets = [0, 16], sizes = [16, 8], strides = [1, 1]} : vector<16x64xbf16> to vector<16x8xbf16>
    %57 = vector.extract_strided_slice %3 {offsets = [0, 48], sizes = [16, 8], strides = [1, 1]} : vector<16x64xbf16> to vector<16x8xbf16>
    %cst_25 = arith.constant dense<0.000000e+00> : vector<16x16xf32>
    %58 = tpu.matmul %55, %56, %cst_25 {dimension_numbers = #tpu.dot_dimension_numbers<[1], [1], [0], [0], [0, 0, 1, 0], [], []>} : vector<16x8xbf16>, vector<16x8xbf16>, vector<16x16xf32> -> vector<16x16xf32>
    %59 = vector.broadcast %5 : vector<1x16xf32> to vector<16x16xf32>
    %60 = arith.addf %58, %59 : vector<16x16xf32>
    %cst_26 = arith.constant dense<0xFF800000> : vector<16xf32>
    %61 = vector.multi_reduction <maximumf>, %60, %cst_26 [1] : vector<16x16xf32> to vector<16xf32>
    %62 = vector.shape_cast %61 : vector<16xf32> to vector<16x1xf32>
    %63 = vector.broadcast %62 : vector<16x1xf32> to vector<16x16xf32>
    %64 = arith.subf %60, %63 : vector<16x16xf32>
    %65 = math.exp %64 : vector<16x16xf32>
    %cst_27 = arith.constant dense<0.000000e+00> : vector<16xf32>
    %66 = vector.multi_reduction <add>, %65, %cst_27 [1] : vector<16x16xf32> to vector<16xf32>
    %67 = vector.shape_cast %66 : vector<16xf32> to vector<16x1xf32>
    %68 = tpu.reciprocal %67 {approx = true} : vector<16x1xf32> -> vector<16x1xf32>
    %69 = vector.broadcast %68 : vector<16x1xf32> to vector<16x16xf32>
    %70 = arith.mulf %65, %69 : vector<16x16xf32>
    %71 = arith.truncf %70 : vector<16x16xf32> to vector<16x16xbf16>
    %cst_28 = arith.constant dense<0.000000e+00> : vector<16x8xf32>
    %72 = tpu.matmul %71, %57, %cst_28 {dimension_numbers = #tpu.dot_dimension_numbers<[1], [0], [0], [1], [0, 0, 1, 1], [], []>} : vector<16x16xbf16>, vector<16x8xbf16>, vector<16x8xf32> -> vector<16x8xf32>
    %73 = arith.truncf %72 : vector<16x8xf32> to vector<16x8xbf16>
    %c16 = arith.constant 16 : index
    %c0_29 = arith.constant 0 : index
    %74 = vector.load %arg5[%c16, %c0_29] : memref<32x32xbf16, #tpu.memory_space<vmem>>, vector<8x32xbf16>
    %cst_30 = arith.constant dense<0.000000e+00> : vector<16x32xf32>
    %75 = tpu.matmul %73, %74, %cst_30 {dimension_numbers = #tpu.dot_dimension_numbers<[1], [0], [0], [1], [0, 0, 1, 1], [], []>} : vector<16x8xbf16>, vector<8x32xbf16>, vector<16x32xf32> -> vector<16x32xf32>
    %76 = arith.addf %54, %75 : vector<16x32xf32>
    %77 = vector.extract_strided_slice %1 {offsets = [0, 24], sizes = [16, 8], strides = [1, 1]} : vector<16x32xbf16> to vector<16x8xbf16>
    %78 = vector.extract_strided_slice %3 {offsets = [0, 24], sizes = [16, 8], strides = [1, 1]} : vector<16x64xbf16> to vector<16x8xbf16>
    %79 = vector.extract_strided_slice %3 {offsets = [0, 56], sizes = [16, 8], strides = [1, 1]} : vector<16x64xbf16> to vector<16x8xbf16>
    %cst_31 = arith.constant dense<0.000000e+00> : vector<16x16xf32>
    %80 = tpu.matmul %77, %78, %cst_31 {dimension_numbers = #tpu.dot_dimension_numbers<[1], [1], [0], [0], [0, 0, 1, 0], [], []>} : vector<16x8xbf16>, vector<16x8xbf16>, vector<16x16xf32> -> vector<16x16xf32>
    %81 = vector.broadcast %5 : vector<1x16xf32> to vector<16x16xf32>
    %82 = arith.addf %80, %81 : vector<16x16xf32>
    %cst_32 = arith.constant dense<0xFF800000> : vector<16xf32>
    %83 = vector.multi_reduction <maximumf>, %82, %cst_32 [1] : vector<16x16xf32> to vector<16xf32>
    %84 = vector.shape_cast %83 : vector<16xf32> to vector<16x1xf32>
    %85 = vector.broadcast %84 : vector<16x1xf32> to vector<16x16xf32>
    %86 = arith.subf %82, %85 : vector<16x16xf32>
    %87 = math.exp %86 : vector<16x16xf32>
    %cst_33 = arith.constant dense<0.000000e+00> : vector<16xf32>
    %88 = vector.multi_reduction <add>, %87, %cst_33 [1] : vector<16x16xf32> to vector<16xf32>
    %89 = vector.shape_cast %88 : vector<16xf32> to vector<16x1xf32>
    %90 = tpu.reciprocal %89 {approx = true} : vector<16x1xf32> -> vector<16x1xf32>
    %91 = vector.broadcast %90 : vector<16x1xf32> to vector<16x16xf32>
    %92 = arith.mulf %87, %91 : vector<16x16xf32>
    %93 = arith.truncf %92 : vector<16x16xf32> to vector<16x16xbf16>
    %cst_34 = arith.constant dense<0.000000e+00> : vector<16x8xf32>
    %94 = tpu.matmul %93, %79, %cst_34 {dimension_numbers = #tpu.dot_dimension_numbers<[1], [0], [0], [1], [0, 0, 1, 1], [], []>} : vector<16x16xbf16>, vector<16x8xbf16>, vector<16x8xf32> -> vector<16x8xf32>
    %95 = arith.truncf %94 : vector<16x8xf32> to vector<16x8xbf16>
    %c24 = arith.constant 24 : index
    %c0_35 = arith.constant 0 : index
    %96 = vector.load %arg5[%c24, %c0_35] : memref<32x32xbf16, #tpu.memory_space<vmem>>, vector<8x32xbf16>
    %cst_36 = arith.constant dense<0.000000e+00> : vector<16x32xf32>
    %97 = tpu.matmul %95, %96, %cst_36 {dimension_numbers = #tpu.dot_dimension_numbers<[1], [0], [0], [1], [0, 0, 1, 1], [], []>} : vector<16x8xbf16>, vector<8x32xbf16>, vector<16x32xf32> -> vector<16x32xf32>
    %98 = arith.addf %76, %97 : vector<16x32xf32>
    %c0_37 = arith.constant 0 : index
    %c0_38 = arith.constant 0 : index
    %c0_39 = arith.constant 0 : index
    %99 = vector.load %arg8[%c0_37, %c0_38, %c0_39] : memref<1x16x32xf32, #tpu.memory_space<vmem>>, vector<1x16x32xf32>
    %100 = vector.shape_cast %99 : vector<1x16x32xf32> to vector<16x32xf32>
    %101 = vector.shape_cast %98 : vector<16x32xf32> to vector<1x16x32xf32>
    tpu.vector_store %arg8[%c0_37, %c0_38, %c0_39], %101 {strides = array<i32>} : memref<1x16x32xf32, #tpu.memory_space<vmem>>, vector<1x16x32xf32>,
    return
  }
  func.func @transform_0(%arg0: i32, %arg1: i32) -> (i32, i32, i32) {
    %c0_i32 = arith.constant 0 : i32
    %c0_i32_0 = arith.constant 0 : i32
    return %arg0, %arg1, %c0_i32 : i32, i32, i32
  }
  func.func @transform_1(%arg0: i32, %arg1: i32) -> (i32, i32, i32) {
    %c0_i32 = arith.constant 0 : i32
    %c0_i32_0 = arith.constant 0 : i32
    %c0_i32_1 = arith.constant 0 : i32
    return %arg0, %c0_i32, %c0_i32_0 : i32, i32, i32
  }
  func.func @transform_2(%arg0: i32, %arg1: i32) -> (i32, i32, i32) {
    %c0_i32 = arith.constant 0 : i32
    %c0_i32_0 = arith.constant 0 : i32
    %c0_i32_1 = arith.constant 0 : i32
    return %arg0, %c0_i32, %c0_i32_0 : i32, i32, i32
  }
  func.func @transform_3(%arg0: i32, %arg1: i32) -> (i32, i32) {
    %c0_i32 = arith.constant 0 : i32
    %c0_i32_0 = arith.constant 0 : i32
    %c0_i32_1 = arith.constant 0 : i32
    return %c0_i32, %c0_i32_0 : i32, i32
  }
  func.func @transform_4(%arg0: i32, %arg1: i32) -> (i32, i32) {
    %c0_i32 = arith.constant 0 : i32
    %c0_i32_0 = arith.constant 0 : i32
    %c0_i32_1 = arith.constant 0 : i32
    return %c0_i32, %c0_i32_0 : i32, i32
  }
  func.func @transform_5(%arg0: i32, %arg1: i32) -> (i32, i32, i32) {
    %c0_i32 = arith.constant 0 : i32
    %c0_i32_0 = arith.constant 0 : i32
    return %arg0, %arg1, %c0_i32 : i32, i32, i32
  }
  func.func @transform_6(%arg0: i32, %arg1: i32) -> (i32, i32, i32) {
    %c0_i32 = arith.constant 0 : i32
    %c0_i32_0 = arith.constant 0 : i32
    return %arg0, %arg1, %c0_i32 : i32, i32, i32
  }
}

module attributes {stable_mosaic.version = 11 : i64} {
  func.func @_norm_ffn_res_kernel(%arg0: i32, %arg1: memref<32x32xf32, #tpu.memory_space<vmem>>, %arg2: memref<1x32xf32, #tpu.memory_space<vmem>>, %arg3: memref<1x32xf32, #tpu.memory_space<vmem>>, %arg4: memref<32x64xbf16, #tpu.memory_space<vmem>>, %arg5: memref<1x64xf32, #tpu.memory_space<vmem>>, %arg6: memref<64x32xbf16, #tpu.memory_space<vmem>>, %arg7: memref<1x32xf32, #tpu.memory_space<vmem>>, %arg8: memref<32x32xf32, #tpu.memory_space<vmem>>) attributes {dimension_semantics = [#tpu.dimension_semantics<parallel>], iteration_bounds = array<i64: 1>, scalar_prefetch = 0 : i64, scratch_operands = 0 : i64, tpu.core_type = #tpu.core_type<tc>, window_params = [{transform_indices = @transform_0, window_bounds = array<i64: 32, 32>}, {pipeline_mode = #tpu.pipeline_mode<synchronous>, transform_indices = @transform_1, window_bounds = array<i64: 1, 32>}, {pipeline_mode = #tpu.pipeline_mode<synchronous>, transform_indices = @transform_2, window_bounds = array<i64: 1, 32>}, {pipeline_mode = #tpu.pipeline_mode<synchronous>, transform_indices = @transform_3, window_bounds = array<i64: 32, 64>}, {pipeline_mode = #tpu.pipeline_mode<synchronous>, transform_indices = @transform_4, window_bounds = array<i64: 1, 64>}, {pipeline_mode = #tpu.pipeline_mode<synchronous>, transform_indices = @transform_5, window_bounds = array<i64: 64, 32>}, {pipeline_mode = #tpu.pipeline_mode<synchronous>, transform_indices = @transform_6, window_bounds = array<i64: 1, 32>}, {transform_indices = @transform_7, window_bounds = array<i64: 32, 32>}]} {
    %c0 = arith.constant 0 : index
    %c0_0 = arith.constant 0 : index
    %0 = vector.load %arg1[%c0, %c0_0] : memref<32x32xf32, #tpu.memory_space<vmem>>, vector<32x32xf32>
    %cst = arith.constant dense<0.000000e+00> : vector<32xf32>
    %1 = vector.multi_reduction <add>, %0, %cst [1] : vector<32x32xf32> to vector<32xf32>
    %2 = vector.shape_cast %1 : vector<32xf32> to vector<32x1xf32>
    %cst_1 = arith.constant 3.200000e+01 : f32
    %3 = vector.broadcast %cst_1 : f32 to vector<32x1xf32>
    %4 = arith.divf %2, %3 : vector<32x1xf32>
    %5 = vector.broadcast %4 : vector<32x1xf32> to vector<32x32xf32>
    %6 = arith.subf %0, %5 : vector<32x32xf32>
    %7 = arith.mulf %6, %6 : vector<32x32xf32>
    %cst_2 = arith.constant dense<0.000000e+00> : vector<32xf32>
    %8 = vector.multi_reduction <add>, %7, %cst_2 [1] : vector<32x32xf32> to vector<32xf32>
    %9 = vector.shape_cast %8 : vector<32xf32> to vector<32x1xf32>
    %cst_3 = arith.constant 3.200000e+01 : f32
    %10 = vector.broadcast %cst_3 : f32 to vector<32x1xf32>
    %11 = arith.divf %9, %10 : vector<32x1xf32>
    %12 = vector.broadcast %4 : vector<32x1xf32> to vector<32x32xf32>
    %13 = arith.subf %0, %12 : vector<32x32xf32>
    %cst_4 = arith.constant 9.99999974E-6 : f32
    %14 = vector.broadcast %cst_4 : f32 to vector<32x1xf32>
    %15 = arith.addf %11, %14 : vector<32x1xf32>
    %16 = math.rsqrt %15 : vector<32x1xf32>
    %17 = vector.broadcast %16 : vector<32x1xf32> to vector<32x32xf32>
    %18 = arith.mulf %13, %17 : vector<32x32xf32>
    %c0_5 = arith.constant 0 : index
    %c0_6 = arith.constant 0 : index
    %19 = vector.load %arg2[%c0_5, %c0_6] : memref<1x32xf32, #tpu.memory_space<vmem>>, vector<1x32xf32>
    %20 = vector.broadcast %19 : vector<1x32xf32> to vector<32x32xf32>
    %21 = arith.mulf %18, %20 : vector<32x32xf32>
    %c0_7 = arith.constant 0 : index
    %c0_8 = arith.constant 0 : index
    %22 = vector.load %arg3[%c0_7, %c0_8] : memref<1x32xf32, #tpu.memory_space<vmem>>, vector<1x32xf32>
    %23 = vector.broadcast %22 : vector<1x32xf32> to vector<32x32xf32>
    %24 = arith.addf %21, %23 : vector<32x32xf32>
    %25 = arith.truncf %24 : vector<32x32xf32> to vector<32x32xbf16>
    %c0_9 = arith.constant 0 : index
    %c0_10 = arith.constant 0 : index
    %26 = vector.load %arg4[%c0_9, %c0_10] : memref<32x64xbf16, #tpu.memory_space<vmem>>, vector<32x64xbf16>
    %cst_11 = arith.constant dense<0.000000e+00> : vector<32x64xf32>
    %27 = tpu.matmul %25, %26, %cst_11 {dimension_numbers = #tpu.dot_dimension_numbers<[1], [0], [0], [1], [0, 0, 1, 1], [], []>} : vector<32x32xbf16>, vector<32x64xbf16>, vector<32x64xf32> -> vector<32x64xf32>
    %c0_12 = arith.constant 0 : index
    %c0_13 = arith.constant 0 : index
    %28 = vector.load %arg5[%c0_12, %c0_13] : memref<1x64xf32, #tpu.memory_space<vmem>>, vector<1x64xf32>
    %29 = vector.broadcast %28 : vector<1x64xf32> to vector<32x64xf32>
    %30 = arith.addf %27, %29 : vector<32x64xf32>
    %cst_14 = arith.constant 0.000000e+00 : f32
    %31 = vector.broadcast %cst_14 : f32 to vector<32x64xf32>
    %32 = arith.maximumf %30, %31 : vector<32x64xf32>
    %33 = arith.truncf %32 : vector<32x64xf32> to vector<32x64xbf16>
    %c0_15 = arith.constant 0 : index
    %c0_16 = arith.constant 0 : index
    %34 = vector.load %arg6[%c0_15, %c0_16] : memref<64x32xbf16, #tpu.memory_space<vmem>>, vector<64x32xbf16>
    %cst_17 = arith.constant dense<0.000000e+00> : vector<32x32xf32>
    %35 = tpu.matmul %33, %34, %cst_17 {dimension_numbers = #tpu.dot_dimension_numbers<[1], [0], [0], [1], [0, 0, 1, 1], [], []>} : vector<32x64xbf16>, vector<64x32xbf16>, vector<32x32xf32> -> vector<32x32xf32>
    %c0_18 = arith.constant 0 : index
    %c0_19 = arith.constant 0 : index
    %36 = vector.load %arg7[%c0_18, %c0_19] : memref<1x32xf32, #tpu.memory_space<vmem>>, vector<1x32xf32>
    %37 = vector.broadcast %36 : vector<1x32xf32> to vector<32x32xf32>
    %38 = arith.addf %35, %37 : vector<32x32xf32>
    %39 = arith.addf %0, %38 : vector<32x32xf32>
    %c0_20 = arith.constant 0 : index
    %c0_21 = arith.constant 0 : index
    %40 = vector.load %arg8[%c0_20, %c0_21] : memref<32x32xf32, #tpu.memory_space<vmem>>, vector<32x32xf32>
    tpu.vector_store %arg8[%c0_20, %c0_21], %39 {strides = array<i32>} : memref<32x32xf32, #tpu.memory_space<vmem>>, vector<32x32xf32>,
    return
  }
  func.func @transform_0(%arg0: i32) -> (i32, i32) {
    %c0_i32 = arith.constant 0 : i32
    %c0_i32_0 = arith.constant 0 : i32
    return %arg0, %c0_i32 : i32, i32
  }
  func.func @transform_1(%arg0: i32) -> (i32, i32) {
    %c0_i32 = arith.constant 0 : i32
    %c0_i32_0 = arith.constant 0 : i32
    %c0_i32_1 = arith.constant 0 : i32
    return %c0_i32, %c0_i32_0 : i32, i32
  }
  func.func @transform_2(%arg0: i32) -> (i32, i32) {
    %c0_i32 = arith.constant 0 : i32
    %c0_i32_0 = arith.constant 0 : i32
    %c0_i32_1 = arith.constant 0 : i32
    return %c0_i32, %c0_i32_0 : i32, i32
  }
  func.func @transform_3(%arg0: i32) -> (i32, i32) {
    %c0_i32 = arith.constant 0 : i32
    %c0_i32_0 = arith.constant 0 : i32
    %c0_i32_1 = arith.constant 0 : i32
    return %c0_i32, %c0_i32_0 : i32, i32
  }
  func.func @transform_4(%arg0: i32) -> (i32, i32) {
    %c0_i32 = arith.constant 0 : i32
    %c0_i32_0 = arith.constant 0 : i32
    %c0_i32_1 = arith.constant 0 : i32
    return %c0_i32, %c0_i32_0 : i32, i32
  }
  func.func @transform_5(%arg0: i32) -> (i32, i32) {
    %c0_i32 = arith.constant 0 : i32
    %c0_i32_0 = arith.constant 0 : i32
    %c0_i32_1 = arith.constant 0 : i32
    return %c0_i32, %c0_i32_0 : i32, i32
  }
  func.func @transform_6(%arg0: i32) -> (i32, i32) {
    %c0_i32 = arith.constant 0 : i32
    %c0_i32_0 = arith.constant 0 : i32
    %c0_i32_1 = arith.constant 0 : i32
    return %c0_i32, %c0_i32_0 : i32, i32
  }
  func.func @transform_7(%arg0: i32) -> (i32, i32) {
    %c0_i32 = arith.constant 0 : i32
    %c0_i32_0 = arith.constant 0 : i32
    return %arg0, %c0_i32 : i32, i32
  }
}

module attributes {stable_mosaic.version = 11 : i64} {
  func.func @_layernorm_kernel(%arg0: i32, %arg1: memref<32x32xf32, #tpu.memory_space<vmem>>, %arg2: memref<1x32xf32, #tpu.memory_space<vmem>>, %arg3: memref<1x32xf32, #tpu.memory_space<vmem>>, %arg4: memref<32x32xf32, #tpu.memory_space<vmem>>) attributes {dimension_semantics = [#tpu.dimension_semantics<parallel>], iteration_bounds = array<i64: 1>, scalar_prefetch = 0 : i64, scratch_operands = 0 : i64, tpu.core_type = #tpu.core_type<tc>, window_params = [{transform_indices = @transform_0, window_bounds = array<i64: 32, 32>}, {pipeline_mode = #tpu.pipeline_mode<synchronous>, transform_indices = @transform_1, window_bounds = array<i64: 1, 32>}, {pipeline_mode = #tpu.pipeline_mode<synchronous>, transform_indices = @transform_2, window_bounds = array<i64: 1, 32>}, {transform_indices = @transform_3, window_bounds = array<i64: 32, 32>}]} {
    %c0 = arith.constant 0 : index
    %c0_0 = arith.constant 0 : index
    %0 = vector.load %arg1[%c0, %c0_0] : memref<32x32xf32, #tpu.memory_space<vmem>>, vector<32x32xf32>
    %cst = arith.constant dense<0.000000e+00> : vector<32xf32>
    %1 = vector.multi_reduction <add>, %0, %cst [1] : vector<32x32xf32> to vector<32xf32>
    %2 = vector.shape_cast %1 : vector<32xf32> to vector<32x1xf32>
    %cst_1 = arith.constant 3.200000e+01 : f32
    %3 = vector.broadcast %cst_1 : f32 to vector<32x1xf32>
    %4 = arith.divf %2, %3 : vector<32x1xf32>
    %5 = vector.broadcast %4 : vector<32x1xf32> to vector<32x32xf32>
    %6 = arith.subf %0, %5 : vector<32x32xf32>
    %7 = arith.mulf %6, %6 : vector<32x32xf32>
    %cst_2 = arith.constant dense<0.000000e+00> : vector<32xf32>
    %8 = vector.multi_reduction <add>, %7, %cst_2 [1] : vector<32x32xf32> to vector<32xf32>
    %9 = vector.shape_cast %8 : vector<32xf32> to vector<32x1xf32>
    %cst_3 = arith.constant 3.200000e+01 : f32
    %10 = vector.broadcast %cst_3 : f32 to vector<32x1xf32>
    %11 = arith.divf %9, %10 : vector<32x1xf32>
    %12 = vector.broadcast %4 : vector<32x1xf32> to vector<32x32xf32>
    %13 = arith.subf %0, %12 : vector<32x32xf32>
    %cst_4 = arith.constant 9.99999974E-6 : f32
    %14 = vector.broadcast %cst_4 : f32 to vector<32x1xf32>
    %15 = arith.addf %11, %14 : vector<32x1xf32>
    %16 = math.rsqrt %15 : vector<32x1xf32>
    %17 = vector.broadcast %16 : vector<32x1xf32> to vector<32x32xf32>
    %18 = arith.mulf %13, %17 : vector<32x32xf32>
    %c0_5 = arith.constant 0 : index
    %c0_6 = arith.constant 0 : index
    %19 = vector.load %arg2[%c0_5, %c0_6] : memref<1x32xf32, #tpu.memory_space<vmem>>, vector<1x32xf32>
    %20 = vector.broadcast %19 : vector<1x32xf32> to vector<32x32xf32>
    %21 = arith.mulf %18, %20 : vector<32x32xf32>
    %c0_7 = arith.constant 0 : index
    %c0_8 = arith.constant 0 : index
    %22 = vector.load %arg3[%c0_7, %c0_8] : memref<1x32xf32, #tpu.memory_space<vmem>>, vector<1x32xf32>
    %23 = vector.broadcast %22 : vector<1x32xf32> to vector<32x32xf32>
    %24 = arith.addf %21, %23 : vector<32x32xf32>
    %c0_9 = arith.constant 0 : index
    %c0_10 = arith.constant 0 : index
    %25 = vector.load %arg4[%c0_9, %c0_10] : memref<32x32xf32, #tpu.memory_space<vmem>>, vector<32x32xf32>
    tpu.vector_store %arg4[%c0_9, %c0_10], %24 {strides = array<i32>} : memref<32x32xf32, #tpu.memory_space<vmem>>, vector<32x32xf32>,
    return
  }
  func.func @transform_0(%arg0: i32) -> (i32, i32) {
    %c0_i32 = arith.constant 0 : i32
    %c0_i32_0 = arith.constant 0 : i32
    return %arg0, %c0_i32 : i32, i32
  }
  func.func @transform_1(%arg0: i32) -> (i32, i32) {
    %c0_i32 = arith.constant 0 : i32
    %c0_i32_0 = arith.constant 0 : i32
    %c0_i32_1 = arith.constant 0 : i32
    return %c0_i32, %c0_i32_0 : i32, i32
  }
  func.func @transform_2(%arg0: i32) -> (i32, i32) {
    %c0_i32 = arith.constant 0 : i32
    %c0_i32_0 = arith.constant 0 : i32
    %c0_i32_1 = arith.constant 0 : i32
    return %c0_i32, %c0_i32_0 : i32, i32
  }
  func.func @transform_3(%arg0: i32) -> (i32, i32) {
    %c0_i32 = arith.constant 0 : i32
    %c0_i32_0 = arith.constant 0 : i32
    return %arg0, %c0_i32 : i32, i32
  }
}

module attributes {stable_mosaic.version = 11 : i64} {
  func.func @_linear_kernel(%arg0: i32, %arg1: i32, %arg2: memref<32x32xf32, #tpu.memory_space<vmem>>, %arg3: memref<32x64xbf16, #tpu.memory_space<vmem>>, %arg4: memref<1x64xf32, #tpu.memory_space<vmem>>, %arg5: memref<32x64xbf16, #tpu.memory_space<vmem>>) attributes {dimension_semantics = [#tpu.dimension_semantics<parallel>, #tpu.dimension_semantics<parallel>], iteration_bounds = array<i64: 1, 1>, scalar_prefetch = 0 : i64, scratch_operands = 0 : i64, tpu.core_type = #tpu.core_type<tc>, window_params = [{transform_indices = @transform_0, window_bounds = array<i64: 32, 32>}, {transform_indices = @transform_1, window_bounds = array<i64: 32, 64>}, {transform_indices = @transform_2, window_bounds = array<i64: 1, 64>}, {transform_indices = @transform_3, window_bounds = array<i64: 32, 64>}]} {
    %c0 = arith.constant 0 : index
    %c0_0 = arith.constant 0 : index
    %0 = vector.load %arg2[%c0, %c0_0] : memref<32x32xf32, #tpu.memory_space<vmem>>, vector<32x32xf32>
    %1 = arith.truncf %0 : vector<32x32xf32> to vector<32x32xbf16>
    %c0_1 = arith.constant 0 : index
    %c0_2 = arith.constant 0 : index
    %2 = vector.load %arg3[%c0_1, %c0_2] : memref<32x64xbf16, #tpu.memory_space<vmem>>, vector<32x64xbf16>
    %cst = arith.constant dense<0.000000e+00> : vector<32x64xf32>
    %3 = tpu.matmul %1, %2, %cst {dimension_numbers = #tpu.dot_dimension_numbers<[1], [0], [0], [1], [0, 0, 1, 1], [], []>} : vector<32x32xbf16>, vector<32x64xbf16>, vector<32x64xf32> -> vector<32x64xf32>
    %c0_3 = arith.constant 0 : index
    %c0_4 = arith.constant 0 : index
    %4 = vector.load %arg4[%c0_3, %c0_4] : memref<1x64xf32, #tpu.memory_space<vmem>>, vector<1x64xf32>
    %5 = vector.broadcast %4 : vector<1x64xf32> to vector<32x64xf32>
    %6 = arith.addf %3, %5 : vector<32x64xf32>
    %7 = arith.truncf %6 : vector<32x64xf32> to vector<32x64xbf16>
    %c0_5 = arith.constant 0 : index
    %c0_6 = arith.constant 0 : index
    %8 = vector.load %arg5[%c0_5, %c0_6] : memref<32x64xbf16, #tpu.memory_space<vmem>>, vector<32x64xbf16>
    tpu.vector_store %arg5[%c0_5, %c0_6], %7 {strides = array<i32>} : memref<32x64xbf16, #tpu.memory_space<vmem>>, vector<32x64xbf16>,
    return
  }
  func.func @transform_0(%arg0: i32, %arg1: i32) -> (i32, i32) {
    %c0_i32 = arith.constant 0 : i32
    %c0_i32_0 = arith.constant 0 : i32
    return %arg1, %c0_i32 : i32, i32
  }
  func.func @transform_1(%arg0: i32, %arg1: i32) -> (i32, i32) {
    %c0_i32 = arith.constant 0 : i32
    %c0_i32_0 = arith.constant 0 : i32
    return %c0_i32, %arg0 : i32, i32
  }
  func.func @transform_2(%arg0: i32, %arg1: i32) -> (i32, i32) {
    %c0_i32 = arith.constant 0 : i32
    %c0_i32_0 = arith.constant 0 : i32
    return %c0_i32, %arg0 : i32, i32
  }
  func.func @transform_3(%arg0: i32, %arg1: i32) -> (i32, i32) {
    %c0_i32 = arith.constant 0 : i32
    return %arg1, %arg0 : i32, i32
  }
}

module attributes {stable_mosaic.version = 11 : i64} {
  func.func @_norm_qkv_kernel(%arg0: i32, %arg1: memref<16x32xf32, #tpu.memory_space<vmem>>, %arg2: memref<1x32xf32, #tpu.memory_space<vmem>>, %arg3: memref<1x32xf32, #tpu.memory_space<vmem>>, %arg4: memref<32x32xbf16, #tpu.memory_space<vmem>>, %arg5: memref<1x32xf32, #tpu.memory_space<vmem>>, %arg6: memref<32x64xbf16, #tpu.memory_space<vmem>>, %arg7: memref<1x64xf32, #tpu.memory_space<vmem>>, %arg8: memref<16x32xbf16, #tpu.memory_space<vmem>>, %arg9: memref<16x64xbf16, #tpu.memory_space<vmem>>) attributes {dimension_semantics = [#tpu.dimension_semantics<parallel>], iteration_bounds = array<i64: 1>, scalar_prefetch = 0 : i64, scratch_operands = 0 : i64, tpu.core_type = #tpu.core_type<tc>, window_params = [{transform_indices = @transform_0, window_bounds = array<i64: 16, 32>}, {pipeline_mode = #tpu.pipeline_mode<synchronous>, transform_indices = @transform_1, window_bounds = array<i64: 1, 32>}, {pipeline_mode = #tpu.pipeline_mode<synchronous>, transform_indices = @transform_2, window_bounds = array<i64: 1, 32>}, {pipeline_mode = #tpu.pipeline_mode<synchronous>, transform_indices = @transform_3, window_bounds = array<i64: 32, 32>}, {pipeline_mode = #tpu.pipeline_mode<synchronous>, transform_indices = @transform_4, window_bounds = array<i64: 1, 32>}, {pipeline_mode = #tpu.pipeline_mode<synchronous>, transform_indices = @transform_5, window_bounds = array<i64: 32, 64>}, {pipeline_mode = #tpu.pipeline_mode<synchronous>, transform_indices = @transform_6, window_bounds = array<i64: 1, 64>}, {transform_indices = @transform_7, window_bounds = array<i64: 16, 32>}, {transform_indices = @transform_8, window_bounds = array<i64: 16, 64>}]} {
    %c0 = arith.constant 0 : index
    %c0_0 = arith.constant 0 : index
    %0 = vector.load %arg1[%c0, %c0_0] : memref<16x32xf32, #tpu.memory_space<vmem>>, vector<16x32xf32>
    %cst = arith.constant dense<0.000000e+00> : vector<16xf32>
    %1 = vector.multi_reduction <add>, %0, %cst [1] : vector<16x32xf32> to vector<16xf32>
    %2 = vector.shape_cast %1 : vector<16xf32> to vector<16x1xf32>
    %cst_1 = arith.constant 3.200000e+01 : f32
    %3 = vector.broadcast %cst_1 : f32 to vector<16x1xf32>
    %4 = arith.divf %2, %3 : vector<16x1xf32>
    %5 = vector.broadcast %4 : vector<16x1xf32> to vector<16x32xf32>
    %6 = arith.subf %0, %5 : vector<16x32xf32>
    %7 = arith.mulf %6, %6 : vector<16x32xf32>
    %cst_2 = arith.constant dense<0.000000e+00> : vector<16xf32>
    %8 = vector.multi_reduction <add>, %7, %cst_2 [1] : vector<16x32xf32> to vector<16xf32>
    %9 = vector.shape_cast %8 : vector<16xf32> to vector<16x1xf32>
    %cst_3 = arith.constant 3.200000e+01 : f32
    %10 = vector.broadcast %cst_3 : f32 to vector<16x1xf32>
    %11 = arith.divf %9, %10 : vector<16x1xf32>
    %12 = vector.broadcast %4 : vector<16x1xf32> to vector<16x32xf32>
    %13 = arith.subf %0, %12 : vector<16x32xf32>
    %cst_4 = arith.constant 9.99999974E-6 : f32
    %14 = vector.broadcast %cst_4 : f32 to vector<16x1xf32>
    %15 = arith.addf %11, %14 : vector<16x1xf32>
    %16 = math.rsqrt %15 : vector<16x1xf32>
    %17 = vector.broadcast %16 : vector<16x1xf32> to vector<16x32xf32>
    %18 = arith.mulf %13, %17 : vector<16x32xf32>
    %c0_5 = arith.constant 0 : index
    %c0_6 = arith.constant 0 : index
    %19 = vector.load %arg2[%c0_5, %c0_6] : memref<1x32xf32, #tpu.memory_space<vmem>>, vector<1x32xf32>
    %20 = vector.broadcast %19 : vector<1x32xf32> to vector<16x32xf32>
    %21 = arith.mulf %18, %20 : vector<16x32xf32>
    %c0_7 = arith.constant 0 : index
    %c0_8 = arith.constant 0 : index
    %22 = vector.load %arg3[%c0_7, %c0_8] : memref<1x32xf32, #tpu.memory_space<vmem>>, vector<1x32xf32>
    %23 = vector.broadcast %22 : vector<1x32xf32> to vector<16x32xf32>
    %24 = arith.addf %21, %23 : vector<16x32xf32>
    %25 = arith.truncf %24 : vector<16x32xf32> to vector<16x32xbf16>
    %c0_9 = arith.constant 0 : index
    %c0_10 = arith.constant 0 : index
    %26 = vector.load %arg4[%c0_9, %c0_10] : memref<32x32xbf16, #tpu.memory_space<vmem>>, vector<32x32xbf16>
    %cst_11 = arith.constant dense<0.000000e+00> : vector<16x32xf32>
    %27 = tpu.matmul %25, %26, %cst_11 {dimension_numbers = #tpu.dot_dimension_numbers<[1], [0], [0], [1], [0, 0, 1, 1], [], []>} : vector<16x32xbf16>, vector<32x32xbf16>, vector<16x32xf32> -> vector<16x32xf32>
    %c0_12 = arith.constant 0 : index
    %c0_13 = arith.constant 0 : index
    %28 = vector.load %arg5[%c0_12, %c0_13] : memref<1x32xf32, #tpu.memory_space<vmem>>, vector<1x32xf32>
    %29 = vector.broadcast %28 : vector<1x32xf32> to vector<16x32xf32>
    %30 = arith.addf %27, %29 : vector<16x32xf32>
    %31 = arith.truncf %30 : vector<16x32xf32> to vector<16x32xbf16>
    %c0_14 = arith.constant 0 : index
    %c0_15 = arith.constant 0 : index
    %32 = vector.load %arg8[%c0_14, %c0_15] : memref<16x32xbf16, #tpu.memory_space<vmem>>, vector<16x32xbf16>
    tpu.vector_store %arg8[%c0_14, %c0_15], %31 {strides = array<i32>} : memref<16x32xbf16, #tpu.memory_space<vmem>>, vector<16x32xbf16>,
    %c0_16 = arith.constant 0 : index
    %c0_17 = arith.constant 0 : index
    %33 = vector.load %arg6[%c0_16, %c0_17] : memref<32x64xbf16, #tpu.memory_space<vmem>>, vector<32x64xbf16>
    %cst_18 = arith.constant dense<0.000000e+00> : vector<16x64xf32>
    %34 = tpu.matmul %25, %33, %cst_18 {dimension_numbers = #tpu.dot_dimension_numbers<[1], [0], [0], [1], [0, 0, 1, 1], [], []>} : vector<16x32xbf16>, vector<32x64xbf16>, vector<16x64xf32> -> vector<16x64xf32>
    %c0_19 = arith.constant 0 : index
    %c0_20 = arith.constant 0 : index
    %35 = vector.load %arg7[%c0_19, %c0_20] : memref<1x64xf32, #tpu.memory_space<vmem>>, vector<1x64xf32>
    %36 = vector.broadcast %35 : vector<1x64xf32> to vector<16x64xf32>
    %37 = arith.addf %34, %36 : vector<16x64xf32>
    %38 = arith.truncf %37 : vector<16x64xf32> to vector<16x64xbf16>
    %c0_21 = arith.constant 0 : index
    %c0_22 = arith.constant 0 : index
    %39 = vector.load %arg9[%c0_21, %c0_22] : memref<16x64xbf16, #tpu.memory_space<vmem>>, vector<16x64xbf16>
    tpu.vector_store %arg9[%c0_21, %c0_22], %38 {strides = array<i32>} : memref<16x64xbf16, #tpu.memory_space<vmem>>, vector<16x64xbf16>,
    return
  }
  func.func @transform_0(%arg0: i32) -> (i32, i32) {
    %c0_i32 = arith.constant 0 : i32
    %c0_i32_0 = arith.constant 0 : i32
    return %arg0, %c0_i32 : i32, i32
  }
  func.func @transform_1(%arg0: i32) -> (i32, i32) {
    %c0_i32 = arith.constant 0 : i32
    %c0_i32_0 = arith.constant 0 : i32
    %c0_i32_1 = arith.constant 0 : i32
    return %c0_i32, %c0_i32_0 : i32, i32
  }
  func.func @transform_2(%arg0: i32) -> (i32, i32) {
    %c0_i32 = arith.constant 0 : i32
    %c0_i32_0 = arith.constant 0 : i32
    %c0_i32_1 = arith.constant 0 : i32
    return %c0_i32, %c0_i32_0 : i32, i32
  }
  func.func @transform_3(%arg0: i32) -> (i32, i32) {
    %c0_i32 = arith.constant 0 : i32
    %c0_i32_0 = arith.constant 0 : i32
    %c0_i32_1 = arith.constant 0 : i32
    return %c0_i32, %c0_i32_0 : i32, i32
  }
  func.func @transform_4(%arg0: i32) -> (i32, i32) {
    %c0_i32 = arith.constant 0 : i32
    %c0_i32_0 = arith.constant 0 : i32
    %c0_i32_1 = arith.constant 0 : i32
    return %c0_i32, %c0_i32_0 : i32, i32
  }
  func.func @transform_5(%arg0: i32) -> (i32, i32) {
    %c0_i32 = arith.constant 0 : i32
    %c0_i32_0 = arith.constant 0 : i32
    %c0_i32_1 = arith.constant 0 : i32
    return %c0_i32, %c0_i32_0 : i32, i32
  }
  func.func @transform_6(%arg0: i32) -> (i32, i32) {
    %c0_i32 = arith.constant 0 : i32
    %c0_i32_0 = arith.constant 0 : i32
    %c0_i32_1 = arith.constant 0 : i32
    return %c0_i32, %c0_i32_0 : i32, i32
  }
  func.func @transform_7(%arg0: i32) -> (i32, i32) {
    %c0_i32 = arith.constant 0 : i32
    %c0_i32_0 = arith.constant 0 : i32
    return %arg0, %c0_i32 : i32, i32
  }
  func.func @transform_8(%arg0: i32) -> (i32, i32) {
    %c0_i32 = arith.constant 0 : i32
    %c0_i32_0 = arith.constant 0 : i32
    return %arg0, %c0_i32 : i32, i32
  }
}

module attributes {stable_mosaic.version = 11 : i64} {
  func.func @_attn_kernel(%arg0: i32, %arg1: i32, %arg2: memref<1x8x32xbf16, #tpu.memory_space<vmem>>, %arg3: memref<1x8x64xbf16, #tpu.memory_space<vmem>>, %arg4: memref<1x1x8xf32, #tpu.memory_space<vmem>>, %arg5: memref<32x32xbf16, #tpu.memory_space<vmem>>, %arg6: memref<1x32xf32, #tpu.memory_space<vmem>>, %arg7: memref<1x8x32xf32, #tpu.memory_space<vmem>>, %arg8: memref<1x8x32xf32, #tpu.memory_space<vmem>>) attributes {dimension_semantics = [#tpu.dimension_semantics<parallel>, #tpu.dimension_semantics<parallel>], iteration_bounds = array<i64: 2, 1>, scalar_prefetch = 0 : i64, scratch_operands = 0 : i64, tpu.core_type = #tpu.core_type<tc>, window_params = [{transform_indices = @transform_0, window_bounds = array<i64: 1, 8, 32>}, {transform_indices = @transform_1, window_bounds = array<i64: 1, 8, 64>}, {transform_indices = @transform_2, window_bounds = array<i64: 1, 1, 8>}, {pipeline_mode = #tpu.pipeline_mode<synchronous>, transform_indices = @transform_3, window_bounds = array<i64: 32, 32>}, {pipeline_mode = #tpu.pipeline_mode<synchronous>, transform_indices = @transform_4, window_bounds = array<i64: 1, 32>}, {transform_indices = @transform_5, window_bounds = array<i64: 1, 8, 32>}, {transform_indices = @transform_6, window_bounds = array<i64: 1, 8, 32>}]} {
    %c0 = arith.constant 0 : index
    %c0_0 = arith.constant 0 : index
    %c0_1 = arith.constant 0 : index
    %0 = vector.load %arg2[%c0, %c0_0, %c0_1] : memref<1x8x32xbf16, #tpu.memory_space<vmem>>, vector<1x8x32xbf16>
    %1 = vector.shape_cast %0 : vector<1x8x32xbf16> to vector<8x32xbf16>
    %c0_2 = arith.constant 0 : index
    %c0_3 = arith.constant 0 : index
    %c0_4 = arith.constant 0 : index
    %2 = vector.load %arg3[%c0_2, %c0_3, %c0_4] : memref<1x8x64xbf16, #tpu.memory_space<vmem>>, vector<1x8x64xbf16>
    %3 = vector.shape_cast %2 : vector<1x8x64xbf16> to vector<8x64xbf16>
    %c0_5 = arith.constant 0 : index
    %c0_6 = arith.constant 0 : index
    %c0_7 = arith.constant 0 : index
    %4 = vector.load %arg4[%c0_5, %c0_6, %c0_7] : memref<1x1x8xf32, #tpu.memory_space<vmem>>, vector<1x1x8xf32>
    %5 = vector.shape_cast %4 : vector<1x1x8xf32> to vector<1x8xf32>
    %c8_i32 = arith.constant 8 : i32
    %6 = arith.muli %arg1, %c8_i32 : i32
    %7 = tpu.iota {dimensions = array<i32: 0>} : vector<8x8xi32>
    %8 = vector.broadcast %6 : i32 to vector<8x8xi32>
    %9 = arith.addi %7, %8 : vector<8x8xi32>
    %10 = tpu.iota {dimensions = array<i32: 1>} : vector<8x8xi32>
    %11 = arith.cmpi sgt, %10, %9 : vector<8x8xi32>
    %cst = arith.constant -1.000000e+09 : f32
    %cst_8 = arith.constant 0.000000e+00 : f32
    %12 = vector.broadcast %cst : f32 to vector<8x8xf32>
    %13 = vector.broadcast %cst_8 : f32 to vector<8x8xf32>
    %14 = arith.select %11, %12, %13 : vector<8x8xi1>, vector<8x8xf32>
    %15 = vector.broadcast %5 : vector<1x8xf32> to vector<8x8xf32>
    %16 = arith.addf %15, %14 : vector<8x8xf32>
    %c0_9 = arith.constant 0 : index
    %c0_10 = arith.constant 0 : index
    %c0_11 = arith.constant 0 : index
    %17 = vector.load %arg7[%c0_9, %c0_10, %c0_11] : memref<1x8x32xf32, #tpu.memory_space<vmem>>, vector<1x8x32xf32>
    %18 = vector.shape_cast %17 : vector<1x8x32xf32> to vector<8x32xf32>
    %c0_12 = arith.constant 0 : index
    %c0_13 = arith.constant 0 : index
    %19 = vector.load %arg6[%c0_12, %c0_13] : memref<1x32xf32, #tpu.memory_space<vmem>>, vector<1x32xf32>
    %20 = vector.broadcast %19 : vector<1x32xf32> to vector<8x32xf32>
    %21 = arith.addf %18, %20 : vector<8x32xf32>
    %22 = vector.extract_strided_slice %1 {offsets = [0, 0], sizes = [8, 8], strides = [1, 1]} : vector<8x32xbf16> to vector<8x8xbf16>
    %23 = vector.extract_strided_slice %3 {offsets = [0, 0], sizes = [8, 8], strides = [1, 1]} : vector<8x64xbf16> to vector<8x8xbf16>
    %24 = vector.extract_strided_slice %3 {offsets = [0, 32], sizes = [8, 8], strides = [1, 1]} : vector<8x64xbf16> to vector<8x8xbf16>
    %cst_14 = arith.constant dense<0.000000e+00> : vector<8x8xf32>
    %25 = tpu.matmul %22, %23, %cst_14 {dimension_numbers = #tpu.dot_dimension_numbers<[1], [1], [0], [0], [0, 0, 1, 0], [], []>} : vector<8x8xbf16>, vector<8x8xbf16>, vector<8x8xf32> -> vector<8x8xf32>
    %26 = arith.addf %25, %16 : vector<8x8xf32>
    %cst_15 = arith.constant dense<0xFF800000> : vector<8xf32>
    %27 = vector.multi_reduction <maximumf>, %26, %cst_15 [1] : vector<8x8xf32> to vector<8xf32>
    %28 = vector.shape_cast %27 : vector<8xf32> to vector<8x1xf32>
    %29 = vector.broadcast %28 : vector<8x1xf32> to vector<8x8xf32>
    %30 = arith.subf %26, %29 : vector<8x8xf32>
    %31 = math.exp %30 : vector<8x8xf32>
    %cst_16 = arith.constant dense<0.000000e+00> : vector<8xf32>
    %32 = vector.multi_reduction <add>, %31, %cst_16 [1] : vector<8x8xf32> to vector<8xf32>
    %33 = vector.shape_cast %32 : vector<8xf32> to vector<8x1xf32>
    %34 = tpu.reciprocal %33 {approx = true} : vector<8x1xf32> -> vector<8x1xf32>
    %35 = vector.broadcast %34 : vector<8x1xf32> to vector<8x8xf32>
    %36 = arith.mulf %31, %35 : vector<8x8xf32>
    %37 = arith.truncf %36 : vector<8x8xf32> to vector<8x8xbf16>
    %cst_17 = arith.constant dense<0.000000e+00> : vector<8x8xf32>
    %38 = tpu.matmul %37, %24, %cst_17 {dimension_numbers = #tpu.dot_dimension_numbers<[1], [0], [0], [1], [0, 0, 1, 1], [], []>} : vector<8x8xbf16>, vector<8x8xbf16>, vector<8x8xf32> -> vector<8x8xf32>
    %39 = arith.truncf %38 : vector<8x8xf32> to vector<8x8xbf16>
    %c0_18 = arith.constant 0 : index
    %c0_19 = arith.constant 0 : index
    %40 = vector.load %arg5[%c0_18, %c0_19] : memref<32x32xbf16, #tpu.memory_space<vmem>>, vector<8x32xbf16>
    %cst_20 = arith.constant dense<0.000000e+00> : vector<8x32xf32>
    %41 = tpu.matmul %39, %40, %cst_20 {dimension_numbers = #tpu.dot_dimension_numbers<[1], [0], [0], [1], [0, 0, 1, 1], [], []>} : vector<8x8xbf16>, vector<8x32xbf16>, vector<8x32xf32> -> vector<8x32xf32>
    %42 = arith.addf %21, %41 : vector<8x32xf32>
    %43 = vector.extract_strided_slice %1 {offsets = [0, 8], sizes = [8, 8], strides = [1, 1]} : vector<8x32xbf16> to vector<8x8xbf16>
    %44 = vector.extract_strided_slice %3 {offsets = [0, 8], sizes = [8, 8], strides = [1, 1]} : vector<8x64xbf16> to vector<8x8xbf16>
    %45 = vector.extract_strided_slice %3 {offsets = [0, 40], sizes = [8, 8], strides = [1, 1]} : vector<8x64xbf16> to vector<8x8xbf16>
    %cst_21 = arith.constant dense<0.000000e+00> : vector<8x8xf32>
    %46 = tpu.matmul %43, %44, %cst_21 {dimension_numbers = #tpu.dot_dimension_numbers<[1], [1], [0], [0], [0, 0, 1, 0], [], []>} : vector<8x8xbf16>, vector<8x8xbf16>, vector<8x8xf32> -> vector<8x8xf32>
    %47 = arith.addf %46, %16 : vector<8x8xf32>
    %cst_22 = arith.constant dense<0xFF800000> : vector<8xf32>
    %48 = vector.multi_reduction <maximumf>, %47, %cst_22 [1] : vector<8x8xf32> to vector<8xf32>
    %49 = vector.shape_cast %48 : vector<8xf32> to vector<8x1xf32>
    %50 = vector.broadcast %49 : vector<8x1xf32> to vector<8x8xf32>
    %51 = arith.subf %47, %50 : vector<8x8xf32>
    %52 = math.exp %51 : vector<8x8xf32>
    %cst_23 = arith.constant dense<0.000000e+00> : vector<8xf32>
    %53 = vector.multi_reduction <add>, %52, %cst_23 [1] : vector<8x8xf32> to vector<8xf32>
    %54 = vector.shape_cast %53 : vector<8xf32> to vector<8x1xf32>
    %55 = tpu.reciprocal %54 {approx = true} : vector<8x1xf32> -> vector<8x1xf32>
    %56 = vector.broadcast %55 : vector<8x1xf32> to vector<8x8xf32>
    %57 = arith.mulf %52, %56 : vector<8x8xf32>
    %58 = arith.truncf %57 : vector<8x8xf32> to vector<8x8xbf16>
    %cst_24 = arith.constant dense<0.000000e+00> : vector<8x8xf32>
    %59 = tpu.matmul %58, %45, %cst_24 {dimension_numbers = #tpu.dot_dimension_numbers<[1], [0], [0], [1], [0, 0, 1, 1], [], []>} : vector<8x8xbf16>, vector<8x8xbf16>, vector<8x8xf32> -> vector<8x8xf32>
    %60 = arith.truncf %59 : vector<8x8xf32> to vector<8x8xbf16>
    %c8 = arith.constant 8 : index
    %c0_25 = arith.constant 0 : index
    %61 = vector.load %arg5[%c8, %c0_25] : memref<32x32xbf16, #tpu.memory_space<vmem>>, vector<8x32xbf16>
    %cst_26 = arith.constant dense<0.000000e+00> : vector<8x32xf32>
    %62 = tpu.matmul %60, %61, %cst_26 {dimension_numbers = #tpu.dot_dimension_numbers<[1], [0], [0], [1], [0, 0, 1, 1], [], []>} : vector<8x8xbf16>, vector<8x32xbf16>, vector<8x32xf32> -> vector<8x32xf32>
    %63 = arith.addf %42, %62 : vector<8x32xf32>
    %64 = vector.extract_strided_slice %1 {offsets = [0, 16], sizes = [8, 8], strides = [1, 1]} : vector<8x32xbf16> to vector<8x8xbf16>
    %65 = vector.extract_strided_slice %3 {offsets = [0, 16], sizes = [8, 8], strides = [1, 1]} : vector<8x64xbf16> to vector<8x8xbf16>
    %66 = vector.extract_strided_slice %3 {offsets = [0, 48], sizes = [8, 8], strides = [1, 1]} : vector<8x64xbf16> to vector<8x8xbf16>
    %cst_27 = arith.constant dense<0.000000e+00> : vector<8x8xf32>
    %67 = tpu.matmul %64, %65, %cst_27 {dimension_numbers = #tpu.dot_dimension_numbers<[1], [1], [0], [0], [0, 0, 1, 0], [], []>} : vector<8x8xbf16>, vector<8x8xbf16>, vector<8x8xf32> -> vector<8x8xf32>
    %68 = arith.addf %67, %16 : vector<8x8xf32>
    %cst_28 = arith.constant dense<0xFF800000> : vector<8xf32>
    %69 = vector.multi_reduction <maximumf>, %68, %cst_28 [1] : vector<8x8xf32> to vector<8xf32>
    %70 = vector.shape_cast %69 : vector<8xf32> to vector<8x1xf32>
    %71 = vector.broadcast %70 : vector<8x1xf32> to vector<8x8xf32>
    %72 = arith.subf %68, %71 : vector<8x8xf32>
    %73 = math.exp %72 : vector<8x8xf32>
    %cst_29 = arith.constant dense<0.000000e+00> : vector<8xf32>
    %74 = vector.multi_reduction <add>, %73, %cst_29 [1] : vector<8x8xf32> to vector<8xf32>
    %75 = vector.shape_cast %74 : vector<8xf32> to vector<8x1xf32>
    %76 = tpu.reciprocal %75 {approx = true} : vector<8x1xf32> -> vector<8x1xf32>
    %77 = vector.broadcast %76 : vector<8x1xf32> to vector<8x8xf32>
    %78 = arith.mulf %73, %77 : vector<8x8xf32>
    %79 = arith.truncf %78 : vector<8x8xf32> to vector<8x8xbf16>
    %cst_30 = arith.constant dense<0.000000e+00> : vector<8x8xf32>
    %80 = tpu.matmul %79, %66, %cst_30 {dimension_numbers = #tpu.dot_dimension_numbers<[1], [0], [0], [1], [0, 0, 1, 1], [], []>} : vector<8x8xbf16>, vector<8x8xbf16>, vector<8x8xf32> -> vector<8x8xf32>
    %81 = arith.truncf %80 : vector<8x8xf32> to vector<8x8xbf16>
    %c16 = arith.constant 16 : index
    %c0_31 = arith.constant 0 : index
    %82 = vector.load %arg5[%c16, %c0_31] : memref<32x32xbf16, #tpu.memory_space<vmem>>, vector<8x32xbf16>
    %cst_32 = arith.constant dense<0.000000e+00> : vector<8x32xf32>
    %83 = tpu.matmul %81, %82, %cst_32 {dimension_numbers = #tpu.dot_dimension_numbers<[1], [0], [0], [1], [0, 0, 1, 1], [], []>} : vector<8x8xbf16>, vector<8x32xbf16>, vector<8x32xf32> -> vector<8x32xf32>
    %84 = arith.addf %63, %83 : vector<8x32xf32>
    %85 = vector.extract_strided_slice %1 {offsets = [0, 24], sizes = [8, 8], strides = [1, 1]} : vector<8x32xbf16> to vector<8x8xbf16>
    %86 = vector.extract_strided_slice %3 {offsets = [0, 24], sizes = [8, 8], strides = [1, 1]} : vector<8x64xbf16> to vector<8x8xbf16>
    %87 = vector.extract_strided_slice %3 {offsets = [0, 56], sizes = [8, 8], strides = [1, 1]} : vector<8x64xbf16> to vector<8x8xbf16>
    %cst_33 = arith.constant dense<0.000000e+00> : vector<8x8xf32>
    %88 = tpu.matmul %85, %86, %cst_33 {dimension_numbers = #tpu.dot_dimension_numbers<[1], [1], [0], [0], [0, 0, 1, 0], [], []>} : vector<8x8xbf16>, vector<8x8xbf16>, vector<8x8xf32> -> vector<8x8xf32>
    %89 = arith.addf %88, %16 : vector<8x8xf32>
    %cst_34 = arith.constant dense<0xFF800000> : vector<8xf32>
    %90 = vector.multi_reduction <maximumf>, %89, %cst_34 [1] : vector<8x8xf32> to vector<8xf32>
    %91 = vector.shape_cast %90 : vector<8xf32> to vector<8x1xf32>
    %92 = vector.broadcast %91 : vector<8x1xf32> to vector<8x8xf32>
    %93 = arith.subf %89, %92 : vector<8x8xf32>
    %94 = math.exp %93 : vector<8x8xf32>
    %cst_35 = arith.constant dense<0.000000e+00> : vector<8xf32>
    %95 = vector.multi_reduction <add>, %94, %cst_35 [1] : vector<8x8xf32> to vector<8xf32>
    %96 = vector.shape_cast %95 : vector<8xf32> to vector<8x1xf32>
    %97 = tpu.reciprocal %96 {approx = true} : vector<8x1xf32> -> vector<8x1xf32>
    %98 = vector.broadcast %97 : vector<8x1xf32> to vector<8x8xf32>
    %99 = arith.mulf %94, %98 : vector<8x8xf32>
    %100 = arith.truncf %99 : vector<8x8xf32> to vector<8x8xbf16>
    %cst_36 = arith.constant dense<0.000000e+00> : vector<8x8xf32>
    %101 = tpu.matmul %100, %87, %cst_36 {dimension_numbers = #tpu.dot_dimension_numbers<[1], [0], [0], [1], [0, 0, 1, 1], [], []>} : vector<8x8xbf16>, vector<8x8xbf16>, vector<8x8xf32> -> vector<8x8xf32>
    %102 = arith.truncf %101 : vector<8x8xf32> to vector<8x8xbf16>
    %c24 = arith.constant 24 : index
    %c0_37 = arith.constant 0 : index
    %103 = vector.load %arg5[%c24, %c0_37] : memref<32x32xbf16, #tpu.memory_space<vmem>>, vector<8x32xbf16>
    %cst_38 = arith.constant dense<0.000000e+00> : vector<8x32xf32>
    %104 = tpu.matmul %102, %103, %cst_38 {dimension_numbers = #tpu.dot_dimension_numbers<[1], [0], [0], [1], [0, 0, 1, 1], [], []>} : vector<8x8xbf16>, vector<8x32xbf16>, vector<8x32xf32> -> vector<8x32xf32>
    %105 = arith.addf %84, %104 : vector<8x32xf32>
    %c0_39 = arith.constant 0 : index
    %c0_40 = arith.constant 0 : index
    %c0_41 = arith.constant 0 : index
    %106 = vector.load %arg8[%c0_39, %c0_40, %c0_41] : memref<1x8x32xf32, #tpu.memory_space<vmem>>, vector<1x8x32xf32>
    %107 = vector.shape_cast %106 : vector<1x8x32xf32> to vector<8x32xf32>
    %108 = vector.shape_cast %105 : vector<8x32xf32> to vector<1x8x32xf32>
    tpu.vector_store %arg8[%c0_39, %c0_40, %c0_41], %108 {strides = array<i32>} : memref<1x8x32xf32, #tpu.memory_space<vmem>>, vector<1x8x32xf32>,
    return
  }
  func.func @transform_0(%arg0: i32, %arg1: i32) -> (i32, i32, i32) {
    %c0_i32 = arith.constant 0 : i32
    %c0_i32_0 = arith.constant 0 : i32
    return %arg0, %arg1, %c0_i32 : i32, i32, i32
  }
  func.func @transform_1(%arg0: i32, %arg1: i32) -> (i32, i32, i32) {
    %c0_i32 = arith.constant 0 : i32
    %c0_i32_0 = arith.constant 0 : i32
    %c0_i32_1 = arith.constant 0 : i32
    return %arg0, %c0_i32, %c0_i32_0 : i32, i32, i32
  }
  func.func @transform_2(%arg0: i32, %arg1: i32) -> (i32, i32, i32) {
    %c0_i32 = arith.constant 0 : i32
    %c0_i32_0 = arith.constant 0 : i32
    %c0_i32_1 = arith.constant 0 : i32
    return %arg0, %c0_i32, %c0_i32_0 : i32, i32, i32
  }
  func.func @transform_3(%arg0: i32, %arg1: i32) -> (i32, i32) {
    %c0_i32 = arith.constant 0 : i32
    %c0_i32_0 = arith.constant 0 : i32
    %c0_i32_1 = arith.constant 0 : i32
    return %c0_i32, %c0_i32_0 : i32, i32
  }
  func.func @transform_4(%arg0: i32, %arg1: i32) -> (i32, i32) {
    %c0_i32 = arith.constant 0 : i32
    %c0_i32_0 = arith.constant 0 : i32
    %c0_i32_1 = arith.constant 0 : i32
    return %c0_i32, %c0_i32_0 : i32, i32
  }
  func.func @transform_5(%arg0: i32, %arg1: i32) -> (i32, i32, i32) {
    %c0_i32 = arith.constant 0 : i32
    %c0_i32_0 = arith.constant 0 : i32
    return %arg0, %arg1, %c0_i32 : i32, i32, i32
  }
  func.func @transform_6(%arg0: i32, %arg1: i32) -> (i32, i32, i32) {
    %c0_i32 = arith.constant 0 : i32
    %c0_i32_0 = arith.constant 0 : i32
    return %arg0, %arg1, %c0_i32 : i32, i32, i32
  }
}

module attributes {stable_mosaic.version = 11 : i64} {
  func.func @_norm_proj_kernel(%arg0: i32, %arg1: memref<16x32xf32, #tpu.memory_space<vmem>>, %arg2: memref<1x32xf32, #tpu.memory_space<vmem>>, %arg3: memref<1x32xf32, #tpu.memory_space<vmem>>, %arg4: memref<32x32xbf16, #tpu.memory_space<vmem>>, %arg5: memref<1x32xf32, #tpu.memory_space<vmem>>, %arg6: memref<16x32xbf16, #tpu.memory_space<vmem>>) attributes {dimension_semantics = [#tpu.dimension_semantics<parallel>], iteration_bounds = array<i64: 1>, scalar_prefetch = 0 : i64, scratch_operands = 0 : i64, tpu.core_type = #tpu.core_type<tc>, window_params = [{transform_indices = @transform_0, window_bounds = array<i64: 16, 32>}, {pipeline_mode = #tpu.pipeline_mode<synchronous>, transform_indices = @transform_1, window_bounds = array<i64: 1, 32>}, {pipeline_mode = #tpu.pipeline_mode<synchronous>, transform_indices = @transform_2, window_bounds = array<i64: 1, 32>}, {pipeline_mode = #tpu.pipeline_mode<synchronous>, transform_indices = @transform_3, window_bounds = array<i64: 32, 32>}, {pipeline_mode = #tpu.pipeline_mode<synchronous>, transform_indices = @transform_4, window_bounds = array<i64: 1, 32>}, {transform_indices = @transform_5, window_bounds = array<i64: 16, 32>}]} {
    %c0 = arith.constant 0 : index
    %c0_0 = arith.constant 0 : index
    %0 = vector.load %arg1[%c0, %c0_0] : memref<16x32xf32, #tpu.memory_space<vmem>>, vector<16x32xf32>
    %cst = arith.constant dense<0.000000e+00> : vector<16xf32>
    %1 = vector.multi_reduction <add>, %0, %cst [1] : vector<16x32xf32> to vector<16xf32>
    %2 = vector.shape_cast %1 : vector<16xf32> to vector<16x1xf32>
    %cst_1 = arith.constant 3.200000e+01 : f32
    %3 = vector.broadcast %cst_1 : f32 to vector<16x1xf32>
    %4 = arith.divf %2, %3 : vector<16x1xf32>
    %5 = vector.broadcast %4 : vector<16x1xf32> to vector<16x32xf32>
    %6 = arith.subf %0, %5 : vector<16x32xf32>
    %7 = arith.mulf %6, %6 : vector<16x32xf32>
    %cst_2 = arith.constant dense<0.000000e+00> : vector<16xf32>
    %8 = vector.multi_reduction <add>, %7, %cst_2 [1] : vector<16x32xf32> to vector<16xf32>
    %9 = vector.shape_cast %8 : vector<16xf32> to vector<16x1xf32>
    %cst_3 = arith.constant 3.200000e+01 : f32
    %10 = vector.broadcast %cst_3 : f32 to vector<16x1xf32>
    %11 = arith.divf %9, %10 : vector<16x1xf32>
    %12 = vector.broadcast %4 : vector<16x1xf32> to vector<16x32xf32>
    %13 = arith.subf %0, %12 : vector<16x32xf32>
    %cst_4 = arith.constant 9.99999974E-6 : f32
    %14 = vector.broadcast %cst_4 : f32 to vector<16x1xf32>
    %15 = arith.addf %11, %14 : vector<16x1xf32>
    %16 = math.rsqrt %15 : vector<16x1xf32>
    %17 = vector.broadcast %16 : vector<16x1xf32> to vector<16x32xf32>
    %18 = arith.mulf %13, %17 : vector<16x32xf32>
    %c0_5 = arith.constant 0 : index
    %c0_6 = arith.constant 0 : index
    %19 = vector.load %arg2[%c0_5, %c0_6] : memref<1x32xf32, #tpu.memory_space<vmem>>, vector<1x32xf32>
    %20 = vector.broadcast %19 : vector<1x32xf32> to vector<16x32xf32>
    %21 = arith.mulf %18, %20 : vector<16x32xf32>
    %c0_7 = arith.constant 0 : index
    %c0_8 = arith.constant 0 : index
    %22 = vector.load %arg3[%c0_7, %c0_8] : memref<1x32xf32, #tpu.memory_space<vmem>>, vector<1x32xf32>
    %23 = vector.broadcast %22 : vector<1x32xf32> to vector<16x32xf32>
    %24 = arith.addf %21, %23 : vector<16x32xf32>
    %25 = arith.truncf %24 : vector<16x32xf32> to vector<16x32xbf16>
    %c0_9 = arith.constant 0 : index
    %c0_10 = arith.constant 0 : index
    %26 = vector.load %arg4[%c0_9, %c0_10] : memref<32x32xbf16, #tpu.memory_space<vmem>>, vector<32x32xbf16>
    %cst_11 = arith.constant dense<0.000000e+00> : vector<16x32xf32>
    %27 = tpu.matmul %25, %26, %cst_11 {dimension_numbers = #tpu.dot_dimension_numbers<[1], [0], [0], [1], [0, 0, 1, 1], [], []>} : vector<16x32xbf16>, vector<32x32xbf16>, vector<16x32xf32> -> vector<16x32xf32>
    %c0_12 = arith.constant 0 : index
    %c0_13 = arith.constant 0 : index
    %28 = vector.load %arg5[%c0_12, %c0_13] : memref<1x32xf32, #tpu.memory_space<vmem>>, vector<1x32xf32>
    %29 = vector.broadcast %28 : vector<1x32xf32> to vector<16x32xf32>
    %30 = arith.addf %27, %29 : vector<16x32xf32>
    %31 = arith.truncf %30 : vector<16x32xf32> to vector<16x32xbf16>
    %c0_14 = arith.constant 0 : index
    %c0_15 = arith.constant 0 : index
    %32 = vector.load %arg6[%c0_14, %c0_15] : memref<16x32xbf16, #tpu.memory_space<vmem>>, vector<16x32xbf16>
    tpu.vector_store %arg6[%c0_14, %c0_15], %31 {strides = array<i32>} : memref<16x32xbf16, #tpu.memory_space<vmem>>, vector<16x32xbf16>,
    return
  }
  func.func @transform_0(%arg0: i32) -> (i32, i32) {
    %c0_i32 = arith.constant 0 : i32
    %c0_i32_0 = arith.constant 0 : i32
    return %arg0, %c0_i32 : i32, i32
  }
  func.func @transform_1(%arg0: i32) -> (i32, i32) {
    %c0_i32 = arith.constant 0 : i32
    %c0_i32_0 = arith.constant 0 : i32
    %c0_i32_1 = arith.constant 0 : i32
    return %c0_i32, %c0_i32_0 : i32, i32
  }
  func.func @transform_2(%arg0: i32) -> (i32, i32) {
    %c0_i32 = arith.constant 0 : i32
    %c0_i32_0 = arith.constant 0 : i32
    %c0_i32_1 = arith.constant 0 : i32
    return %c0_i32, %c0_i32_0 : i32, i32
  }
  func.func @transform_3(%arg0: i32) -> (i32, i32) {
    %c0_i32 = arith.constant 0 : i32
    %c0_i32_0 = arith.constant 0 : i32
    %c0_i32_1 = arith.constant 0 : i32
    return %c0_i32, %c0_i32_0 : i32, i32
  }
  func.func @transform_4(%arg0: i32) -> (i32, i32) {
    %c0_i32 = arith.constant 0 : i32
    %c0_i32_0 = arith.constant 0 : i32
    %c0_i32_1 = arith.constant 0 : i32
    return %c0_i32, %c0_i32_0 : i32, i32
  }
  func.func @transform_5(%arg0: i32) -> (i32, i32) {
    %c0_i32 = arith.constant 0 : i32
    %c0_i32_0 = arith.constant 0 : i32
    return %arg0, %c0_i32 : i32, i32
  }
}

module attributes {stable_mosaic.version = 11 : i64} {
  func.func @_attn_kernel(%arg0: i32, %arg1: i32, %arg2: memref<1x8x32xbf16, #tpu.memory_space<vmem>>, %arg3: memref<1x16x64xbf16, #tpu.memory_space<vmem>>, %arg4: memref<1x1x16xf32, #tpu.memory_space<vmem>>, %arg5: memref<32x32xbf16, #tpu.memory_space<vmem>>, %arg6: memref<1x32xf32, #tpu.memory_space<vmem>>, %arg7: memref<1x8x32xf32, #tpu.memory_space<vmem>>, %arg8: memref<1x8x32xf32, #tpu.memory_space<vmem>>) attributes {dimension_semantics = [#tpu.dimension_semantics<parallel>, #tpu.dimension_semantics<parallel>], iteration_bounds = array<i64: 2, 1>, scalar_prefetch = 0 : i64, scratch_operands = 0 : i64, tpu.core_type = #tpu.core_type<tc>, window_params = [{transform_indices = @transform_0, window_bounds = array<i64: 1, 8, 32>}, {transform_indices = @transform_1, window_bounds = array<i64: 1, 16, 64>}, {transform_indices = @transform_2, window_bounds = array<i64: 1, 1, 16>}, {pipeline_mode = #tpu.pipeline_mode<synchronous>, transform_indices = @transform_3, window_bounds = array<i64: 32, 32>}, {pipeline_mode = #tpu.pipeline_mode<synchronous>, transform_indices = @transform_4, window_bounds = array<i64: 1, 32>}, {transform_indices = @transform_5, window_bounds = array<i64: 1, 8, 32>}, {transform_indices = @transform_6, window_bounds = array<i64: 1, 8, 32>}]} {
    %c0 = arith.constant 0 : index
    %c0_0 = arith.constant 0 : index
    %c0_1 = arith.constant 0 : index
    %0 = vector.load %arg2[%c0, %c0_0, %c0_1] : memref<1x8x32xbf16, #tpu.memory_space<vmem>>, vector<1x8x32xbf16>
    %1 = vector.shape_cast %0 : vector<1x8x32xbf16> to vector<8x32xbf16>
    %c0_2 = arith.constant 0 : index
    %c0_3 = arith.constant 0 : index
    %c0_4 = arith.constant 0 : index
    %2 = vector.load %arg3[%c0_2, %c0_3, %c0_4] : memref<1x16x64xbf16, #tpu.memory_space<vmem>>, vector<1x16x64xbf16>
    %3 = vector.shape_cast %2 : vector<1x16x64xbf16> to vector<16x64xbf16>
    %c0_5 = arith.constant 0 : index
    %c0_6 = arith.constant 0 : index
    %c0_7 = arith.constant 0 : index
    %4 = vector.load %arg4[%c0_5, %c0_6, %c0_7] : memref<1x1x16xf32, #tpu.memory_space<vmem>>, vector<1x1x16xf32>
    %5 = vector.shape_cast %4 : vector<1x1x16xf32> to vector<1x16xf32>
    %c0_8 = arith.constant 0 : index
    %c0_9 = arith.constant 0 : index
    %c0_10 = arith.constant 0 : index
    %6 = vector.load %arg7[%c0_8, %c0_9, %c0_10] : memref<1x8x32xf32, #tpu.memory_space<vmem>>, vector<1x8x32xf32>
    %7 = vector.shape_cast %6 : vector<1x8x32xf32> to vector<8x32xf32>
    %c0_11 = arith.constant 0 : index
    %c0_12 = arith.constant 0 : index
    %8 = vector.load %arg6[%c0_11, %c0_12] : memref<1x32xf32, #tpu.memory_space<vmem>>, vector<1x32xf32>
    %9 = vector.broadcast %8 : vector<1x32xf32> to vector<8x32xf32>
    %10 = arith.addf %7, %9 : vector<8x32xf32>
    %11 = vector.extract_strided_slice %1 {offsets = [0, 0], sizes = [8, 8], strides = [1, 1]} : vector<8x32xbf16> to vector<8x8xbf16>
    %12 = vector.extract_strided_slice %3 {offsets = [0, 0], sizes = [16, 8], strides = [1, 1]} : vector<16x64xbf16> to vector<16x8xbf16>
    %13 = vector.extract_strided_slice %3 {offsets = [0, 32], sizes = [16, 8], strides = [1, 1]} : vector<16x64xbf16> to vector<16x8xbf16>
    %cst = arith.constant dense<0.000000e+00> : vector<8x16xf32>
    %14 = tpu.matmul %11, %12, %cst {dimension_numbers = #tpu.dot_dimension_numbers<[1], [1], [0], [0], [0, 0, 1, 0], [], []>} : vector<8x8xbf16>, vector<16x8xbf16>, vector<8x16xf32> -> vector<8x16xf32>
    %15 = vector.broadcast %5 : vector<1x16xf32> to vector<8x16xf32>
    %16 = arith.addf %14, %15 : vector<8x16xf32>
    %cst_13 = arith.constant dense<0xFF800000> : vector<8xf32>
    %17 = vector.multi_reduction <maximumf>, %16, %cst_13 [1] : vector<8x16xf32> to vector<8xf32>
    %18 = vector.shape_cast %17 : vector<8xf32> to vector<8x1xf32>
    %19 = vector.broadcast %18 : vector<8x1xf32> to vector<8x16xf32>
    %20 = arith.subf %16, %19 : vector<8x16xf32>
    %21 = math.exp %20 : vector<8x16xf32>
    %cst_14 = arith.constant dense<0.000000e+00> : vector<8xf32>
    %22 = vector.multi_reduction <add>, %21, %cst_14 [1] : vector<8x16xf32> to vector<8xf32>
    %23 = vector.shape_cast %22 : vector<8xf32> to vector<8x1xf32>
    %24 = tpu.reciprocal %23 {approx = true} : vector<8x1xf32> -> vector<8x1xf32>
    %25 = vector.broadcast %24 : vector<8x1xf32> to vector<8x16xf32>
    %26 = arith.mulf %21, %25 : vector<8x16xf32>
    %27 = arith.truncf %26 : vector<8x16xf32> to vector<8x16xbf16>
    %cst_15 = arith.constant dense<0.000000e+00> : vector<8x8xf32>
    %28 = tpu.matmul %27, %13, %cst_15 {dimension_numbers = #tpu.dot_dimension_numbers<[1], [0], [0], [1], [0, 0, 1, 1], [], []>} : vector<8x16xbf16>, vector<16x8xbf16>, vector<8x8xf32> -> vector<8x8xf32>
    %29 = arith.truncf %28 : vector<8x8xf32> to vector<8x8xbf16>
    %c0_16 = arith.constant 0 : index
    %c0_17 = arith.constant 0 : index
    %30 = vector.load %arg5[%c0_16, %c0_17] : memref<32x32xbf16, #tpu.memory_space<vmem>>, vector<8x32xbf16>
    %cst_18 = arith.constant dense<0.000000e+00> : vector<8x32xf32>
    %31 = tpu.matmul %29, %30, %cst_18 {dimension_numbers = #tpu.dot_dimension_numbers<[1], [0], [0], [1], [0, 0, 1, 1], [], []>} : vector<8x8xbf16>, vector<8x32xbf16>, vector<8x32xf32> -> vector<8x32xf32>
    %32 = arith.addf %10, %31 : vector<8x32xf32>
    %33 = vector.extract_strided_slice %1 {offsets = [0, 8], sizes = [8, 8], strides = [1, 1]} : vector<8x32xbf16> to vector<8x8xbf16>
    %34 = vector.extract_strided_slice %3 {offsets = [0, 8], sizes = [16, 8], strides = [1, 1]} : vector<16x64xbf16> to vector<16x8xbf16>
    %35 = vector.extract_strided_slice %3 {offsets = [0, 40], sizes = [16, 8], strides = [1, 1]} : vector<16x64xbf16> to vector<16x8xbf16>
    %cst_19 = arith.constant dense<0.000000e+00> : vector<8x16xf32>
    %36 = tpu.matmul %33, %34, %cst_19 {dimension_numbers = #tpu.dot_dimension_numbers<[1], [1], [0], [0], [0, 0, 1, 0], [], []>} : vector<8x8xbf16>, vector<16x8xbf16>, vector<8x16xf32> -> vector<8x16xf32>
    %37 = vector.broadcast %5 : vector<1x16xf32> to vector<8x16xf32>
    %38 = arith.addf %36, %37 : vector<8x16xf32>
    %cst_20 = arith.constant dense<0xFF800000> : vector<8xf32>
    %39 = vector.multi_reduction <maximumf>, %38, %cst_20 [1] : vector<8x16xf32> to vector<8xf32>
    %40 = vector.shape_cast %39 : vector<8xf32> to vector<8x1xf32>
    %41 = vector.broadcast %40 : vector<8x1xf32> to vector<8x16xf32>
    %42 = arith.subf %38, %41 : vector<8x16xf32>
    %43 = math.exp %42 : vector<8x16xf32>
    %cst_21 = arith.constant dense<0.000000e+00> : vector<8xf32>
    %44 = vector.multi_reduction <add>, %43, %cst_21 [1] : vector<8x16xf32> to vector<8xf32>
    %45 = vector.shape_cast %44 : vector<8xf32> to vector<8x1xf32>
    %46 = tpu.reciprocal %45 {approx = true} : vector<8x1xf32> -> vector<8x1xf32>
    %47 = vector.broadcast %46 : vector<8x1xf32> to vector<8x16xf32>
    %48 = arith.mulf %43, %47 : vector<8x16xf32>
    %49 = arith.truncf %48 : vector<8x16xf32> to vector<8x16xbf16>
    %cst_22 = arith.constant dense<0.000000e+00> : vector<8x8xf32>
    %50 = tpu.matmul %49, %35, %cst_22 {dimension_numbers = #tpu.dot_dimension_numbers<[1], [0], [0], [1], [0, 0, 1, 1], [], []>} : vector<8x16xbf16>, vector<16x8xbf16>, vector<8x8xf32> -> vector<8x8xf32>
    %51 = arith.truncf %50 : vector<8x8xf32> to vector<8x8xbf16>
    %c8 = arith.constant 8 : index
    %c0_23 = arith.constant 0 : index
    %52 = vector.load %arg5[%c8, %c0_23] : memref<32x32xbf16, #tpu.memory_space<vmem>>, vector<8x32xbf16>
    %cst_24 = arith.constant dense<0.000000e+00> : vector<8x32xf32>
    %53 = tpu.matmul %51, %52, %cst_24 {dimension_numbers = #tpu.dot_dimension_numbers<[1], [0], [0], [1], [0, 0, 1, 1], [], []>} : vector<8x8xbf16>, vector<8x32xbf16>, vector<8x32xf32> -> vector<8x32xf32>
    %54 = arith.addf %32, %53 : vector<8x32xf32>
    %55 = vector.extract_strided_slice %1 {offsets = [0, 16], sizes = [8, 8], strides = [1, 1]} : vector<8x32xbf16> to vector<8x8xbf16>
    %56 = vector.extract_strided_slice %3 {offsets = [0, 16], sizes = [16, 8], strides = [1, 1]} : vector<16x64xbf16> to vector<16x8xbf16>
    %57 = vector.extract_strided_slice %3 {offsets = [0, 48], sizes = [16, 8], strides = [1, 1]} : vector<16x64xbf16> to vector<16x8xbf16>
    %cst_25 = arith.constant dense<0.000000e+00> : vector<8x16xf32>
    %58 = tpu.matmul %55, %56, %cst_25 {dimension_numbers = #tpu.dot_dimension_numbers<[1], [1], [0], [0], [0, 0, 1, 0], [], []>} : vector<8x8xbf16>, vector<16x8xbf16>, vector<8x16xf32> -> vector<8x16xf32>
    %59 = vector.broadcast %5 : vector<1x16xf32> to vector<8x16xf32>
    %60 = arith.addf %58, %59 : vector<8x16xf32>
    %cst_26 = arith.constant dense<0xFF800000> : vector<8xf32>
    %61 = vector.multi_reduction <maximumf>, %60, %cst_26 [1] : vector<8x16xf32> to vector<8xf32>
    %62 = vector.shape_cast %61 : vector<8xf32> to vector<8x1xf32>
    %63 = vector.broadcast %62 : vector<8x1xf32> to vector<8x16xf32>
    %64 = arith.subf %60, %63 : vector<8x16xf32>
    %65 = math.exp %64 : vector<8x16xf32>
    %cst_27 = arith.constant dense<0.000000e+00> : vector<8xf32>
    %66 = vector.multi_reduction <add>, %65, %cst_27 [1] : vector<8x16xf32> to vector<8xf32>
    %67 = vector.shape_cast %66 : vector<8xf32> to vector<8x1xf32>
    %68 = tpu.reciprocal %67 {approx = true} : vector<8x1xf32> -> vector<8x1xf32>
    %69 = vector.broadcast %68 : vector<8x1xf32> to vector<8x16xf32>
    %70 = arith.mulf %65, %69 : vector<8x16xf32>
    %71 = arith.truncf %70 : vector<8x16xf32> to vector<8x16xbf16>
    %cst_28 = arith.constant dense<0.000000e+00> : vector<8x8xf32>
    %72 = tpu.matmul %71, %57, %cst_28 {dimension_numbers = #tpu.dot_dimension_numbers<[1], [0], [0], [1], [0, 0, 1, 1], [], []>} : vector<8x16xbf16>, vector<16x8xbf16>, vector<8x8xf32> -> vector<8x8xf32>
    %73 = arith.truncf %72 : vector<8x8xf32> to vector<8x8xbf16>
    %c16 = arith.constant 16 : index
    %c0_29 = arith.constant 0 : index
    %74 = vector.load %arg5[%c16, %c0_29] : memref<32x32xbf16, #tpu.memory_space<vmem>>, vector<8x32xbf16>
    %cst_30 = arith.constant dense<0.000000e+00> : vector<8x32xf32>
    %75 = tpu.matmul %73, %74, %cst_30 {dimension_numbers = #tpu.dot_dimension_numbers<[1], [0], [0], [1], [0, 0, 1, 1], [], []>} : vector<8x8xbf16>, vector<8x32xbf16>, vector<8x32xf32> -> vector<8x32xf32>
    %76 = arith.addf %54, %75 : vector<8x32xf32>
    %77 = vector.extract_strided_slice %1 {offsets = [0, 24], sizes = [8, 8], strides = [1, 1]} : vector<8x32xbf16> to vector<8x8xbf16>
    %78 = vector.extract_strided_slice %3 {offsets = [0, 24], sizes = [16, 8], strides = [1, 1]} : vector<16x64xbf16> to vector<16x8xbf16>
    %79 = vector.extract_strided_slice %3 {offsets = [0, 56], sizes = [16, 8], strides = [1, 1]} : vector<16x64xbf16> to vector<16x8xbf16>
    %cst_31 = arith.constant dense<0.000000e+00> : vector<8x16xf32>
    %80 = tpu.matmul %77, %78, %cst_31 {dimension_numbers = #tpu.dot_dimension_numbers<[1], [1], [0], [0], [0, 0, 1, 0], [], []>} : vector<8x8xbf16>, vector<16x8xbf16>, vector<8x16xf32> -> vector<8x16xf32>
    %81 = vector.broadcast %5 : vector<1x16xf32> to vector<8x16xf32>
    %82 = arith.addf %80, %81 : vector<8x16xf32>
    %cst_32 = arith.constant dense<0xFF800000> : vector<8xf32>
    %83 = vector.multi_reduction <maximumf>, %82, %cst_32 [1] : vector<8x16xf32> to vector<8xf32>
    %84 = vector.shape_cast %83 : vector<8xf32> to vector<8x1xf32>
    %85 = vector.broadcast %84 : vector<8x1xf32> to vector<8x16xf32>
    %86 = arith.subf %82, %85 : vector<8x16xf32>
    %87 = math.exp %86 : vector<8x16xf32>
    %cst_33 = arith.constant dense<0.000000e+00> : vector<8xf32>
    %88 = vector.multi_reduction <add>, %87, %cst_33 [1] : vector<8x16xf32> to vector<8xf32>
    %89 = vector.shape_cast %88 : vector<8xf32> to vector<8x1xf32>
    %90 = tpu.reciprocal %89 {approx = true} : vector<8x1xf32> -> vector<8x1xf32>
    %91 = vector.broadcast %90 : vector<8x1xf32> to vector<8x16xf32>
    %92 = arith.mulf %87, %91 : vector<8x16xf32>
    %93 = arith.truncf %92 : vector<8x16xf32> to vector<8x16xbf16>
    %cst_34 = arith.constant dense<0.000000e+00> : vector<8x8xf32>
    %94 = tpu.matmul %93, %79, %cst_34 {dimension_numbers = #tpu.dot_dimension_numbers<[1], [0], [0], [1], [0, 0, 1, 1], [], []>} : vector<8x16xbf16>, vector<16x8xbf16>, vector<8x8xf32> -> vector<8x8xf32>
    %95 = arith.truncf %94 : vector<8x8xf32> to vector<8x8xbf16>
    %c24 = arith.constant 24 : index
    %c0_35 = arith.constant 0 : index
    %96 = vector.load %arg5[%c24, %c0_35] : memref<32x32xbf16, #tpu.memory_space<vmem>>, vector<8x32xbf16>
    %cst_36 = arith.constant dense<0.000000e+00> : vector<8x32xf32>
    %97 = tpu.matmul %95, %96, %cst_36 {dimension_numbers = #tpu.dot_dimension_numbers<[1], [0], [0], [1], [0, 0, 1, 1], [], []>} : vector<8x8xbf16>, vector<8x32xbf16>, vector<8x32xf32> -> vector<8x32xf32>
    %98 = arith.addf %76, %97 : vector<8x32xf32>
    %c0_37 = arith.constant 0 : index
    %c0_38 = arith.constant 0 : index
    %c0_39 = arith.constant 0 : index
    %99 = vector.load %arg8[%c0_37, %c0_38, %c0_39] : memref<1x8x32xf32, #tpu.memory_space<vmem>>, vector<1x8x32xf32>
    %100 = vector.shape_cast %99 : vector<1x8x32xf32> to vector<8x32xf32>
    %101 = vector.shape_cast %98 : vector<8x32xf32> to vector<1x8x32xf32>
    tpu.vector_store %arg8[%c0_37, %c0_38, %c0_39], %101 {strides = array<i32>} : memref<1x8x32xf32, #tpu.memory_space<vmem>>, vector<1x8x32xf32>,
    return
  }
  func.func @transform_0(%arg0: i32, %arg1: i32) -> (i32, i32, i32) {
    %c0_i32 = arith.constant 0 : i32
    %c0_i32_0 = arith.constant 0 : i32
    return %arg0, %arg1, %c0_i32 : i32, i32, i32
  }
  func.func @transform_1(%arg0: i32, %arg1: i32) -> (i32, i32, i32) {
    %c0_i32 = arith.constant 0 : i32
    %c0_i32_0 = arith.constant 0 : i32
    %c0_i32_1 = arith.constant 0 : i32
    return %arg0, %c0_i32, %c0_i32_0 : i32, i32, i32
  }
  func.func @transform_2(%arg0: i32, %arg1: i32) -> (i32, i32, i32) {
    %c0_i32 = arith.constant 0 : i32
    %c0_i32_0 = arith.constant 0 : i32
    %c0_i32_1 = arith.constant 0 : i32
    return %arg0, %c0_i32, %c0_i32_0 : i32, i32, i32
  }
  func.func @transform_3(%arg0: i32, %arg1: i32) -> (i32, i32) {
    %c0_i32 = arith.constant 0 : i32
    %c0_i32_0 = arith.constant 0 : i32
    %c0_i32_1 = arith.constant 0 : i32
    return %c0_i32, %c0_i32_0 : i32, i32
  }
  func.func @transform_4(%arg0: i32, %arg1: i32) -> (i32, i32) {
    %c0_i32 = arith.constant 0 : i32
    %c0_i32_0 = arith.constant 0 : i32
    %c0_i32_1 = arith.constant 0 : i32
    return %c0_i32, %c0_i32_0 : i32, i32
  }
  func.func @transform_5(%arg0: i32, %arg1: i32) -> (i32, i32, i32) {
    %c0_i32 = arith.constant 0 : i32
    %c0_i32_0 = arith.constant 0 : i32
    return %arg0, %arg1, %c0_i32 : i32, i32, i32
  }
  func.func @transform_6(%arg0: i32, %arg1: i32) -> (i32, i32, i32) {
    %c0_i32 = arith.constant 0 : i32
    %c0_i32_0 = arith.constant 0 : i32
    return %arg0, %arg1, %c0_i32 : i32, i32, i32
  }
}

module attributes {stable_mosaic.version = 11 : i64} {
  func.func @_layernorm_kernel(%arg0: i32, %arg1: memref<16x32xf32, #tpu.memory_space<vmem>>, %arg2: memref<1x32xf32, #tpu.memory_space<vmem>>, %arg3: memref<1x32xf32, #tpu.memory_space<vmem>>, %arg4: memref<16x32xf32, #tpu.memory_space<vmem>>) attributes {dimension_semantics = [#tpu.dimension_semantics<parallel>], iteration_bounds = array<i64: 1>, scalar_prefetch = 0 : i64, scratch_operands = 0 : i64, tpu.core_type = #tpu.core_type<tc>, window_params = [{transform_indices = @transform_0, window_bounds = array<i64: 16, 32>}, {pipeline_mode = #tpu.pipeline_mode<synchronous>, transform_indices = @transform_1, window_bounds = array<i64: 1, 32>}, {pipeline_mode = #tpu.pipeline_mode<synchronous>, transform_indices = @transform_2, window_bounds = array<i64: 1, 32>}, {transform_indices = @transform_3, window_bounds = array<i64: 16, 32>}]} {
    %c0 = arith.constant 0 : index
    %c0_0 = arith.constant 0 : index
    %0 = vector.load %arg1[%c0, %c0_0] : memref<16x32xf32, #tpu.memory_space<vmem>>, vector<16x32xf32>
    %cst = arith.constant dense<0.000000e+00> : vector<16xf32>
    %1 = vector.multi_reduction <add>, %0, %cst [1] : vector<16x32xf32> to vector<16xf32>
    %2 = vector.shape_cast %1 : vector<16xf32> to vector<16x1xf32>
    %cst_1 = arith.constant 3.200000e+01 : f32
    %3 = vector.broadcast %cst_1 : f32 to vector<16x1xf32>
    %4 = arith.divf %2, %3 : vector<16x1xf32>
    %5 = vector.broadcast %4 : vector<16x1xf32> to vector<16x32xf32>
    %6 = arith.subf %0, %5 : vector<16x32xf32>
    %7 = arith.mulf %6, %6 : vector<16x32xf32>
    %cst_2 = arith.constant dense<0.000000e+00> : vector<16xf32>
    %8 = vector.multi_reduction <add>, %7, %cst_2 [1] : vector<16x32xf32> to vector<16xf32>
    %9 = vector.shape_cast %8 : vector<16xf32> to vector<16x1xf32>
    %cst_3 = arith.constant 3.200000e+01 : f32
    %10 = vector.broadcast %cst_3 : f32 to vector<16x1xf32>
    %11 = arith.divf %9, %10 : vector<16x1xf32>
    %12 = vector.broadcast %4 : vector<16x1xf32> to vector<16x32xf32>
    %13 = arith.subf %0, %12 : vector<16x32xf32>
    %cst_4 = arith.constant 9.99999974E-6 : f32
    %14 = vector.broadcast %cst_4 : f32 to vector<16x1xf32>
    %15 = arith.addf %11, %14 : vector<16x1xf32>
    %16 = math.rsqrt %15 : vector<16x1xf32>
    %17 = vector.broadcast %16 : vector<16x1xf32> to vector<16x32xf32>
    %18 = arith.mulf %13, %17 : vector<16x32xf32>
    %c0_5 = arith.constant 0 : index
    %c0_6 = arith.constant 0 : index
    %19 = vector.load %arg2[%c0_5, %c0_6] : memref<1x32xf32, #tpu.memory_space<vmem>>, vector<1x32xf32>
    %20 = vector.broadcast %19 : vector<1x32xf32> to vector<16x32xf32>
    %21 = arith.mulf %18, %20 : vector<16x32xf32>
    %c0_7 = arith.constant 0 : index
    %c0_8 = arith.constant 0 : index
    %22 = vector.load %arg3[%c0_7, %c0_8] : memref<1x32xf32, #tpu.memory_space<vmem>>, vector<1x32xf32>
    %23 = vector.broadcast %22 : vector<1x32xf32> to vector<16x32xf32>
    %24 = arith.addf %21, %23 : vector<16x32xf32>
    %c0_9 = arith.constant 0 : index
    %c0_10 = arith.constant 0 : index
    %25 = vector.load %arg4[%c0_9, %c0_10] : memref<16x32xf32, #tpu.memory_space<vmem>>, vector<16x32xf32>
    tpu.vector_store %arg4[%c0_9, %c0_10], %24 {strides = array<i32>} : memref<16x32xf32, #tpu.memory_space<vmem>>, vector<16x32xf32>,
    return
  }
  func.func @transform_0(%arg0: i32) -> (i32, i32) {
    %c0_i32 = arith.constant 0 : i32
    %c0_i32_0 = arith.constant 0 : i32
    return %arg0, %c0_i32 : i32, i32
  }
  func.func @transform_1(%arg0: i32) -> (i32, i32) {
    %c0_i32 = arith.constant 0 : i32
    %c0_i32_0 = arith.constant 0 : i32
    %c0_i32_1 = arith.constant 0 : i32
    return %c0_i32, %c0_i32_0 : i32, i32
  }
  func.func @transform_2(%arg0: i32) -> (i32, i32) {
    %c0_i32 = arith.constant 0 : i32
    %c0_i32_0 = arith.constant 0 : i32
    %c0_i32_1 = arith.constant 0 : i32
    return %c0_i32, %c0_i32_0 : i32, i32
  }
  func.func @transform_3(%arg0: i32) -> (i32, i32) {
    %c0_i32 = arith.constant 0 : i32
    %c0_i32_0 = arith.constant 0 : i32
    return %arg0, %c0_i32 : i32, i32
  }
}

module attributes {stable_mosaic.version = 11 : i64} {
  func.func @_norm_ffn_res_kernel(%arg0: i32, %arg1: memref<16x32xf32, #tpu.memory_space<vmem>>, %arg2: memref<1x32xf32, #tpu.memory_space<vmem>>, %arg3: memref<1x32xf32, #tpu.memory_space<vmem>>, %arg4: memref<32x64xbf16, #tpu.memory_space<vmem>>, %arg5: memref<1x64xf32, #tpu.memory_space<vmem>>, %arg6: memref<64x32xbf16, #tpu.memory_space<vmem>>, %arg7: memref<1x32xf32, #tpu.memory_space<vmem>>, %arg8: memref<16x32xf32, #tpu.memory_space<vmem>>) attributes {dimension_semantics = [#tpu.dimension_semantics<parallel>], iteration_bounds = array<i64: 1>, scalar_prefetch = 0 : i64, scratch_operands = 0 : i64, tpu.core_type = #tpu.core_type<tc>, window_params = [{transform_indices = @transform_0, window_bounds = array<i64: 16, 32>}, {pipeline_mode = #tpu.pipeline_mode<synchronous>, transform_indices = @transform_1, window_bounds = array<i64: 1, 32>}, {pipeline_mode = #tpu.pipeline_mode<synchronous>, transform_indices = @transform_2, window_bounds = array<i64: 1, 32>}, {pipeline_mode = #tpu.pipeline_mode<synchronous>, transform_indices = @transform_3, window_bounds = array<i64: 32, 64>}, {pipeline_mode = #tpu.pipeline_mode<synchronous>, transform_indices = @transform_4, window_bounds = array<i64: 1, 64>}, {pipeline_mode = #tpu.pipeline_mode<synchronous>, transform_indices = @transform_5, window_bounds = array<i64: 64, 32>}, {pipeline_mode = #tpu.pipeline_mode<synchronous>, transform_indices = @transform_6, window_bounds = array<i64: 1, 32>}, {transform_indices = @transform_7, window_bounds = array<i64: 16, 32>}]} {
    %c0 = arith.constant 0 : index
    %c0_0 = arith.constant 0 : index
    %0 = vector.load %arg1[%c0, %c0_0] : memref<16x32xf32, #tpu.memory_space<vmem>>, vector<16x32xf32>
    %cst = arith.constant dense<0.000000e+00> : vector<16xf32>
    %1 = vector.multi_reduction <add>, %0, %cst [1] : vector<16x32xf32> to vector<16xf32>
    %2 = vector.shape_cast %1 : vector<16xf32> to vector<16x1xf32>
    %cst_1 = arith.constant 3.200000e+01 : f32
    %3 = vector.broadcast %cst_1 : f32 to vector<16x1xf32>
    %4 = arith.divf %2, %3 : vector<16x1xf32>
    %5 = vector.broadcast %4 : vector<16x1xf32> to vector<16x32xf32>
    %6 = arith.subf %0, %5 : vector<16x32xf32>
    %7 = arith.mulf %6, %6 : vector<16x32xf32>
    %cst_2 = arith.constant dense<0.000000e+00> : vector<16xf32>
    %8 = vector.multi_reduction <add>, %7, %cst_2 [1] : vector<16x32xf32> to vector<16xf32>
    %9 = vector.shape_cast %8 : vector<16xf32> to vector<16x1xf32>
    %cst_3 = arith.constant 3.200000e+01 : f32
    %10 = vector.broadcast %cst_3 : f32 to vector<16x1xf32>
    %11 = arith.divf %9, %10 : vector<16x1xf32>
    %12 = vector.broadcast %4 : vector<16x1xf32> to vector<16x32xf32>
    %13 = arith.subf %0, %12 : vector<16x32xf32>
    %cst_4 = arith.constant 9.99999974E-6 : f32
    %14 = vector.broadcast %cst_4 : f32 to vector<16x1xf32>
    %15 = arith.addf %11, %14 : vector<16x1xf32>
    %16 = math.rsqrt %15 : vector<16x1xf32>
    %17 = vector.broadcast %16 : vector<16x1xf32> to vector<16x32xf32>
    %18 = arith.mulf %13, %17 : vector<16x32xf32>
    %c0_5 = arith.constant 0 : index
    %c0_6 = arith.constant 0 : index
    %19 = vector.load %arg2[%c0_5, %c0_6] : memref<1x32xf32, #tpu.memory_space<vmem>>, vector<1x32xf32>
    %20 = vector.broadcast %19 : vector<1x32xf32> to vector<16x32xf32>
    %21 = arith.mulf %18, %20 : vector<16x32xf32>
    %c0_7 = arith.constant 0 : index
    %c0_8 = arith.constant 0 : index
    %22 = vector.load %arg3[%c0_7, %c0_8] : memref<1x32xf32, #tpu.memory_space<vmem>>, vector<1x32xf32>
    %23 = vector.broadcast %22 : vector<1x32xf32> to vector<16x32xf32>
    %24 = arith.addf %21, %23 : vector<16x32xf32>
    %25 = arith.truncf %24 : vector<16x32xf32> to vector<16x32xbf16>
    %c0_9 = arith.constant 0 : index
    %c0_10 = arith.constant 0 : index
    %26 = vector.load %arg4[%c0_9, %c0_10] : memref<32x64xbf16, #tpu.memory_space<vmem>>, vector<32x64xbf16>
    %cst_11 = arith.constant dense<0.000000e+00> : vector<16x64xf32>
    %27 = tpu.matmul %25, %26, %cst_11 {dimension_numbers = #tpu.dot_dimension_numbers<[1], [0], [0], [1], [0, 0, 1, 1], [], []>} : vector<16x32xbf16>, vector<32x64xbf16>, vector<16x64xf32> -> vector<16x64xf32>
    %c0_12 = arith.constant 0 : index
    %c0_13 = arith.constant 0 : index
    %28 = vector.load %arg5[%c0_12, %c0_13] : memref<1x64xf32, #tpu.memory_space<vmem>>, vector<1x64xf32>
    %29 = vector.broadcast %28 : vector<1x64xf32> to vector<16x64xf32>
    %30 = arith.addf %27, %29 : vector<16x64xf32>
    %cst_14 = arith.constant 0.000000e+00 : f32
    %31 = vector.broadcast %cst_14 : f32 to vector<16x64xf32>
    %32 = arith.maximumf %30, %31 : vector<16x64xf32>
    %33 = arith.truncf %32 : vector<16x64xf32> to vector<16x64xbf16>
    %c0_15 = arith.constant 0 : index
    %c0_16 = arith.constant 0 : index
    %34 = vector.load %arg6[%c0_15, %c0_16] : memref<64x32xbf16, #tpu.memory_space<vmem>>, vector<64x32xbf16>
    %cst_17 = arith.constant dense<0.000000e+00> : vector<16x32xf32>
    %35 = tpu.matmul %33, %34, %cst_17 {dimension_numbers = #tpu.dot_dimension_numbers<[1], [0], [0], [1], [0, 0, 1, 1], [], []>} : vector<16x64xbf16>, vector<64x32xbf16>, vector<16x32xf32> -> vector<16x32xf32>
    %c0_18 = arith.constant 0 : index
    %c0_19 = arith.constant 0 : index
    %36 = vector.load %arg7[%c0_18, %c0_19] : memref<1x32xf32, #tpu.memory_space<vmem>>, vector<1x32xf32>
    %37 = vector.broadcast %36 : vector<1x32xf32> to vector<16x32xf32>
    %38 = arith.addf %35, %37 : vector<16x32xf32>
    %39 = arith.addf %0, %38 : vector<16x32xf32>
    %c0_20 = arith.constant 0 : index
    %c0_21 = arith.constant 0 : index
    %40 = vector.load %arg8[%c0_20, %c0_21] : memref<16x32xf32, #tpu.memory_space<vmem>>, vector<16x32xf32>
    tpu.vector_store %arg8[%c0_20, %c0_21], %39 {strides = array<i32>} : memref<16x32xf32, #tpu.memory_space<vmem>>, vector<16x32xf32>,
    return
  }
  func.func @transform_0(%arg0: i32) -> (i32, i32) {
    %c0_i32 = arith.constant 0 : i32
    %c0_i32_0 = arith.constant 0 : i32
    return %arg0, %c0_i32 : i32, i32
  }
  func.func @transform_1(%arg0: i32) -> (i32, i32) {
    %c0_i32 = arith.constant 0 : i32
    %c0_i32_0 = arith.constant 0 : i32
    %c0_i32_1 = arith.constant 0 : i32
    return %c0_i32, %c0_i32_0 : i32, i32
  }
  func.func @transform_2(%arg0: i32) -> (i32, i32) {
    %c0_i32 = arith.constant 0 : i32
    %c0_i32_0 = arith.constant 0 : i32
    %c0_i32_1 = arith.constant 0 : i32
    return %c0_i32, %c0_i32_0 : i32, i32
  }
  func.func @transform_3(%arg0: i32) -> (i32, i32) {
    %c0_i32 = arith.constant 0 : i32
    %c0_i32_0 = arith.constant 0 : i32
    %c0_i32_1 = arith.constant 0 : i32
    return %c0_i32, %c0_i32_0 : i32, i32
  }
  func.func @transform_4(%arg0: i32) -> (i32, i32) {
    %c0_i32 = arith.constant 0 : i32
    %c0_i32_0 = arith.constant 0 : i32
    %c0_i32_1 = arith.constant 0 : i32
    return %c0_i32, %c0_i32_0 : i32, i32
  }
  func.func @transform_5(%arg0: i32) -> (i32, i32) {
    %c0_i32 = arith.constant 0 : i32
    %c0_i32_0 = arith.constant 0 : i32
    %c0_i32_1 = arith.constant 0 : i32
    return %c0_i32, %c0_i32_0 : i32, i32
  }
  func.func @transform_6(%arg0: i32) -> (i32, i32) {
    %c0_i32 = arith.constant 0 : i32
    %c0_i32_0 = arith.constant 0 : i32
    %c0_i32_1 = arith.constant 0 : i32
    return %c0_i32, %c0_i32_0 : i32, i32
  }
  func.func @transform_7(%arg0: i32) -> (i32, i32) {
    %c0_i32 = arith.constant 0 : i32
    %c0_i32_0 = arith.constant 0 : i32
    return %arg0, %c0_i32 : i32, i32
  }
}

module attributes {stable_mosaic.version = 11 : i64} {
  func.func @_linear_kernel(%arg0: i32, %arg1: i32, %arg2: memref<16x32xf32, #tpu.memory_space<vmem>>, %arg3: memref<32x19xbf16, #tpu.memory_space<vmem>>, %arg4: memref<1x19xf32, #tpu.memory_space<vmem>>, %arg5: memref<16x19xf32, #tpu.memory_space<vmem>>) attributes {dimension_semantics = [#tpu.dimension_semantics<parallel>, #tpu.dimension_semantics<parallel>], iteration_bounds = array<i64: 1, 1>, scalar_prefetch = 0 : i64, scratch_operands = 0 : i64, tpu.core_type = #tpu.core_type<tc>, window_params = [{transform_indices = @transform_0, window_bounds = array<i64: 16, 32>}, {transform_indices = @transform_1, window_bounds = array<i64: 32, 19>}, {transform_indices = @transform_2, window_bounds = array<i64: 1, 19>}, {transform_indices = @transform_3, window_bounds = array<i64: 16, 19>}]} {
    %c0 = arith.constant 0 : index
    %c0_0 = arith.constant 0 : index
    %0 = vector.load %arg2[%c0, %c0_0] : memref<16x32xf32, #tpu.memory_space<vmem>>, vector<16x32xf32>
    %1 = arith.truncf %0 : vector<16x32xf32> to vector<16x32xbf16>
    %c0_1 = arith.constant 0 : index
    %c0_2 = arith.constant 0 : index
    %2 = vector.load %arg3[%c0_1, %c0_2] : memref<32x19xbf16, #tpu.memory_space<vmem>>, vector<32x19xbf16>
    %cst = arith.constant dense<0.000000e+00> : vector<16x19xf32>
    %3 = tpu.matmul %1, %2, %cst {dimension_numbers = #tpu.dot_dimension_numbers<[1], [0], [0], [1], [0, 0, 1, 1], [], []>} : vector<16x32xbf16>, vector<32x19xbf16>, vector<16x19xf32> -> vector<16x19xf32>
    %c0_3 = arith.constant 0 : index
    %c0_4 = arith.constant 0 : index
    %4 = vector.load %arg4[%c0_3, %c0_4] : memref<1x19xf32, #tpu.memory_space<vmem>>, vector<1x19xf32>
    %5 = vector.broadcast %4 : vector<1x19xf32> to vector<16x19xf32>
    %6 = arith.addf %3, %5 : vector<16x19xf32>
    %c0_5 = arith.constant 0 : index
    %c0_6 = arith.constant 0 : index
    %7 = vector.load %arg5[%c0_5, %c0_6] : memref<16x19xf32, #tpu.memory_space<vmem>>, vector<16x19xf32>
    tpu.vector_store %arg5[%c0_5, %c0_6], %6 {strides = array<i32>} : memref<16x19xf32, #tpu.memory_space<vmem>>, vector<16x19xf32>,
    return
  }
  func.func @transform_0(%arg0: i32, %arg1: i32) -> (i32, i32) {
    %c0_i32 = arith.constant 0 : i32
    %c0_i32_0 = arith.constant 0 : i32
    return %arg1, %c0_i32 : i32, i32
  }
  func.func @transform_1(%arg0: i32, %arg1: i32) -> (i32, i32) {
    %c0_i32 = arith.constant 0 : i32
    %c0_i32_0 = arith.constant 0 : i32
    return %c0_i32, %arg0 : i32, i32
  }
  func.func @transform_2(%arg0: i32, %arg1: i32) -> (i32, i32) {
    %c0_i32 = arith.constant 0 : i32
    %c0_i32_0 = arith.constant 0 : i32
    return %c0_i32, %arg0 : i32, i32
  }
  func.func @transform_3(%arg0: i32, %arg1: i32) -> (i32, i32) {
    %c0_i32 = arith.constant 0 : i32
    return %arg1, %arg0 : i32, i32
  }
}

</mosaic_0001>

<bundles_post_ra>
// kernel: transformer_forward.27
= control target key start
LH: loop header
LB: loop body
LE: loop exit
PB: predicated region body
PF: predicated region fallthrough
CT: control target
= control target key end

     0   :  { %vm18_vm0 = vcmask 261120   ;;  %s174_s0 = inlined_call_operand.vmem [shape: f32[32,32], index: 0, kind: input, shape index: {}]   ;;  %s175_s1 = inlined_call_operand.vmem [shape: f32[1,32], index: 1, kind: input, shape index: {}]   ;;  %s176_s2 = inlined_call_operand.vmem [shape: f32[1,32], index: 2, kind: input, shape index: {}]   ;;  %s177_s3 = inlined_call_operand.vmem [shape: f32[32,32], index: 3, kind: output, shape index: {}]  }
   0x1   :  { %v14_v0 = vld [vmem:[%s174_s0] sm:$0xff]  ;;  %v16_v1 = vld [vmem:[%s174_s0 + $0x10] sm:$0xff]  ;;  %v15_v2 = vld [vmem:[%s174_s0 + $0x8] sm:$0xff] }
   0x2   :  { %v19_v3 = vsel %vm18_vm0, %v14_v0, 0.0  ;;  %v25_v4 = vsel %vm18_vm0, %v16_v1, 0.0  ;;  %v17_v5 = vld [vmem:[%s174_s0 + $0x18] sm:$0xff]  ;;  %v22_v6 = vsel %vm18_vm0, %v15_v2, 0.0  ;;  %v102_v41 = vld [vmem:[%s175_s1] ss:$0 sm:$0xff] }
   0x3   :  { %20 = vadd.xlane.f32.xlu0 %v19_v3  ;;  %26 = vadd.xlane.f32.xlu1 %v25_v4  ;;  %v28_v7 = vsel %vm18_vm0, %v17_v5, 0.0  ;;  %v103_v43 = vld [vmem:[%s176_s2] ss:$0 sm:$0xff] }
   0x7   :  { %23 = vadd.xlane.f32.xlu0 %v22_v6  ;;  %29 = vadd.xlane.f32.xlu1 %v28_v7 }
  0x8c   :  { %v21_v8 = vpop.xlane.xlu0 %20  ;;  %v27_v9 = vpop.xlane.xlu1 %26 }
  0x8d   :  { %v32_v10 = vmul.f32 0.03125, %v21_v8  ;;  %v34_v11 = vmul.f32 0.03125, %v27_v9 }
  0x8f   :  { %v36_v12 = vsub.f32 %v14_v0, %v32_v10  ;;  %v38_v13 = vsub.f32 %v16_v1, %v34_v11 }
  0x90   :  { %v24_v14 = vpop.xlane.xlu0 %23  ;;  %v30_v15 = vpop.xlane.xlu1 %29 }
  0x91   :  { %v33_v16 = vmul.f32 0.03125, %v24_v14  ;;  %v35_v17 = vmul.f32 0.03125, %v30_v15  ;;  %v40_v18 = vmul.f32 %v36_v12, %v36_v12  ;;  %v42_v19 = vmul.f32 %v38_v13, %v38_v13 }
  0x93   :  { %v37_v20 = vsub.f32 %v15_v2, %v33_v16  ;;  %v39_v21 = vsub.f32 %v17_v5, %v35_v17  ;;  %v44_v22 = vsel %vm18_vm0, %v40_v18, 0.0  ;;  %v50_v23 = vsel %vm18_vm0, %v42_v19, 0.0 }
  0x94   :  { %45 = vadd.xlane.f32.xlu0 %v44_v22 }
  0x95   :  { %v41_v24 = vmul.f32 %v37_v20, %v37_v20  ;;  %v43_v25 = vmul.f32 %v39_v21, %v39_v21 }
  0x97   :  { %v47_v26 = vsel %vm18_vm0, %v41_v24, 0.0  ;;  %v53_v27 = vsel %vm18_vm0, %v43_v25, 0.0 }
  0x98   :  { %51 = vadd.xlane.f32.xlu0 %v50_v23  ;;  %48 = vadd.xlane.f32.xlu1 %v47_v26 }
  0x9c   :  { %54 = vadd.xlane.f32.xlu1 %v53_v27 }
 0x11d   :  { %v46_v28 = vpop.xlane.xlu0 %45 }
 0x11e   :  { %v56_v29 = vmul.f32 0.03125, %v46_v28 }
 0x120   :  { %v60_v30 = vadd.f32 1e-05, %v56_v29 }
 0x121   :  { %v49_v31 = vpop.xlane.xlu1 %48  ;;  %v52_v32 = vpop.xlane.xlu0 %51 }
 0x122   :  { %104 = vrsqrt.f32 %v60_v30  ;;  %v57_v33 = vmul.f32 0.03125, %v49_v31  ;;  %v58_v34 = vmul.f32 0.03125, %v52_v32 }
 0x124   :  { %v61_v35 = vadd.f32 1e-05, %v57_v33  ;;  %v62_v36 = vadd.f32 1e-05, %v58_v34 }
 0x125   :  { %v55_v37 = vpop.xlane.xlu1 %54 }
 0x126   :  { %106 = vrsqrt.f32 %v61_v35  ;;  %v59_v38 = vmul.f32 0.03125, %v55_v37 }
 0x127   :  { %108 = vrsqrt.f32 %v62_v36 }
 0x128   :  { %v63_v39 = vadd.f32 1e-05, %v59_v38 }
 0x12a   :  { %110 = vrsqrt.f32 %v63_v39 }
 0x12f   :  { %v105_v40 = vpop.eup %104 }
 0x130   :  { %v68_v42 = vmul.f32 %v105_v40, %v36_v12 }
 0x132   :  { %v79_v44 = vmul.f32 %v102_v41, %v68_v42 }
 0x133   :  { %v107_v45 = vpop.eup %106 }
 0x134   :  { %v109_v46 = vpop.eup %108  ;;  %v90_v47 = vadd.f32 %v103_v43, %v79_v44  ;;  %v69_v48 = vmul.f32 %v107_v45, %v37_v20 }
 0x135   :  { %v70_v49 = vmul.f32 %v109_v46, %v38_v13 }
 0x136   :  { %94 = vst.msk [vmem:[%s177_s3] sm:$0xff] %vm18_vm0, %v90_v47  ;;  %v80_v50 = vmul.f32 %v102_v41, %v69_v48 }
 0x137   :  { %v111_v51 = vpop.eup %110  ;;  %v81_v52 = vmul.f32 %v102_v41, %v70_v49 }
 0x138   :  { %v91_v53 = vadd.f32 %v103_v43, %v80_v50  ;;  %v71_v54 = vmul.f32 %v111_v51, %v39_v21 }
 0x139   :  { %v92_v55 = vadd.f32 %v103_v43, %v81_v52 }
 0x13a   :  { %95 = vst.msk [vmem:[%s177_s3 + $0x8] sm:$0xff] %vm18_vm0, %v91_v53  ;;  %v82_v56 = vmul.f32 %v102_v41, %v71_v54 }
 0x13b   :  { %96 = vst.msk [vmem:[%s177_s3 + $0x10] sm:$0xff] %vm18_vm0, %v92_v55 }
 0x13c   :  { %v93_v57 = vadd.f32 %v103_v43, %v82_v56 }
 0x13e   :  { %97 = vst.msk [vmem:[%s177_s3 + $0x18] sm:$0xff] %vm18_vm0, %v93_v57 }

// kernel: transformer_forward.23
= control target key start
LH: loop header
LB: loop body
LE: loop exit
PB: predicated region body
PF: predicated region fallthrough
CT: control target
= control target key end

     0   :  { %vm31_vm0 = vcmask 261120   ;;  %vm232_vm1 = vcmask 523264   ;;  %s486_s0 = inlined_call_operand.vmem [shape: f32[32,32], index: 0, kind: input, shape index: {}]   ;;  %s487_s3 = inlined_call_operand.vmem [shape: bf16[32,64], index: 3, kind: input, shape index: {}]   ;;  %s488_s5 = inlined_call_operand.vmem [shape: bf16[64,32], index: 5, kind: input, shape index: {}]   ;;  %s489_s1 = inlined_call_operand.vmem [shape: f32[1,32], index: 1, kind: input, shape index: {}]   ;;  %s490_s2 = inlined_call_operand.vmem [shape: f32[1,32], index: 2, kind: input, shape index: {}]   ;;  %s491_s4 = inlined_call_operand.vmem [shape: f32[1,64], index: 4, kind: input, shape index: {}]   ;;  %s492_s6 = inlined_call_operand.vmem [shape: f32[1,32], index: 6, kind: input, shape index: {}]   ;;  %s493_s7 = inlined_call_operand.vmem [shape: f32[32,32], index: 7, kind: output, shape index: {}]  }
   0x1   :  { %v401_v0 = vld [vmem:[%s486_s0] sm:$0xff]  ;;  %v406_v1 = vld [vmem:[%s486_s0 + $0x10] sm:$0xff]  ;;  %v411_v2 = vld [vmem:[%s486_s0 + $0x8] sm:$0xff] }
   0x2   :  { %v32_v3 = vsel %vm31_vm0, %v401_v0, 0.0  ;;  %v38_v4 = vsel %vm31_vm0, %v406_v1, 0.0  ;;  %v420_v5 = vld [vmem:[%s486_s0 + $0x18] sm:$0xff]  ;;  %v35_v6 = vsel %vm31_vm0, %v411_v2, 0.0  ;;  %v344_v28 = vld [vmem:[%s487_s3 + $0x8] sm:$0xff]   ;;  %v345_v29 = vld [vmem:[%s487_s3] sm:$0xff]  }
   0x3   :  { %33 = vadd.xlane.f32.xlu0 %v32_v3  ;;  %39 = vadd.xlane.f32.xlu1 %v38_v4  ;;  %v41_v7 = vsel %vm31_vm0, %v420_v5, 0.0  ;;  %v346_v30 = vld [vmem:[%s488_s5 + $0x18] sm:$0xff]   ;;  %v300_v45 = vld [vmem:[%s489_s1] ss:$0 sm:$0xff]  ;;  %v347_v63 = vld [vmem:[%s488_s5 + $0x10] sm:$0xff]  }
   0x4   :  { %324 = vmatprep.subr.bf16.mxu0 %v344_v28  ;;  %332 = vmatprep.subr.bf16.mxu1 %v346_v30  ;;  %v301_v50 = vld [vmem:[%s490_s2] ss:$0 sm:$0xff]  ;;  %v348_v3 = vld [vmem:[%s488_s5 + $0x8] sm:$0xff]  }
   0x5   :  { %325 = vmatpush3.bf16.msra.mxu0 %v344_v28  ;;  %333 = vmatpush3.bf16.msra.mxu1 %v346_v30  ;;  %v349_v4 = vld [vmem:[%s488_s5] sm:$0xff]  }
   0x6   :  { %326 = vmatprep.subr.bf16.mxu0 %v345_v29  ;;  %334 = vmatprep.subr.bf16.mxu1 %v347_v63 }
   0x7   :  { %36 = vadd.xlane.f32.xlu0 %v35_v6  ;;  %42 = vadd.xlane.f32.xlu1 %v41_v7 }
   0x9   :  { %327 = vmatpush3.bf16.msra.mxu0 %v345_v29  ;;  %335 = vmatpush3.bf16.msra.mxu1 %v347_v63 }
   0xa   :  { %336 = vmatprep.subr.bf16.mxu1 %v348_v3 }
   0xd   :  { %337 = vmatpush3.bf16.msra.mxu1 %v348_v3 }
   0xe   :  { %338 = vmatprep.subr.bf16.mxu1 %v349_v4 }
  0x11   :  { %339 = vmatpush3.bf16.msra.mxu1 %v349_v4 }
  0x8c   :  { %v34_v8 = vpop.xlane.xlu0 %33  ;;  %v40_v9 = vpop.xlane.xlu1 %39 }
  0x8d   :  { %v45_v10 = vmul.f32 0.03125, %v34_v8  ;;  %v47_v11 = vmul.f32 0.03125, %v40_v9  ;;  %v302_v8 = vld [vmem:[%s491_s4] ss:$0 sm:$0xff] }
  0x8f   :  { %v49_v12 = vsub.f32 %v401_v0, %v45_v10  ;;  %v51_v13 = vsub.f32 %v406_v1, %v47_v11 }
  0x90   :  { %v37_v14 = vpop.xlane.xlu0 %36  ;;  %v43_v15 = vpop.xlane.xlu1 %42 }
  0x91   :  { %v46_v16 = vmul.f32 0.03125, %v37_v14  ;;  %v48_v17 = vmul.f32 0.03125, %v43_v15  ;;  %v53_v18 = vmul.f32 %v49_v12, %v49_v12  ;;  %v55_v19 = vmul.f32 %v51_v13, %v51_v13 }
  0x93   :  { %v50_v20 = vsub.f32 %v411_v2, %v46_v16  ;;  %v52_v21 = vsub.f32 %v420_v5, %v48_v17  ;;  %v57_v22 = vsel %vm31_vm0, %v53_v18, 0.0  ;;  %v63_v23 = vsel %vm31_vm0, %v55_v19, 0.0 }
  0x94   :  { %58 = vadd.xlane.f32.xlu0 %v57_v22 }
  0x95   :  { %v54_v24 = vmul.f32 %v50_v20, %v50_v20  ;;  %v56_v25 = vmul.f32 %v52_v21, %v52_v21 }
  0x97   :  { %v60_v26 = vsel %vm31_vm0, %v54_v24, 0.0  ;;  %v66_v27 = vsel %vm31_vm0, %v56_v25, 0.0 }
  0x98   :  { %64 = vadd.xlane.f32.xlu0 %v63_v23  ;;  %61 = vadd.xlane.f32.xlu1 %v60_v26 }
  0x9c   :  { %67 = vadd.xlane.f32.xlu1 %v66_v27 }
 0x11d   :  { %v59_v31 = vpop.xlane.xlu0 %58 }
 0x11e   :  { %v69_v32 = vmul.f32 0.03125, %v59_v31 }
 0x120   :  { %v73_v33 = vadd.f32 1e-05, %v69_v32 }
 0x121   :  { %v62_v34 = vpop.xlane.xlu1 %61  ;;  %v65_v35 = vpop.xlane.xlu0 %64 }
 0x122   :  { %350 = vrsqrt.f32 %v73_v33  ;;  %v70_v36 = vmul.f32 0.03125, %v62_v34  ;;  %v71_v37 = vmul.f32 0.03125, %v65_v35 }
 0x124   :  { %v74_v38 = vadd.f32 1e-05, %v70_v36  ;;  %v75_v39 = vadd.f32 1e-05, %v71_v37 }
 0x125   :  { %v68_v40 = vpop.xlane.xlu1 %67 }
 0x126   :  { %352 = vrsqrt.f32 %v74_v38  ;;  %v72_v41 = vmul.f32 0.03125, %v68_v40 }
 0x127   :  { %354 = vrsqrt.f32 %v75_v39 }
 0x128   :  { %v76_v42 = vadd.f32 1e-05, %v72_v41 }
 0x12a   :  { %356 = vrsqrt.f32 %v76_v42 }
 0x12f   :  { %v351_v43 = vpop.eup %350 }
 0x130   :  { %v81_v44 = vmul.f32 %v351_v43, %v49_v12 }
 0x132   :  { %v92_v49 = vmul.f32 %v300_v45, %v81_v44 }
 0x133   :  { %v353_v46 = vpop.eup %352 }
 0x134   :  { %v355_v47 = vpop.eup %354  ;;  %v82_v48 = vmul.f32 %v353_v46, %v50_v20  ;;  %v103_v54 = vadd.f32 %v301_v50, %v92_v49 }
 0x135   :  { %v83_v51 = vmul.f32 %v355_v47, %v51_v13 }
 0x136   :  { %v93_v52 = vmul.f32 %v300_v45, %v82_v48 }
 0x137   :  { %v357_v53 = vpop.eup %356  ;;  %v94_v57 = vmul.f32 %v300_v45, %v83_v51 }
 0x138   :  { %v104_v55 = vadd.f32 %v301_v50, %v93_v52  ;;  %v84_v56 = vmul.f32 %v357_v53, %v52_v21  ;;  %v307_v21 = vld [vmem:[%s492_s6] ss:$0 sm:$0xff] }
 0x139   :  { %v105_v60 = vadd.f32 %v301_v50, %v94_v57 }
 0x13a   :  { %v107_v58 = vpack.c.bf16 %v104_v55, %v103_v54  ;;  %v95_v59 = vmul.f32 %v300_v45, %v84_v56 }
 0x13c   :  { %328 = vmatprep.mubr.msk.bf16.mxu0 %vm31_vm0, %v107_v58  ;;  %v106_v61 = vadd.f32 %v301_v50, %v95_v59 }
 0x13e   :  { %v108_v62 = vpack.c.bf16 %v106_v61, %v105_v60 }
 0x140   :  { %329 = vmatmul.mubr.msk.bf16.vlgmr.msra.gmra.mxu0 %vm31_vm0, %v108_v62 }
 0x200   :  { %v330_v6 = vpop.f32.mrf.mxu0 }
 0x201   :  { %v181_v12 = vadd.f32 %v330_v6, %v302_v8 }
 0x202   :  { %v172_v7 = vpop.f32.mrf.mxu0 }
 0x203   :  { %v173_v10 = vadd.f32 %v302_v8, %v172_v7  ;;  %v189_v18 = vmax.f32 %v181_v12, 0.0 }
 0x204   :  { %v331_v9 = vpop.f32.mrf.mxu0 }
 0x205   :  { %v184_v11 = vadd.f32 %v331_v9, %v302_v8  ;;  %v187_v16 = vmax.f32 %v173_v10, 0.0 }
 0x206   :  { %v175_v13 = vpop.f32.mrf.mxu0 }
 0x207   :  { %v176_v14 = vadd.f32 %v302_v8, %v175_v13  ;;  %v190_v15 = vmax.f32 %v184_v11, 0.0 }
 0x209   :  { %v188_v17 = vmax.f32 %v176_v14, 0.0  ;;  %v192_v20 = vpack.c.bf16 %v190_v15, %v189_v18 }
 0x20b   :  { %v191_v19 = vpack.c.bf16 %v188_v17, %v187_v16 }
 0x20d   :  { %340 = vmatprep.mubr.msk.bf16.mxu1 %vm232_vm1, %v191_v19 }
 0x20e   :  { %341 = vmatmul.mubr.msk.bf16.vlgmr.msra.gmra.mxu1 %vm232_vm1, %v192_v20 }
 0x2ce   :  { %v342_v22 = vpop.f32.mrf.mxu1 }
 0x2cf   :  { %v282_v23 = vadd.f32 %v342_v22, %v307_v21 }
 0x2d0   :  { %v273_v24 = vpop.f32.mrf.mxu1 }
 0x2d1   :  { %v290_v25 = vadd.f32 %v282_v23, %v406_v1  ;;  %v274_v26 = vadd.f32 %v307_v21, %v273_v24 }
 0x2d2   :  { %v343_v27 = vpop.f32.mrf.mxu1 }
 0x2d3   :  { %294 = vst.msk [vmem:[%s493_s7 + $0x10] sm:$0xff] %vm31_vm0, %v290_v25  ;;  %v288_v28 = vadd.f32 %v274_v26, %v401_v0  ;;  %v285_v29 = vadd.f32 %v343_v27, %v307_v21 }
 0x2d4   :  { %v276_v30 = vpop.f32.mrf.mxu1 }
 0x2d5   :  { %292 = vst.msk [vmem:[%s493_s7] sm:$0xff] %vm31_vm0, %v288_v28  ;;  %v291_v31 = vadd.f32 %v285_v29, %v420_v5  ;;  %v277_v32 = vadd.f32 %v307_v21, %v276_v30 }
 0x2d7   :  { %295 = vst.msk [vmem:[%s493_s7 + $0x18] sm:$0xff] %vm31_vm0, %v291_v31  ;;  %v289_v1 = vadd.f32 %v277_v32, %v411_v2 }
 0x2d9   :  { %293 = vst.msk [vmem:[%s493_s7 + $0x8] sm:$0xff] %vm31_vm0, %v289_v1 }

// kernel: transformer_forward.21
= control target key start
LH: loop header
LB: loop body
LE: loop exit
PB: predicated region body
PF: predicated region fallthrough
CT: control target
= control target key end

     0   :  { %vm33_vm0 = vcmask 261120   ;;  %vm205_vm1 = vcmask 257024   ;;  %vm298_vm2 = vcmask 519168   ;;  %s500_s0 = inlined_call_operand.vmem [shape: f32[32,32], index: 0, kind: input, shape index: {}]   ;;  %s501_s3 = inlined_call_operand.vmem [shape: bf16[32,32], index: 3, kind: input, shape index: {}]   ;;  %s502_s5 = inlined_call_operand.vmem [shape: bf16[32,64], index: 5, kind: input, shape index: {}]   ;;  %s503_s1 = inlined_call_operand.vmem [shape: f32[1,32], index: 1, kind: input, shape index: {}]   ;;  %s504_s2 = inlined_call_operand.vmem [shape: f32[1,32], index: 2, kind: input, shape index: {}]   ;;  %s505_s4 = inlined_call_operand.vmem [shape: f32[1,32], index: 4, kind: input, shape index: {}]   ;;  %s506_s6 = inlined_call_operand.vmem [shape: f32[1,64], index: 6, kind: input, shape index: {}]   ;;  %s507_s7 = inlined_call_operand.vmem [shape: bf16[32,32], index: 7, kind: output, shape index: {0}]   ;;  %s508_s8 = inlined_call_operand.vmem [shape: bf16[32,64], index: 8, kind: output, shape index: {1}]  }
   0x1   :  { %v29_v0 = vld [vmem:[%s500_s0] sm:$0xff]  ;;  %v31_v1 = vld [vmem:[%s500_s0 + $0x10] sm:$0xff]  ;;  %v30_v2 = vld [vmem:[%s500_s0 + $0x8] sm:$0xff] }
   0x2   :  { %v34_v3 = vsel %vm33_vm0, %v29_v0, 0.0  ;;  %v40_v4 = vsel %vm33_vm0, %v31_v1, 0.0  ;;  %v32_v5 = vld [vmem:[%s500_s0 + $0x18] sm:$0xff]  ;;  %v37_v6 = vsel %vm33_vm0, %v30_v2, 0.0  ;;  %v363_v28 = vld [vmem:[%s501_s3 + $0x8] sm:$0xff]   ;;  %v365_v30 = vld [vmem:[%s501_s3] sm:$0xff]  }
   0x3   :  { %35 = vadd.xlane.f32.xlu0 %v34_v3  ;;  %41 = vadd.xlane.f32.xlu1 %v40_v4  ;;  %v43_v7 = vsel %vm33_vm0, %v32_v5, 0.0  ;;  %v364_v29 = vld [vmem:[%s502_s5 + $0x8] sm:$0xff]   ;;  %v366_v31 = vld [vmem:[%s502_s5] sm:$0xff]  }
   0x4   :  { %347 = vmatprep.subr.bf16.mxu0 %v363_v28  ;;  %355 = vmatprep.subr.bf16.mxu1 %v364_v29  ;;  %v311_v46 = vld [vmem:[%s503_s1] ss:$0 sm:$0xff] }
   0x5   :  { %348 = vmatpush3.bf16.msra.mxu0 %v363_v28  ;;  %356 = vmatpush3.bf16.msra.mxu1 %v364_v29  ;;  %v312_v51 = vld [vmem:[%s504_s2] ss:$0 sm:$0xff] }
   0x6   :  { %349 = vmatprep.subr.bf16.mxu0 %v365_v30  ;;  %357 = vmatprep.subr.bf16.mxu1 %v366_v31 }
   0x7   :  { %38 = vadd.xlane.f32.xlu0 %v37_v6  ;;  %44 = vadd.xlane.f32.xlu1 %v43_v7 }
   0x9   :  { %350 = vmatpush3.bf16.msra.mxu0 %v365_v30  ;;  %358 = vmatpush3.bf16.msra.mxu1 %v366_v31 }
  0x8c   :  { %v36_v8 = vpop.xlane.xlu0 %35  ;;  %v42_v9 = vpop.xlane.xlu1 %41 }
  0x8d   :  { %v47_v10 = vmul.f32 0.03125, %v36_v8  ;;  %v49_v11 = vmul.f32 0.03125, %v42_v9 }
  0x8f   :  { %v51_v12 = vsub.f32 %v29_v0, %v47_v10  ;;  %v53_v13 = vsub.f32 %v31_v1, %v49_v11  ;;  %v313_v0 = vld [vmem:[%s505_s4] ss:$0 sm:$0xff] }
  0x90   :  { %v39_v14 = vpop.xlane.xlu0 %38  ;;  %v45_v15 = vpop.xlane.xlu1 %44  ;;  %v322_v1 = vld [vmem:[%s506_s6] ss:$0 sm:$0xff] }
  0x91   :  { %v48_v16 = vmul.f32 0.03125, %v39_v14  ;;  %v50_v17 = vmul.f32 0.03125, %v45_v15  ;;  %v55_v18 = vmul.f32 %v51_v12, %v51_v12  ;;  %v57_v19 = vmul.f32 %v53_v13, %v53_v13 }
  0x93   :  { %v52_v20 = vsub.f32 %v30_v2, %v48_v16  ;;  %v54_v21 = vsub.f32 %v32_v5, %v50_v17  ;;  %v59_v22 = vsel %vm33_vm0, %v55_v18, 0.0  ;;  %v65_v23 = vsel %vm33_vm0, %v57_v19, 0.0 }
  0x94   :  { %60 = vadd.xlane.f32.xlu0 %v59_v22 }
  0x95   :  { %v56_v24 = vmul.f32 %v52_v20, %v52_v20  ;;  %v58_v25 = vmul.f32 %v54_v21, %v54_v21 }
  0x97   :  { %v62_v26 = vsel %vm33_vm0, %v56_v24, 0.0  ;;  %v68_v27 = vsel %vm33_vm0, %v58_v25, 0.0 }
  0x98   :  { %66 = vadd.xlane.f32.xlu0 %v65_v23  ;;  %63 = vadd.xlane.f32.xlu1 %v62_v26 }
  0x9c   :  { %69 = vadd.xlane.f32.xlu1 %v68_v27 }
 0x11d   :  { %v61_v32 = vpop.xlane.xlu0 %60 }
 0x11e   :  { %v71_v33 = vmul.f32 0.03125, %v61_v32 }
 0x120   :  { %v75_v34 = vadd.f32 1e-05, %v71_v33 }
 0x121   :  { %v64_v35 = vpop.xlane.xlu1 %63  ;;  %v67_v36 = vpop.xlane.xlu0 %66 }
 0x122   :  { %367 = vrsqrt.f32 %v75_v34  ;;  %v72_v37 = vmul.f32 0.03125, %v64_v35  ;;  %v73_v38 = vmul.f32 0.03125, %v67_v36 }
 0x124   :  { %v76_v39 = vadd.f32 1e-05, %v72_v37  ;;  %v77_v40 = vadd.f32 1e-05, %v73_v38 }
 0x125   :  { %v70_v41 = vpop.xlane.xlu1 %69 }
 0x126   :  { %369 = vrsqrt.f32 %v76_v39  ;;  %v74_v42 = vmul.f32 0.03125, %v70_v41 }
 0x127   :  { %371 = vrsqrt.f32 %v77_v40 }
 0x128   :  { %v78_v43 = vadd.f32 1e-05, %v74_v42 }
 0x12a   :  { %373 = vrsqrt.f32 %v78_v43 }
 0x12f   :  { %v368_v44 = vpop.eup %367 }
 0x130   :  { %v83_v45 = vmul.f32 %v368_v44, %v51_v12 }
 0x132   :  { %v94_v50 = vmul.f32 %v311_v46, %v83_v45 }
 0x133   :  { %v370_v47 = vpop.eup %369 }
 0x134   :  { %v372_v48 = vpop.eup %371  ;;  %v84_v49 = vmul.f32 %v370_v47, %v52_v20  ;;  %v105_v55 = vadd.f32 %v312_v51, %v94_v50 }
 0x135   :  { %v85_v52 = vmul.f32 %v372_v48, %v53_v13 }
 0x136   :  { %v95_v53 = vmul.f32 %v311_v46, %v84_v49 }
 0x137   :  { %v374_v54 = vpop.eup %373  ;;  %v96_v58 = vmul.f32 %v311_v46, %v85_v52 }
 0x138   :  { %v106_v56 = vadd.f32 %v312_v51, %v95_v53  ;;  %v86_v57 = vmul.f32 %v374_v54, %v54_v21 }
 0x139   :  { %v107_v61 = vadd.f32 %v312_v51, %v96_v58 }
 0x13a   :  { %v109_v59 = vpack.c.bf16 %v106_v56, %v105_v55  ;;  %v97_v60 = vmul.f32 %v311_v46, %v86_v57 }
 0x13c   :  { %351 = vmatprep.mubr.msk.bf16.mxu0 %vm33_vm0, %v109_v59  ;;  %359 = vmatprep.mubr.msk.bf16.mxu1 %vm33_vm0, %v109_v59  ;;  %v108_v62 = vadd.f32 %v312_v51, %v97_v60 }
 0x13e   :  { %v110_v63 = vpack.c.bf16 %v108_v62, %v107_v61 }
 0x140   :  { %352 = vmatmul.mubr.msk.bf16.vlgmr.msra.gmra.mxu0 %vm33_vm0, %v110_v63  ;;  %360 = vmatmul.mubr.msk.bf16.vlgmr.msra.gmra.mxu1 %vm33_vm0, %v110_v63 }
 0x200   :  { %v353_v2 = vpop.f32.mrf.mxu0  ;;  %v361_v3 = vpop.f32.mrf.mxu1 }
 0x201   :  { %v183_v4 = vadd.f32 %v353_v2, %v313_v0  ;;  %v276_v5 = vadd.f32 %v361_v3, %v322_v1 }
 0x202   :  { %v174_v6 = vpop.f32.mrf.mxu0  ;;  %v267_v7 = vpop.f32.mrf.mxu1 }
 0x203   :  { %v333_v8 = vpack.c.bf16 %v183_v4, %v183_v4  ;;  %v337_v9 = vpack.c.bf16 %v276_v5, %v276_v5  ;;  %v175_v10 = vadd.f32 %v313_v0, %v174_v6  ;;  %v268_v11 = vadd.f32 %v322_v1, %v267_v7 }
 0x204   :  { %v354_v12 = vpop.f32.mrf.mxu0  ;;  %v362_v13 = vpop.f32.mrf.mxu1 }
 0x205   :  { %208 = vst.msk [vmem:[%s507_s7 + $0x8] sm:$0xf] %vm205_vm1, %v333_v8  ;;  %v331_v14 = vpack.c.bf16 %v175_v10, %v175_v10  ;;  %v335_v15 = vpack.c.bf16 %v268_v11, %v268_v11  ;;  %v186_v16 = vadd.f32 %v354_v12, %v313_v0  ;;  %v279_v17 = vadd.f32 %v362_v13, %v322_v1 }
 0x206   :  { %301 = vst.msk [vmem:[%s508_s8 + $0x8] sm:$0xf] %vm298_vm2, %v337_v9  ;;  %v177_v18 = vpop.f32.mrf.mxu0  ;;  %v270_v19 = vpop.f32.mrf.mxu1 }
 0x207   :  { %206 = vst.msk [vmem:[%s507_s7] sm:$0xf] %vm205_vm1, %v331_v14  ;;  %v334_v20 = vpack.c.bf16 %v186_v16, %v186_v16  ;;  %v338_v21 = vpack.c.bf16 %v279_v17, %v279_v17  ;;  %v178_v22 = vadd.f32 %v313_v0, %v177_v18  ;;  %v271_v23 = vadd.f32 %v322_v1, %v270_v19 }
 0x208   :  { %299 = vst.msk [vmem:[%s508_s8] sm:$0xf] %vm298_vm2, %v335_v15 }
 0x209   :  { %209 = vst.msk [vmem:[%s507_s7 + $0xc] sm:$0xf] %vm205_vm1, %v334_v20  ;;  %v332_v24 = vpack.c.bf16 %v178_v22, %v178_v22  ;;  %v336_v25 = vpack.c.bf16 %v271_v23, %v271_v23 }
 0x20a   :  { %302 = vst.msk [vmem:[%s508_s8 + $0xc] sm:$0xf] %vm298_vm2, %v338_v21 }
 0x20b   :  { %207 = vst.msk [vmem:[%s507_s7 + $0x4] sm:$0xf] %vm205_vm1, %v332_v24 }
 0x20c   :  { %300 = vst.msk [vmem:[%s508_s8 + $0x4] sm:$0xf] %vm298_vm2, %v336_v25 }

// kernel: transformer_forward.22
= control target key start
LH: loop header
LB: loop body
LE: loop exit
PB: predicated region body
PF: predicated region fallthrough
CT: control target
= control target key end

     0   :  { %s1476_s21 = smov 0   ;;  %s1478_s22 = smov 0   ;;  %s1648_s0 = inlined_call_operand.vmem [shape: bf16[2,16,32], index: 0, kind: input, shape index: {}]   ;;  %s1649_s1 = inlined_call_operand.vmem [shape: bf16[2,16,64], index: 1, kind: input, shape index: {}]   ;;  %s1650_s2 = inlined_call_operand.vmem [shape: f32[2,1,16], index: 2, kind: input, shape index: {}]   ;;  %s1651_s3 = inlined_call_operand.vmem [shape: bf16[32,32], index: 3, kind: input, shape index: {}]   ;;  %s1652_s4 = inlined_call_operand.vmem [shape: f32[1,32], index: 4, kind: input, shape index: {}]   ;;  %s1653_s5 = inlined_call_operand.vmem [shape: f32[2,16,32], index: 5, kind: input, shape index: {}]   ;;  %s1654_s6 = inlined_call_operand.vmem [shape: f32[2,16,32], index: 6, kind: output, shape index: {}]  }
   0x1   :  { %s1480_s23 = smov 0  }
   0x2 LB: > { %s28_s24 = sadd.s32 1, %s1426_s22  ;;  %p1214_p0 = scmp.ge.s32.totalorder %s1430_s23, 1  ;;  %s1430_s23 = sphi %s1480_s23, %s16_s23   ;;  %s1426_s22 = sphi %s1478_s22, %s1656_s22   ;;  %s1422_s21 = sphi %s1476_s21, %s1655_s21  }
   0x3   : > { %p30_p1 = scmp.ge.s32.totalorder %s28_s24, 2  ;;  %p268_p2 = scmp.lt.s32.totalorder %s1430_s23, 3 }
   0x5   : > { %s1658_s24 = smov (%p30_p1, %s28_s24), 0  ;;  %p269_p3 = pnand %p1214_p0, %p268_p2 }
   0x6   : > { %p324_p4 = scmp.lt.s32.totalorder (!%p269_p3), %s1422_s21, 1  ;;  %s1434_s8 = smov (!%p269_p3), 120  }
   0x7   : > { %272 = sbr.rel (%p269_p3) target bundleno = 2192 (0x890), region = 44  ;;  %s1435_s12 = smov (!%p269_p3), 96  }
   0x8   : > { %s1436_s13 = smov (!%p269_p3), 112   ;;  %s1437_s16 = smov (!%p269_p3), 88  }
   0x9   : > { %s1438_s19 = smov (!%p269_p3), 104   ;;  %s1439_s30 = smov (!%p269_p3), 80  }
   0xa   : > { %s1440_s9 = smov (!%p269_p3), 72  }
   0xc   : > { %v1432_v0 = vmov 0.0   ;;  %vm1433_vm0 = vmmov 0   ;;  %s1660_s21 = smov (!%p324_p4, %s1422_s21), 1  ;;  %vm394_vm1 = vcmask 64512   ;;  %vm442_vm2 = vcmask 130048  }
   0xd   : > { %1269 = vmatprep.subr.bf16.mxu0 %v1432_v0  ;;  %1271 = vmatprep.mubr.msk.bf16.mxu0 %vm1433_vm0, %v1432_v0  ;;  %s1241_s25 = sshll.u32 %s1660_s21, 3  ;;  %s340_s11 = scalar_lea.vmem %s1650_s2, %s1660_s21  ;;  %v514_v52 = vld [vmem:[%s1651_s3] sm:$0xf]  ;;  %vm518_vm3 = vcmask 1043456   ;;  %vm1081_vm4 = vcmask 261120  }
   0xe   : > { %1275 = vmatprep.subr.bf16.mxu1 %v1432_v0  ;;  %1277 = vmatprep.mubr.msk.bf16.mxu1 %vm1433_vm0, %v1432_v0  ;;  %s337_s28 = scalar_lea.vmem %s1649_s1, %s1241_s25  ;;  %s331_s7 = scalar_lea.vmem %s1648_s0, %s1241_s25  ;;  %v1531_v7 = vld [vmem:[%s340_s11] ss:$0 sm:$0xff]  ;;  %v520_v53 = vsel %vm518_vm3, %v514_v52, 0 }
   0xf   : > { %v1506_v1 = vld [vmem:[%s337_s28] sm:$0xff]   ;;  %s1243_s20 = sshll.u32 %s1660_s21, 4 }
  0x10   : > { %v399_v2 = vsel %vm394_vm1, %v1506_v1, 0  ;;  %567 = vrot.lane.b32.xlu0 %v1506_v1, %s1434_s8  ;;  %v1514_v3 = vld [vmem:[%s331_s7] sm:$0xff]   ;;  %s349_s27 = scalar_lea.vmem %s1653_s5, %s1243_s20  ;;  %s359_s14 = scalar_lea.vmem %s1654_s6, %s1243_s20 }
  0x11   : > { %1270 = vmatpush3.bf16.xpose.msra.mxu0 %v399_v2 }
  0x12   : > { %1287 = vmatprep.subr.bf16.mxu0 %v1432_v0 }
  0x14   : > { %565 = vrot.lane.b32.xlu0 %v1514_v3, %s1434_s8 }
  0x18   : > { %1272 = vmatmul.mubr.msk.bf16.vlgmr.msra.gmra.mxu0 %vm394_vm1, %v1514_v3 }
  0x19   : > { %1289 = vmatprep.mubr.msk.bf16.mxu0 %vm1433_vm0, %v1432_v0 }
  0x82   : > { %v568_v4 = vpop.permute.xlu0 %567 }
  0x83   : > { %v573_v5 = vsel %vm394_vm1, %v568_v4, 0 }
  0x84   : > { %1288 = vmatpush3.bf16.xpose.msra.mxu0 %v573_v5 }
  0x85   : > { %1299 = vmatprep.subr.bf16.mxu0 %v1432_v0 }
  0x86   : > { %v566_v6 = vpop.permute.xlu0 %565 }
  0x8b   : > { %1290 = vmatmul.mubr.msk.bf16.vlgmr.msra.gmra.mxu0 %vm394_vm1, %v566_v6 }
  0x8c   : > { %1301 = vmatprep.mubr.msk.bf16.mxu0 %vm1433_vm0, %v1432_v0 }
  0xd8   : > { %v435_v8 = vpop.f32.mrf.mxu0 }
  0xd9   : > { %v436_v9 = vadd.f32 %v1531_v7, %v435_v8 }
  0xda   : > { %v1273_v10 = vpop.f32.mrf.mxu0 }
  0xdb   : > { %v443_v11 = vsel %vm442_vm2, %v436_v9, -inf  ;;  %v687_v10 = vld [vmem:[%s1651_s3 + $0x4] sm:$0xf] }
  0xdc   : > { %444 = vmax.xlane.f32.xlu1 %v443_v11  ;;  %v438_v12 = vpop.f32.mrf.mxu0  ;;  %v692_v11 = vsel %vm518_vm3, %v687_v10, 0 }
  0xdd   : > { %v439_v13 = vadd.f32 %v1531_v7, %v438_v12  ;;  %1300 = vmatpush3.bf16.msra.mxu0 %v692_v11 }
  0xde   : > { %v1274_v14 = vpop.f32.mrf.mxu0  ;;  %1311 = vmatprep.subr.bf16.mxu0 %v1432_v0 }
  0xdf   : > { %v446_v15 = vsel %vm442_vm2, %v439_v13, -inf }
  0xe0   : > { %447 = vmax.xlane.f32.xlu1 %v446_v15 }
 0x14b   : > { %v609_v16 = vpop.f32.mrf.mxu0 }
 0x14c   : > { %v610_v32 = vadd.f32 %v1531_v7, %v609_v16 }
 0x14d   : > { %v1291_v17 = vpop.f32.mrf.mxu0 }
 0x14e   : > { %v616_v33 = vsel %vm442_vm2, %v610_v32, -inf }
 0x14f   : > { %v612_v18 = vpop.f32.mrf.mxu0 }
 0x150   : > { %v613_v26 = vadd.f32 %v1531_v7, %v612_v18 }
 0x151   : > { %v1292_v19 = vpop.f32.mrf.mxu0 }
 0x152   : > { %v619_v29 = vsel %vm442_vm2, %v613_v26, -inf }
 0x165   : > { %v445_v20 = vpop.xlane.xlu1 %444 }
 0x166   : > { %v449_v21 = vsub.f32 %v436_v9, %v445_v20 }
 0x168   : > { %v451_v22 = vmul.f32 1.442695, %v449_v21 }
 0x169   : > { %v448_v23 = vpop.xlane.xlu1 %447 }
 0x16a   : > { %1376 = vpow2.f32 %v451_v22  ;;  %v450_v24 = vsub.f32 %v439_v13, %v448_v23 }
 0x16c   : > { %v453_v25 = vmul.f32 1.442695, %v450_v24 }
 0x16e   : > { %1378 = vpow2.f32 %v453_v25 }
 0x177   : > { %v1377_v27 = vpop.eup %1376 }
 0x178   : > { %v455_v28 = vsel %vm442_vm2, %v1377_v27, 0.0 }
 0x179   : > { %456 = vadd.xlane.f32.xlu0 %v455_v28 }
 0x17b   : > { %v1379_v30 = vpop.eup %1378 }
 0x17c   : > { %v458_v31 = vsel %vm442_vm2, %v1379_v30, 0.0 }
 0x17d   : > { %459 = vadd.xlane.f32.xlu1 %v458_v31  ;;  %620 = vmax.xlane.f32.xlu0 %v619_v29 }
 0x18e   : > { %466 = vrot.lane.b32.xlu1 %v1506_v1, %s1435_s12 }
 0x1b2   : > { %617 = vmax.xlane.f32.xlu1 %v616_v33 }
 0x1c3   : > { %739 = vrot.lane.b32.xlu1 %v1506_v1, %s1436_s13 }
 0x202   : > { %v457_v34 = vpop.xlane.xlu0 %456 }
 0x203   : > { %1380 = vrcp.f32 %v457_v34 }
 0x206   : > { %v460_v35 = vpop.xlane.xlu1 %459  ;;  %v621_v42 = vpop.xlane.xlu0 %620 }
 0x207   : > { %1382 = vrcp.f32 %v460_v35  ;;  %v623_v43 = vsub.f32 %v613_v26, %v621_v42 }
 0x209   : > { %v626_v46 = vmul.f32 1.442695, %v623_v43 }
 0x20a   : > { %v467_v36 = vpop.permute.xlu1 %466 }
 0x20b   : > { %1276 = vmatpush3.bf16.msra.mxu1 %v467_v36 }
 0x20c   : > { %1281 = vmatprep.subr.bf16.mxu1 %v1432_v0 }
 0x210   : > { %v1381_v37 = vpop.eup %1380 }
 0x211   : > { %v463_v39 = vmul.f32 %v1381_v37, %v1377_v27 }
 0x214   : > { %v1383_v38 = vpop.eup %1382 }
 0x215   : > { %v464_v40 = vmul.f32 %v1383_v38, %v1379_v30 }
 0x217   : > { %v465_v41 = vpack.c.bf16 %v464_v40, %v463_v39  ;;  %v1223_v39 = vld [vmem:[%s1652_s4] ss:$0 sm:$0xff] }
 0x219   : > { %1278 = vmatmul.mubr.msk.bf16.vlgmr.msra.gmra.mxu1 %vm442_vm2, %v465_v41  ;;  %v368_v41 = vld [vmem:[%s349_s27 + $0x8] sm:$0xff] }
 0x21a   : > { %1283 = vmatprep.mubr.msk.bf16.mxu1 %vm1433_vm0, %v1432_v0  ;;  %1282 = vmatpush3.bf16.msra.mxu1 %v520_v53  ;;  %v377_v43 = vadd.f32 %v1223_v39, %v368_v41 }
 0x21b   : > { %1293 = vmatprep.subr.bf16.mxu1 %v1432_v0 }
 0x23b   : > { %v618_v44 = vpop.xlane.xlu1 %617 }
 0x23c   : > { %v622_v45 = vsub.f32 %v610_v32, %v618_v44 }
 0x23e   : > { %v624_v47 = vmul.f32 1.442695, %v622_v45 }
 0x23f   : > { %v740_v2 = vpop.permute.xlu1 %739 }
 0x240   : > { %1384 = vpow2.f32 %v624_v47  ;;  %v745_v6 = vsel %vm394_vm1, %v740_v2, 0 }
 0x241   : > { %1386 = vpow2.f32 %v626_v46 }
 0x24d   : > { %v1385_v48 = vpop.eup %1384 }
 0x24e   : > { %v628_v49 = vsel %vm442_vm2, %v1385_v48, 0.0  ;;  %v1387_v50 = vpop.eup %1386 }
 0x24f   : > { %629 = vadd.xlane.f32.xlu0 %v628_v49  ;;  %v631_v51 = vsel %vm442_vm2, %v1387_v50, 0.0 }
 0x253   : > { %632 = vadd.xlane.f32.xlu0 %v631_v51 }
 0x269   : > { %639 = vrot.lane.b32.xlu0 %v1506_v1, %s1437_s16 }
 0x26d   : > { %737 = vrot.lane.b32.xlu0 %v1514_v3, %s1436_s13 }
 0x2d8   : > { %v630_v54 = vpop.xlane.xlu0 %629 }
 0x2d9   : > { %v506_v55 = vpop.f32.mrf.mxu1  ;;  %1388 = vrcp.f32 %v630_v54 }
 0x2db   : > { %v1279_v56 = vpop.f32.mrf.mxu1 }
 0x2dc   : > { %v633_v57 = vpop.xlane.xlu0 %632 }
 0x2dd   : > { %1390 = vrcp.f32 %v633_v57  ;;  %v509_v58 = vpop.f32.mrf.mxu1 }
 0x2de   : > { %v513_v59 = vpack.c.bf16 %v509_v58, %v506_v55 }
 0x2df   : > { %v1280_v60 = vpop.f32.mrf.mxu1 }
 0x2e0   : > { %1284 = vmatmul.mubr.msk.bf16.vlgmr.msra.gmra.mxu1 %vm394_vm1, %v513_v59  ;;  %v640_v61 = vpop.permute.xlu0 %639 }
 0x2e1   : > { %1294 = vmatpush3.bf16.msra.mxu1 %v640_v61  ;;  %1295 = vmatprep.mubr.msk.bf16.mxu1 %vm1433_vm0, %v1432_v0 }
 0x2e2   : > { %1305 = vmatprep.subr.bf16.mxu1 %v1432_v0 }
 0x2e4   : > { %v738_v9 = vpop.permute.xlu0 %737 }
 0x2e6   : > { %v1389_v62 = vpop.eup %1388 }
 0x2e7   : > { %v636_v4 = vmul.f32 %v1389_v62, %v1385_v48  ;;  %v859_v62 = vld [vmem:[%s1651_s3 + $0x8] sm:$0xf] }
 0x2ea   : > { %v1391_v63 = vpop.eup %1390 }
 0x2eb   : > { %v637_v5 = vmul.f32 %v1391_v63, %v1387_v50  ;;  %v864_v63 = vsel %vm518_vm3, %v859_v62, 0 }
 0x2ed   : > { %v638_v8 = vpack.c.bf16 %v637_v5, %v636_v4 }
 0x2ef   : > { %1296 = vmatmul.mubr.msk.bf16.vlgmr.msra.gmra.mxu1 %vm442_vm2, %v638_v8 }
 0x2f0   : > { %1306 = vmatpush3.bf16.xpose.msra.mxu1 %v745_v6  ;;  %1307 = vmatprep.mubr.msk.bf16.mxu1 %vm1433_vm0, %v1432_v0 }
 0x2f1   : > { %1317 = vmatprep.subr.bf16.mxu1 %v1432_v0 }
 0x2f7   : > { %1308 = vmatmul.mubr.msk.bf16.vlgmr.msra.gmra.mxu1 %vm394_vm1, %v738_v9 }
 0x2f8   : > { %1319 = vmatprep.mubr.msk.bf16.mxu1 %vm1433_vm0, %v1432_v0  ;;  %1318 = vmatpush3.bf16.msra.mxu1 %v864_v63 }
 0x2f9   : > { %1329 = vmatprep.subr.bf16.mxu1 %v1432_v0 }
 0x3a0   : > { %v556_v12 = vpop.f32.mrf.mxu1 }
 0x3a2   : > { %v1285_v13 = vpop.f32.mrf.mxu1 }
 0x3a4   : > { %v559_v14 = vpop.f32.mrf.mxu1 }
 0x3a5   : > { %v564_v47 = vadd.f32 %v559_v14, %v377_v43 }
 0x3a6   : > { %v1286_v15 = vpop.f32.mrf.mxu1 }
 0x3af   : > { %v679_v16 = vpop.f32.mrf.mxu1 }
 0x3b1   : > { %v1297_v17 = vpop.f32.mrf.mxu1 }
 0x3b3   : > { %v682_v18 = vpop.f32.mrf.mxu1 }
 0x3b4   : > { %v686_v19 = vpack.c.bf16 %v682_v18, %v679_v16 }
 0x3b5   : > { %v1298_v20 = vpop.f32.mrf.mxu1 }
 0x3b6   : > { %1302 = vmatmul.mubr.msk.bf16.vlgmr.msra.gmra.mxu0 %vm394_vm1, %v686_v19 }
 0x3b7   : > { %v781_v21 = vpop.f32.mrf.mxu1  ;;  %1313 = vmatprep.mubr.msk.bf16.mxu0 %vm1433_vm0, %v1432_v0 }
 0x3b8   : > { %v782_v22 = vadd.f32 %v1531_v7, %v781_v21 }
 0x3b9   : > { %v1309_v23 = vpop.f32.mrf.mxu1 }
 0x3ba   : > { %v788_v24 = vsel %vm442_vm2, %v782_v22, -inf }
 0x3bb   : > { %789 = vmax.xlane.f32.xlu0 %v788_v24  ;;  %v784_v25 = vpop.f32.mrf.mxu1 }
 0x3bc   : > { %v785_v26 = vadd.f32 %v1531_v7, %v784_v25 }
 0x3bd   : > { %v1310_v27 = vpop.f32.mrf.mxu1 }
 0x3be   : > { %v791_v28 = vsel %vm442_vm2, %v785_v26, -inf }
 0x3bf   : > { %792 = vmax.xlane.f32.xlu1 %v791_v28  ;;  %v1031_v28 = vld [vmem:[%s1651_s3 + $0xc] sm:$0xf] }
 0x3d0   : > { %911 = vrot.lane.b32.xlu1 %v1506_v1, %s1438_s19 }
 0x3d4   : > { %909 = vrot.lane.b32.xlu1 %v1514_v3, %s1438_s19  ;;  %v367_v3 = vld [vmem:[%s349_s27] sm:$0xff] }
 0x3d5   : > { %v376_v40 = vadd.f32 %v1223_v39, %v367_v3 }
 0x3d7   : > { %v563_v42 = vadd.f32 %v556_v12, %v376_v40 }
 0x444   : > { %v790_v29 = vpop.xlane.xlu0 %789 }
 0x445   : > { %v794_v30 = vsub.f32 %v782_v22, %v790_v29  ;;  %v1036_v29 = vsel %vm518_vm3, %v1031_v28, 0 }
 0x447   : > { %v796_v31 = vmul.f32 1.442695, %v794_v30 }
 0x448   : > { %v793_v32 = vpop.xlane.xlu1 %792 }
 0x449   : > { %1392 = vpow2.f32 %v796_v31  ;;  %v795_v33 = vsub.f32 %v785_v26, %v793_v32 }
 0x44b   : > { %v798_v34 = vmul.f32 1.442695, %v795_v33 }
 0x44c   : > { %v912_v56 = vpop.permute.xlu1 %911 }
 0x44d   : > { %1394 = vpow2.f32 %v798_v34  ;;  %v917_v59 = vsel %vm394_vm1, %v912_v56, 0 }
 0x450   : > { %v910_v61 = vpop.permute.xlu1 %909 }
 0x456   : > { %v1393_v35 = vpop.eup %1392 }
 0x457   : > { %v800_v36 = vsel %vm442_vm2, %v1393_v35, 0.0 }
 0x458   : > { %801 = vadd.xlane.f32.xlu0 %v800_v36 }
 0x45a   : > { %v1395_v37 = vpop.eup %1394 }
 0x45b   : > { %v803_v38 = vsel %vm442_vm2, %v1395_v37, 0.0 }
 0x45c   : > { %804 = vadd.xlane.f32.xlu0 %v803_v38 }
 0x472   : > { %811 = vrot.lane.b32.xlu0 %v1506_v1, %s1439_s30 }
 0x476   : > { %v728_v44 = vpop.f32.mrf.mxu0 }
 0x477   : > { %v1598_v45 = vadd.f32 %v728_v44, %v563_v42 }
 0x478   : > { %v1303_v46 = vpop.f32.mrf.mxu0 }
 0x47a   : > { %v731_v48 = vpop.f32.mrf.mxu0 }
 0x47b   : > { %v1600_v49 = vadd.f32 %v731_v48, %v564_v47 }
 0x47c   : > { %v1304_v50 = vpop.f32.mrf.mxu0 }
 0x4e1   : > { %v802_v51 = vpop.xlane.xlu0 %801 }
 0x4e2   : > { %1396 = vrcp.f32 %v802_v51 }
 0x4e5   : > { %v805_v52 = vpop.xlane.xlu0 %804 }
 0x4e6   : > { %1398 = vrcp.f32 %v805_v52 }
 0x4e9   : > { %v812_v53 = vpop.permute.xlu0 %811 }
 0x4ea   : > { %1312 = vmatpush3.bf16.msra.mxu0 %v812_v53 }
 0x4eb   : > { %1323 = vmatprep.subr.bf16.mxu0 %v1432_v0 }
 0x4ef   : > { %v1397_v54 = vpop.eup %1396 }
 0x4f0   : > { %v808_v57 = vmul.f32 %v1397_v54, %v1393_v35 }
 0x4f3   : > { %v1399_v55 = vpop.eup %1398 }
 0x4f4   : > { %v809_v58 = vmul.f32 %v1399_v55, %v1395_v37 }
 0x4f6   : > { %v810_v60 = vpack.c.bf16 %v809_v58, %v808_v57 }
 0x4f8   : > { %1314 = vmatmul.mubr.msk.bf16.vlgmr.msra.gmra.mxu0 %vm442_vm2, %v810_v60 }
 0x4f9   : > { %1324 = vmatpush3.bf16.xpose.msra.mxu0 %v917_v59  ;;  %1325 = vmatprep.mubr.msk.bf16.mxu0 %vm1433_vm0, %v1432_v0 }
 0x4fa   : > { %1335 = vmatprep.subr.bf16.mxu0 %v1432_v0 }
 0x500   : > { %1326 = vmatmul.mubr.msk.bf16.vlgmr.msra.gmra.mxu0 %vm394_vm1, %v910_v61 }
 0x501   : > { %1337 = vmatprep.mubr.msk.bf16.mxu0 %vm1433_vm0, %v1432_v0  ;;  %1336 = vmatpush3.bf16.msra.mxu0 %v1036_v29 }
 0x5b8   : > { %v851_v2 = vpop.f32.mrf.mxu0 }
 0x5ba   : > { %v1315_v4 = vpop.f32.mrf.mxu0 }
 0x5bc   : > { %v854_v5 = vpop.f32.mrf.mxu0 }
 0x5bd   : > { %v858_v6 = vpack.c.bf16 %v854_v5, %v851_v2 }
 0x5be   : > { %v1316_v8 = vpop.f32.mrf.mxu0 }
 0x5bf   : > { %1320 = vmatmul.mubr.msk.bf16.vlgmr.msra.gmra.mxu1 %vm394_vm1, %v858_v6 }
 0x5c0   : > { %v953_v9 = vpop.f32.mrf.mxu0  ;;  %1331 = vmatprep.mubr.msk.bf16.mxu1 %vm1433_vm0, %v1432_v0 }
 0x5c1   : > { %v954_v10 = vadd.f32 %v1531_v7, %v953_v9 }
 0x5c2   : > { %v1327_v11 = vpop.f32.mrf.mxu0 }
 0x5c3   : > { %v960_v12 = vsel %vm442_vm2, %v954_v10, -inf }
 0x5c4   : > { %961 = vmax.xlane.f32.xlu0 %v960_v12  ;;  %v956_v13 = vpop.f32.mrf.mxu0 }
 0x5c5   : > { %v957_v14 = vadd.f32 %v1531_v7, %v956_v13 }
 0x5c6   : > { %v1328_v15 = vpop.f32.mrf.mxu0 }
 0x5c7   : > { %v963_v16 = vsel %vm442_vm2, %v957_v14, -inf }
 0x5c8   : > { %964 = vmax.xlane.f32.xlu1 %v963_v16 }
 0x5d9   : > { %983 = vrot.lane.b32.xlu1 %v1506_v1, %s1440_s9 }
 0x64d   : > { %v962_v17 = vpop.xlane.xlu0 %961 }
 0x64e   : > { %v966_v18 = vsub.f32 %v954_v10, %v962_v17 }
 0x650   : > { %v968_v19 = vmul.f32 1.442695, %v966_v18 }
 0x651   : > { %v965_v0 = vpop.xlane.xlu1 %964 }
 0x652   : > { %1400 = vpow2.f32 %v968_v19  ;;  %v967_v20 = vsub.f32 %v957_v14, %v965_v0 }
 0x654   : > { %v970_v21 = vmul.f32 1.442695, %v967_v20 }
 0x655   : > { %v984_v25 = vpop.permute.xlu1 %983 }
 0x656   : > { %1402 = vpow2.f32 %v970_v21  ;;  %1330 = vmatpush3.bf16.msra.mxu1 %v984_v25 }
 0x65f   : > { %v1401_v22 = vpop.eup %1400 }
 0x660   : > { %v972_v23 = vsel %vm442_vm2, %v1401_v22, 0.0 }
 0x661   : > { %973 = vadd.xlane.f32.xlu0 %v972_v23 }
 0x663   : > { %v1403_v7 = vpop.eup %1402 }
 0x664   : > { %v975_v24 = vsel %vm442_vm2, %v1403_v7, 0.0 }
 0x665   : > { %976 = vadd.xlane.f32.xlu0 %v975_v24 }
 0x67f   : > { %v900_v26 = vpop.f32.mrf.mxu1 }
 0x680   : > { %v907_v1 = vadd.f32 %v900_v26, %v1598_v45 }
 0x681   : > { %v1321_v27 = vpop.f32.mrf.mxu1 }
 0x683   : > { %v903_v30 = vpop.f32.mrf.mxu1 }
 0x684   : > { %v908_v31 = vadd.f32 %v903_v30, %v1600_v49 }
 0x685   : > { %v1322_v32 = vpop.f32.mrf.mxu1 }
 0x6ea   : > { %v974_v33 = vpop.xlane.xlu0 %973 }
 0x6eb   : > { %1404 = vrcp.f32 %v974_v33 }
 0x6ee   : > { %v977_v34 = vpop.xlane.xlu0 %976 }
 0x6ef   : > { %1406 = vrcp.f32 %v977_v34 }
 0x6f8   : > { %v1405_v35 = vpop.eup %1404 }
 0x6f9   : > { %v980_v38 = vmul.f32 %v1405_v35, %v1401_v22 }
 0x6fc   : > { %v1407_v36 = vpop.eup %1406 }
 0x6fd   : > { %v981_v37 = vmul.f32 %v1407_v36, %v1403_v7 }
 0x6ff   : > { %v982_v3 = vpack.c.bf16 %v981_v37, %v980_v38 }
 0x701   : > { %1332 = vmatmul.mubr.msk.bf16.vlgmr.msra.gmra.mxu1 %vm442_vm2, %v982_v3 }
 0x7c1   : > { %v1023_v39 = vpop.f32.mrf.mxu1 }
 0x7c3   : > { %v1333_v40 = vpop.f32.mrf.mxu1 }
 0x7c5   : > { %v1026_v41 = vpop.f32.mrf.mxu1 }
 0x7c6   : > { %v1030_v42 = vpack.c.bf16 %v1026_v41, %v1023_v39 }
 0x7c7   : > { %v1334_v43 = vpop.f32.mrf.mxu1 }
 0x7c8   : > { %1338 = vmatmul.mubr.msk.bf16.vlgmr.msra.gmra.mxu0 %vm394_vm1, %v1030_v42 }
 0x888   : > { %v1072_v44 = vpop.f32.mrf.mxu0 }
 0x889   : > { %v1079_v45 = vadd.f32 %v1072_v44, %v907_v1 }
 0x88a   : > { %v1339_v46 = vpop.f32.mrf.mxu0 }
 0x88b   : > { %1082 = vst.msk [vmem:[%s359_s14] sm:$0xff] %vm1081_vm4, %v1079_v45 }
 0x88c   : > { %v1075_v47 = vpop.f32.mrf.mxu0 }
 0x88d   : > { %v1080_v48 = vadd.f32 %v1075_v47, %v908_v31 }
 0x88e   : > { %v1340_v49 = vpop.f32.mrf.mxu0 }
 0x88f   : > { %1083 = vst.msk [vmem:[%s359_s14 + $0x8] sm:$0xff] %vm1081_vm4, %v1080_v48 }
 0x890 PF: > { %s16_s23 = sadd.s32 1, %s1430_s23   ;;  %s1655_s21 = smov %s1426_s22 }
 0x891   : > { %p13_p5 = scmp.ge.s32.totalorder %s16_s23, 4   ;;  %s1656_s22 = smov %s1658_s24 }
 0x893   :  { %15 = sbr.rel (!%p13_p5) target bundleno = 2 (0x2), region = 83 }

// kernel: transformer_forward.31
= control target key start
LH: loop header
LB: loop body
LE: loop exit
PB: predicated region body
PF: predicated region fallthrough
CT: control target
= control target key end

     0   :  { %vm44_vm0 = vcmask 261120   ;;  %vm116_vm1 = vcmask 519168   ;;  %s205_s1 = inlined_call_operand.vmem [shape: bf16[32,64], index: 1, kind: input, shape index: {}]   ;;  %s206_s0 = inlined_call_operand.vmem [shape: f32[32,32], index: 0, kind: input, shape index: {}]   ;;  %s207_s2 = inlined_call_operand.vmem [shape: f32[1,64], index: 2, kind: input, shape index: {}]   ;;  %s208_s3 = inlined_call_operand.vmem [shape: bf16[32,64], index: 3, kind: output, shape index: {}]  }
   0x1   :  { %v150_v0 = vld [vmem:[%s205_s1 + $0x8] sm:$0xff]   ;;  %v151_v1 = vld [vmem:[%s205_s1] sm:$0xff]   ;;  %v17_v5 = vld [vmem:[%s206_s0 + $0x10] sm:$0xff] }
   0x2   :  { %142 = vmatprep.subr.bf16.mxu0 %v150_v0  ;;  %v15_v2 = vld [vmem:[%s206_s0] sm:$0xff]  ;;  %v16_v3 = vld [vmem:[%s206_s0 + $0x8] sm:$0xff]  ;;  %v18_v6 = vld [vmem:[%s206_s0 + $0x18] sm:$0xff] }
   0x3   :  { %143 = vmatpush3.bf16.msra.mxu0 %v150_v0  ;;  %v19_v4 = vpack.c.bf16 %v16_v3, %v15_v2  ;;  %v20_v7 = vpack.c.bf16 %v18_v6, %v17_v5  ;;  %v125_v8 = vld [vmem:[%s207_s2] ss:$0 sm:$0xff] }
   0x4   :  { %144 = vmatprep.subr.bf16.mxu0 %v151_v1 }
   0x5   :  { %146 = vmatprep.mubr.msk.bf16.mxu0 %vm44_vm0, %v19_v4 }
   0x7   :  { %145 = vmatpush3.bf16.msra.mxu0 %v151_v1 }
   0xa   :  { %147 = vmatmul.mubr.msk.bf16.vlgmr.msra.gmra.mxu0 %vm44_vm0, %v20_v7 }
  0xca   :  { %v148_v9 = vpop.f32.mrf.mxu0 }
  0xcb   :  { %v94_v10 = vadd.f32 %v148_v9, %v125_v8 }
  0xcc   :  { %v85_v11 = vpop.f32.mrf.mxu0 }
  0xcd   :  { %v136_v12 = vpack.c.bf16 %v94_v10, %v94_v10  ;;  %v86_v13 = vadd.f32 %v125_v8, %v85_v11 }
  0xce   :  { %v149_v14 = vpop.f32.mrf.mxu0 }
  0xcf   :  { %119 = vst.msk [vmem:[%s208_s3 + $0x8] sm:$0xf] %vm116_vm1, %v136_v12  ;;  %v134_v15 = vpack.c.bf16 %v86_v13, %v86_v13  ;;  %v97_v16 = vadd.f32 %v149_v14, %v125_v8 }
  0xd0   :  { %v88_v17 = vpop.f32.mrf.mxu0 }
  0xd1   :  { %117 = vst.msk [vmem:[%s208_s3] sm:$0xf] %vm116_vm1, %v134_v15  ;;  %v137_v18 = vpack.c.bf16 %v97_v16, %v97_v16  ;;  %v89_v19 = vadd.f32 %v125_v8, %v88_v17 }
  0xd3   :  { %120 = vst.msk [vmem:[%s208_s3 + $0xc] sm:$0xf] %vm116_vm1, %v137_v18  ;;  %v135_v20 = vpack.c.bf16 %v89_v19, %v89_v19 }
  0xd5   :  { %118 = vst.msk [vmem:[%s208_s3 + $0x4] sm:$0xf] %vm116_vm1, %v135_v20 }

// kernel: transformer_forward.28
= control target key start
LH: loop header
LB: loop body
LE: loop exit
PB: predicated region body
PF: predicated region fallthrough
CT: control target
= control target key end

     0   :  { %vm31_vm0 = vcmask 261120   ;;  %v289_v14 = vmov 0.0   ;;  %vm290_vm1 = vmmov 0   ;;  %vm153_vm2 = vcmask 257024   ;;  %s388_s0 = inlined_call_operand.vmem [shape: f32[16,32], index: 0, kind: input, shape index: {}]   ;;  %s389_s3 = inlined_call_operand.vmem [shape: bf16[32,32], index: 3, kind: input, shape index: {}]   ;;  %s390_s5 = inlined_call_operand.vmem [shape: bf16[32,64], index: 5, kind: input, shape index: {}]   ;;  %s391_s1 = inlined_call_operand.vmem [shape: f32[1,32], index: 1, kind: input, shape index: {}]   ;;  %s392_s2 = inlined_call_operand.vmem [shape: f32[1,32], index: 2, kind: input, shape index: {}]   ;;  %s393_s4 = inlined_call_operand.vmem [shape: f32[1,32], index: 4, kind: input, shape index: {}]   ;;  %s394_s6 = inlined_call_operand.vmem [shape: f32[1,64], index: 6, kind: input, shape index: {}]   ;;  %s395_s7 = inlined_call_operand.vmem [shape: bf16[16,32], index: 7, kind: output, shape index: {0}]   ;;  %s396_s8 = inlined_call_operand.vmem [shape: bf16[16,64], index: 8, kind: output, shape index: {1}]  }
   0x1   :  { %v29_v0 = vld [vmem:[%s388_s0] sm:$0xff]  ;;  %v30_v1 = vld [vmem:[%s388_s0 + $0x8] sm:$0xff]  ;;  %263 = vmatprep.subr.bf16.mxu0 %v289_v14  ;;  %271 = vmatprep.subr.bf16.mxu1 %v289_v14  ;;  %vm228_vm3 = vcmask 519168  }
   0x2   :  { %v32_v2 = vsel %vm31_vm0, %v29_v0, 0.0  ;;  %v35_v3 = vsel %vm31_vm0, %v30_v1, 0.0  ;;  %v281_v15 = vld [vmem:[%s389_s3 + $0x8] sm:$0xff]   ;;  %267 = vmatprep.mubr.msk.bf16.mxu0 %vm290_vm1, %v289_v14  ;;  %275 = vmatprep.mubr.msk.bf16.mxu1 %vm290_vm1, %v289_v14  ;;  %v283_v17 = vld [vmem:[%s389_s3] sm:$0xff]  }
   0x3   :  { %33 = vadd.xlane.f32.xlu0 %v32_v2  ;;  %v282_v16 = vld [vmem:[%s390_s5 + $0x8] sm:$0xff]   ;;  %264 = vmatpush3.bf16.msra.mxu0 %v281_v15  ;;  %v284_v18 = vld [vmem:[%s390_s5] sm:$0xff]  }
   0x4   :  { %272 = vmatpush3.bf16.msra.mxu1 %v282_v16  ;;  %265 = vmatprep.subr.bf16.mxu0 %v289_v14  ;;  %v239_v27 = vld [vmem:[%s391_s1] ss:$0 sm:$0xff] }
   0x5   :  { %273 = vmatprep.subr.bf16.mxu1 %v289_v14  ;;  %v240_v31 = vld [vmem:[%s392_s2] ss:$0 sm:$0xff] }
   0x6   :  { %v241_v36 = vld [vmem:[%s393_s4] ss:$0 sm:$0xff] }
   0x7   :  { %36 = vadd.xlane.f32.xlu0 %v35_v3  ;;  %266 = vmatpush3.bf16.msra.mxu0 %v283_v17  ;;  %v247_v37 = vld [vmem:[%s394_s6] ss:$0 sm:$0xff] }
   0x8   :  { %274 = vmatpush3.bf16.msra.mxu1 %v284_v18 }
  0x8c   :  { %v34_v4 = vpop.xlane.xlu0 %33 }
  0x8d   :  { %v39_v5 = vmul.f32 0.03125, %v34_v4 }
  0x8f   :  { %v41_v6 = vsub.f32 %v29_v0, %v39_v5 }
  0x90   :  { %v37_v7 = vpop.xlane.xlu0 %36 }
  0x91   :  { %v40_v8 = vmul.f32 0.03125, %v37_v7  ;;  %v43_v9 = vmul.f32 %v41_v6, %v41_v6 }
  0x93   :  { %v42_v10 = vsub.f32 %v30_v1, %v40_v8  ;;  %v45_v11 = vsel %vm31_vm0, %v43_v9, 0.0 }
  0x94   :  { %46 = vadd.xlane.f32.xlu1 %v45_v11 }
  0x95   :  { %v44_v12 = vmul.f32 %v42_v10, %v42_v10 }
  0x97   :  { %v48_v13 = vsel %vm31_vm0, %v44_v12, 0.0 }
  0x98   :  { %49 = vadd.xlane.f32.xlu1 %v48_v13 }
 0x11d   :  { %v47_v19 = vpop.xlane.xlu1 %46 }
 0x11e   :  { %v51_v20 = vmul.f32 0.03125, %v47_v19 }
 0x120   :  { %v53_v21 = vadd.f32 1e-05, %v51_v20 }
 0x121   :  { %v50_v22 = vpop.xlane.xlu1 %49 }
 0x122   :  { %285 = vrsqrt.f32 %v53_v21  ;;  %v52_v23 = vmul.f32 0.03125, %v50_v22 }
 0x124   :  { %v54_v24 = vadd.f32 1e-05, %v52_v23 }
 0x126   :  { %287 = vrsqrt.f32 %v54_v24 }
 0x12f   :  { %v286_v25 = vpop.eup %285 }
 0x130   :  { %v57_v26 = vmul.f32 %v286_v25, %v41_v6 }
 0x132   :  { %v66_v30 = vmul.f32 %v239_v27, %v57_v26 }
 0x133   :  { %v288_v28 = vpop.eup %287 }
 0x134   :  { %v58_v29 = vmul.f32 %v288_v28, %v42_v10  ;;  %v75_v33 = vadd.f32 %v240_v31, %v66_v30 }
 0x136   :  { %v67_v32 = vmul.f32 %v239_v27, %v58_v29 }
 0x138   :  { %v76_v34 = vadd.f32 %v240_v31, %v67_v32 }
 0x13a   :  { %v77_v35 = vpack.c.bf16 %v76_v34, %v75_v33 }
 0x13c   :  { %268 = vmatmul.mubr.msk.bf16.vlgmr.msra.gmra.mxu0 %vm31_vm0, %v77_v35  ;;  %276 = vmatmul.mubr.msk.bf16.vlgmr.msra.gmra.mxu1 %vm31_vm0, %v77_v35 }
 0x1fc   :  { %v138_v38 = vpop.f32.mrf.mxu0  ;;  %v213_v39 = vpop.f32.mrf.mxu1 }
 0x1fd   :  { %v139_v40 = vadd.f32 %v241_v36, %v138_v38  ;;  %v214_v41 = vadd.f32 %v247_v37, %v213_v39 }
 0x1fe   :  { %v269_v42 = vpop.f32.mrf.mxu0  ;;  %v277_v43 = vpop.f32.mrf.mxu1 }
 0x1ff   :  { %v253_v44 = vpack.c.bf16 %v139_v40, %v139_v40  ;;  %v255_v45 = vpack.c.bf16 %v214_v41, %v214_v41 }
 0x200   :  { %v141_v46 = vpop.f32.mrf.mxu0  ;;  %v216_v47 = vpop.f32.mrf.mxu1 }
 0x201   :  { %154 = vst.msk [vmem:[%s395_s7] sm:$0xf] %vm153_vm2, %v253_v44  ;;  %v142_v48 = vadd.f32 %v241_v36, %v141_v46  ;;  %v217_v49 = vadd.f32 %v247_v37, %v216_v47 }
 0x202   :  { %229 = vst.msk [vmem:[%s396_s8] sm:$0xf] %vm228_vm3, %v255_v45  ;;  %v270_v50 = vpop.f32.mrf.mxu0  ;;  %v278_v51 = vpop.f32.mrf.mxu1 }
 0x203   :  { %v254_v52 = vpack.c.bf16 %v142_v48, %v142_v48  ;;  %v256_v53 = vpack.c.bf16 %v217_v49, %v217_v49 }
 0x205   :  { %155 = vst.msk [vmem:[%s395_s7 + $0x4] sm:$0xf] %vm153_vm2, %v254_v52 }
 0x206   :  { %230 = vst.msk [vmem:[%s396_s8 + $0x4] sm:$0xf] %vm228_vm3, %v256_v53 }

// kernel: transformer_forward.30
= control target key start
LH: loop header
LB: loop body
LE: loop exit
PB: predicated region body
PF: predicated region fallthrough
CT: control target
= control target key end

     0   :  { %vm23_vm0 = vcmask 261120   ;;  %v181_v14 = vmov 0.0   ;;  %vm182_vm1 = vmmov 0   ;;  %vm145_vm2 = vcmask 257024   ;;  %s245_s0 = inlined_call_operand.vmem [shape: f32[16,32], index: 0, kind: input, shape index: {}]   ;;  %s246_s3 = inlined_call_operand.vmem [shape: bf16[32,32], index: 3, kind: input, shape index: {}]   ;;  %s247_s1 = inlined_call_operand.vmem [shape: f32[1,32], index: 1, kind: input, shape index: {}]   ;;  %s248_s2 = inlined_call_operand.vmem [shape: f32[1,32], index: 2, kind: input, shape index: {}]   ;;  %s249_s4 = inlined_call_operand.vmem [shape: f32[1,32], index: 4, kind: input, shape index: {}]   ;;  %s250_s5 = inlined_call_operand.vmem [shape: bf16[16,32], index: 5, kind: output, shape index: {}]  }
   0x1   :  { %v21_v0 = vld [vmem:[%s245_s0] sm:$0xff]  ;;  %v22_v1 = vld [vmem:[%s245_s0 + $0x8] sm:$0xff]  ;;  %165 = vmatprep.subr.bf16.mxu0 %v181_v14  ;;  %169 = vmatprep.mubr.msk.bf16.mxu0 %vm182_vm1, %v181_v14 }
   0x2   :  { %v24_v2 = vsel %vm23_vm0, %v21_v0, 0.0  ;;  %v27_v3 = vsel %vm23_vm0, %v22_v1, 0.0  ;;  %v175_v15 = vld [vmem:[%s246_s3 + $0x8] sm:$0xff]   ;;  %v176_v16 = vld [vmem:[%s246_s3] sm:$0xff]  }
   0x3   :  { %25 = vadd.xlane.f32.xlu0 %v24_v2  ;;  %166 = vmatpush3.bf16.msra.mxu0 %v175_v15  ;;  %v152_v25 = vld [vmem:[%s247_s1] ss:$0 sm:$0xff] }
   0x4   :  { %167 = vmatprep.subr.bf16.mxu0 %v181_v14  ;;  %v153_v29 = vld [vmem:[%s248_s2] ss:$0 sm:$0xff] }
   0x5   :  { %v154_v34 = vld [vmem:[%s249_s4] ss:$0 sm:$0xff] }
   0x7   :  { %28 = vadd.xlane.f32.xlu0 %v27_v3  ;;  %168 = vmatpush3.bf16.msra.mxu0 %v176_v16 }
  0x8c   :  { %v26_v4 = vpop.xlane.xlu0 %25 }
  0x8d   :  { %v31_v5 = vmul.f32 0.03125, %v26_v4 }
  0x8f   :  { %v33_v6 = vsub.f32 %v21_v0, %v31_v5 }
  0x90   :  { %v29_v7 = vpop.xlane.xlu0 %28 }
  0x91   :  { %v32_v8 = vmul.f32 0.03125, %v29_v7  ;;  %v35_v9 = vmul.f32 %v33_v6, %v33_v6 }
  0x93   :  { %v34_v10 = vsub.f32 %v22_v1, %v32_v8  ;;  %v37_v11 = vsel %vm23_vm0, %v35_v9, 0.0 }
  0x94   :  { %38 = vadd.xlane.f32.xlu1 %v37_v11 }
  0x95   :  { %v36_v12 = vmul.f32 %v34_v10, %v34_v10 }
  0x97   :  { %v40_v13 = vsel %vm23_vm0, %v36_v12, 0.0 }
  0x98   :  { %41 = vadd.xlane.f32.xlu1 %v40_v13 }
 0x11d   :  { %v39_v17 = vpop.xlane.xlu1 %38 }
 0x11e   :  { %v43_v18 = vmul.f32 0.03125, %v39_v17 }
 0x120   :  { %v45_v19 = vadd.f32 1e-05, %v43_v18 }
 0x121   :  { %v42_v20 = vpop.xlane.xlu1 %41 }
 0x122   :  { %177 = vrsqrt.f32 %v45_v19  ;;  %v44_v21 = vmul.f32 0.03125, %v42_v20 }
 0x124   :  { %v46_v22 = vadd.f32 1e-05, %v44_v21 }
 0x126   :  { %179 = vrsqrt.f32 %v46_v22 }
 0x12f   :  { %v178_v23 = vpop.eup %177 }
 0x130   :  { %v49_v24 = vmul.f32 %v178_v23, %v33_v6 }
 0x132   :  { %v58_v28 = vmul.f32 %v152_v25, %v49_v24 }
 0x133   :  { %v180_v26 = vpop.eup %179 }
 0x134   :  { %v50_v27 = vmul.f32 %v180_v26, %v34_v10  ;;  %v67_v31 = vadd.f32 %v153_v29, %v58_v28 }
 0x136   :  { %v59_v30 = vmul.f32 %v152_v25, %v50_v27 }
 0x138   :  { %v68_v32 = vadd.f32 %v153_v29, %v59_v30 }
 0x13a   :  { %v69_v33 = vpack.c.bf16 %v68_v32, %v67_v31 }
 0x13c   :  { %170 = vmatmul.mubr.msk.bf16.vlgmr.msra.gmra.mxu0 %vm23_vm0, %v69_v33 }
 0x1fc   :  { %v130_v35 = vpop.f32.mrf.mxu0 }
 0x1fd   :  { %v131_v36 = vadd.f32 %v154_v34, %v130_v35 }
 0x1fe   :  { %v171_v37 = vpop.f32.mrf.mxu0 }
 0x1ff   :  { %v160_v38 = vpack.c.bf16 %v131_v36, %v131_v36 }
 0x200   :  { %v133_v39 = vpop.f32.mrf.mxu0 }
 0x201   :  { %146 = vst.msk [vmem:[%s250_s5] sm:$0xf] %vm145_vm2, %v160_v38  ;;  %v134_v40 = vadd.f32 %v154_v34, %v133_v39 }
 0x202   :  { %v172_v41 = vpop.f32.mrf.mxu0 }
 0x203   :  { %v161_v42 = vpack.c.bf16 %v134_v40, %v134_v40 }
 0x205   :  { %147 = vst.msk [vmem:[%s250_s5 + $0x4] sm:$0xf] %vm145_vm2, %v161_v42 }

// kernel: transformer_forward.29
= control target key start
LH: loop header
LB: loop body
LE: loop exit
PB: predicated region body
PF: predicated region fallthrough
CT: control target
= control target key end

     0   :  { %s1360_s21 = smov 0   ;;  %s1362_s22 = smov 0   ;;  %s1515_s0 = inlined_call_operand.vmem [shape: bf16[2,8,32], index: 0, kind: input, shape index: {}]   ;;  %s1516_s1 = inlined_call_operand.vmem [shape: bf16[2,8,64], index: 1, kind: input, shape index: {}]   ;;  %s1517_s2 = inlined_call_operand.vmem [shape: f32[2,1,8], index: 2, kind: input, shape index: {}]   ;;  %s1518_s3 = inlined_call_operand.vmem [shape: bf16[32,32], index: 3, kind: input, shape index: {}]   ;;  %s1519_s4 = inlined_call_operand.vmem [shape: f32[1,32], index: 4, kind: input, shape index: {}]   ;;  %s1520_s5 = inlined_call_operand.vmem [shape: f32[2,8,32], index: 5, kind: input, shape index: {}]   ;;  %s1521_s6 = inlined_call_operand.vmem [shape: f32[2,8,32], index: 6, kind: output, shape index: {}]  }
   0x1   :  { %s1364_s23 = smov 0  }
   0x2 LB: > { %s28_s24 = sadd.s32 1, %s1310_s22  ;;  %p1122_p0 = scmp.ge.s32.totalorder %s1314_s23, 1  ;;  %s1314_s23 = sphi %s1364_s23, %s16_s23   ;;  %s1310_s22 = sphi %s1362_s22, %s1523_s22   ;;  %s1306_s21 = sphi %s1360_s21, %s1522_s21  }
   0x3   : > { %p30_p1 = scmp.ge.s32.totalorder %s28_s24, 2  ;;  %p261_p2 = scmp.lt.s32.totalorder %s1314_s23, 3 }
   0x5   : > { %s1525_s24 = smov (%p30_p1, %s28_s24), 0  ;;  %p262_p3 = pnand %p1122_p0, %p261_p2 }
   0x6   : > { %p309_p4 = scmp.lt.s32.totalorder (!%p262_p3), %s1306_s21, 1  ;;  %s1318_s8 = smov (!%p262_p3), 120  }
   0x7   : > { %265 = sbr.rel (%p262_p3) target bundleno = 2164 (0x874), region = 44  ;;  %s1319_s12 = smov (!%p262_p3), 96  }
   0x8   : > { %s1320_s13 = smov (!%p262_p3), 88   ;;  %s1321_s14 = smov (!%p262_p3), 112  }
   0x9   : > { %s1322_s19 = smov (!%p262_p3), 80   ;;  %s1323_s30 = smov (!%p262_p3), 104  }
   0xa   : > { %s1324_s9 = smov (!%p262_p3), 72  }
   0xc   : > { %v1316_v0 = vmov 0.0   ;;  %vm1317_vm0 = vmmov 0   ;;  %s1527_s21 = smov (!%p309_p4, %s1306_s21), 1  ;;  %vm366_vm1 = vcmask 64512   ;;  %v342_v9 = vlaneseq  ;;  %v478_v43 = vld [vmem:[%s1518_s3] sm:$0xf] }
   0xd   : > { %1169 = vmatprep.subr.bf16.mxu0 %v1316_v0  ;;  %1171 = vmatprep.mubr.msk.bf16.mxu0 %vm1317_vm0, %v1316_v0  ;;  %s1123_s25 = sshll.u32 %s1527_s21, 2  ;;  %s322_s11 = scalar_lea.vmem %s1517_s2, %s1527_s21  ;;  %vm433_vm3 = vcmask 1043456   ;;  %v640_v59 = vld [vmem:[%s1518_s3 + $0x4] sm:$0xf]  ;;  %vm1006_vm4 = vcmask 261120  }
   0xe   : > { %1175 = vmatprep.subr.bf16.mxu1 %v1316_v0  ;;  %1177 = vmatprep.mubr.msk.bf16.mxu1 %vm1317_vm0, %v1316_v0  ;;  %s319_s28 = scalar_lea.vmem %s1516_s1, %s1123_s25  ;;  %s315_s7 = scalar_lea.vmem %s1515_s0, %s1123_s25  ;;  %v343_v10 = vshrl.u32 %v342_v9, 7  ;;  %v347_v11 = vand.u32 127, %v342_v9  ;;  %v1127_v12 = vld [vmem:[%s322_s11] ss:$0 sm:$0xff]  ;;  %v483_v44 = vsel %vm433_vm3, %v478_v43, 0  ;;  %v645_v60 = vsel %vm433_vm3, %v640_v59, 0 }
   0xf   : > { %v339_v1 = vld [vmem:[%s319_s28] sm:$0xf]  ;;  %s1125_s20 = sshll.u32 %s1527_s21, 3  ;;  %v958_v59 = vld [vmem:[%s1518_s3 + $0xc] sm:$0xf] }
  0x10   : > { %v371_v2 = vsel %vm366_vm1, %v339_v1, 0  ;;  %v1394_v3 = vcombine.low %v339_v1, %v339_v1  ;;  %v338_v4 = vld [vmem:[%s315_s7] sm:$0xf]  ;;  %vm348_vm2 = vcmp.gt.s32.totalorder %v347_v11, %v343_v10  ;;  %s329_s27 = scalar_lea.vmem %s1520_s5, %s1125_s20 }
  0x11   : > { %1170 = vmatpush3.bf16.xpose.msra.mxu0 %v371_v2  ;;  %v1397_v5 = vcombine.low %v338_v4, %v338_v4  ;;  %v349_v13 = vsel %vm348_vm2, -1e+09, %v1316_v0 }
  0x12   : > { %531 = vrot.lane.b32.xlu0 %v1394_v3, %s1318_s8  ;;  %1187 = vmatprep.subr.bf16.mxu0 %v1316_v0  ;;  %v1414_v14 = vadd.f32 %v1127_v12, %v349_v13 }
  0x16   : > { %529 = vrot.lane.b32.xlu0 %v1397_v5, %s1318_s8 }
  0x18   : > { %1172 = vmatmul.mubr.msk.bf16.vlgmr.msra.gmra.mxu0 %vm366_vm1, %v338_v4 }
  0x19   : > { %1189 = vmatprep.mubr.msk.bf16.mxu0 %vm1317_vm0, %v1316_v0 }
  0x1a   : > { %428 = vrot.lane.b32.xlu0 %v1394_v3, %s1319_s12 }
  0x84   : > { %v532_v6 = vpop.permute.xlu0 %531 }
  0x85   : > { %v537_v7 = vsel %vm366_vm1, %v532_v6, 0 }
  0x86   : > { %1188 = vmatpush3.bf16.xpose.msra.mxu0 %v537_v7 }
  0x87   : > { %1199 = vmatprep.subr.bf16.mxu0 %v1316_v0 }
  0x88   : > { %v530_v8 = vpop.permute.xlu0 %529 }
  0x8c   : > { %v429_v32 = vpop.permute.xlu0 %428 }
  0x8d   : > { %1190 = vmatmul.mubr.msk.bf16.vlgmr.msra.gmra.mxu0 %vm366_vm1, %v530_v8  ;;  %v435_v33 = vsel %vm433_vm3, %v429_v32, 0 }
  0x8e   : > { %1201 = vmatprep.mubr.msk.bf16.mxu0 %vm1317_vm0, %v1316_v0  ;;  %1176 = vmatpush3.bf16.msra.mxu1 %v435_v33 }
  0x8f   : > { %1181 = vmatprep.subr.bf16.mxu1 %v1316_v0  ;;  %1200 = vmatpush3.bf16.msra.mxu0 %v645_v60 }
  0x90   : > { %1211 = vmatprep.subr.bf16.mxu0 %v1316_v0 }
  0xd8   : > { %v407_v15 = vpop.f32.mrf.mxu0 }
  0xd9   : > { %v408_v16 = vadd.f32 %v407_v15, %v1414_v14 }
  0xda   : > { %v1173_v17 = vpop.f32.mrf.mxu0 }
  0xdb   : > { %v413_v18 = vsel %vm366_vm1, %v408_v16, -inf }
  0xdc   : > { %414 = vmax.xlane.f32.xlu1 %v413_v18  ;;  %v410_v19 = vpop.f32.mrf.mxu0 }
  0xde   : > { %v1174_v20 = vpop.f32.mrf.mxu0 }
 0x14d   : > { %v573_v21 = vpop.f32.mrf.mxu0 }
 0x14e   : > { %v574_v28 = vadd.f32 %v573_v21, %v1414_v14 }
 0x14f   : > { %v1191_v22 = vpop.f32.mrf.mxu0 }
 0x150   : > { %v579_v31 = vsel %vm366_vm1, %v574_v28, -inf }
 0x151   : > { %v576_v23 = vpop.f32.mrf.mxu0 }
 0x152   : > { %v357_v23 = vld [vmem:[%s329_s27] sm:$0xff] }
 0x153   : > { %v1192_v24 = vpop.f32.mrf.mxu0 }
 0x154   : > { %v1128_v24 = vld [vmem:[%s1519_s4] ss:$0 sm:$0xff] }
 0x165   : > { %v415_v25 = vpop.xlane.xlu1 %414 }
 0x166   : > { %v416_v26 = vsub.f32 %v408_v16, %v415_v25  ;;  %v365_v25 = vadd.f32 %v1128_v24, %v357_v23 }
 0x168   : > { %v417_v27 = vmul.f32 1.442695, %v416_v26 }
 0x16a   : > { %1276 = vpow2.f32 %v417_v27 }
 0x177   : > { %v1277_v29 = vpop.eup %1276 }
 0x178   : > { %v419_v30 = vsel %vm366_vm1, %v1277_v29, 0.0 }
 0x179   : > { %420 = vadd.xlane.f32.xlu1 %v419_v30 }
 0x17d   : > { %580 = vmax.xlane.f32.xlu1 %v579_v31 }
 0x18e   : > { %591 = vrot.lane.b32.xlu1 %v1394_v3, %s1320_s13 }
 0x192   : > { %690 = vrot.lane.b32.xlu1 %v1394_v3, %s1321_s14 }
 0x196   : > { %688 = vrot.lane.b32.xlu1 %v1397_v5, %s1321_s14  ;;  %s336_s14 = scalar_lea.vmem %s1521_s6, %s1125_s20 }
 0x202   : > { %v421_v34 = vpop.xlane.xlu1 %420 }
 0x203   : > { %1278 = vrcp.f32 %v421_v34 }
 0x206   : > { %v581_v35 = vpop.xlane.xlu1 %580 }
 0x207   : > { %v582_v36 = vsub.f32 %v574_v28, %v581_v35 }
 0x209   : > { %v583_v37 = vmul.f32 1.442695, %v582_v36 }
 0x20a   : > { %v592_v46 = vpop.permute.xlu1 %591 }
 0x20b   : > { %1280 = vpow2.f32 %v583_v37  ;;  %v597_v49 = vsel %vm433_vm3, %v592_v46, 0 }
 0x20e   : > { %v691_v55 = vpop.permute.xlu1 %690 }
 0x20f   : > { %v696_v56 = vsel %vm366_vm1, %v691_v55, 0 }
 0x210   : > { %v1279_v38 = vpop.eup %1278 }
 0x211   : > { %v423_v39 = vmul.f32 %v1279_v38, %v1277_v29  ;;  %v799_v38 = vld [vmem:[%s1518_s3 + $0x8] sm:$0xf] }
 0x212   : > { %v689_v58 = vpop.permute.xlu1 %688 }
 0x213   : > { %v424_v40 = vpack.c.bf16 %v423_v39, %v423_v39  ;;  %v804_v39 = vsel %vm433_vm3, %v799_v38, 0 }
 0x215   : > { %1178 = vmatmul.mubr.msk.bf16.vlgmr.msra.gmra.mxu1 %vm366_vm1, %v424_v40 }
 0x216   : > { %1183 = vmatprep.mubr.msk.bf16.mxu1 %vm1317_vm0, %v1316_v0  ;;  %1182 = vmatpush3.bf16.msra.mxu1 %v483_v44 }
 0x217   : > { %1193 = vmatprep.subr.bf16.mxu1 %v1316_v0 }
 0x218   : > { %v1281_v41 = vpop.eup %1280 }
 0x219   : > { %v585_v42 = vsel %vm366_vm1, %v1281_v41, 0.0 }
 0x21a   : > { %586 = vadd.xlane.f32.xlu0 %v585_v42 }
 0x230   : > { %750 = vrot.lane.b32.xlu0 %v1394_v3, %s1322_s19 }
 0x2a3   : > { %v587_v45 = vpop.xlane.xlu0 %586 }
 0x2a4   : > { %1282 = vrcp.f32 %v587_v45 }
 0x2a7   : > { %v751_v16 = vpop.permute.xlu0 %750 }
 0x2a8   : > { %v756_v17 = vsel %vm433_vm3, %v751_v16, 0 }
 0x2b1   : > { %v1283_v50 = vpop.eup %1282 }
 0x2b2   : > { %v589_v53 = vmul.f32 %v1283_v50, %v1281_v41 }
 0x2b4   : > { %v590_v57 = vpack.c.bf16 %v589_v53, %v589_v53 }
 0x2d5   : > { %v471_v47 = vpop.f32.mrf.mxu1 }
 0x2d6   : > { %v477_v48 = vpack.c.bf16 %v471_v47, %v471_v47 }
 0x2d7   : > { %v1179_v51 = vpop.f32.mrf.mxu1 }
 0x2d8   : > { %1184 = vmatmul.mubr.msk.bf16.vlgmr.msra.gmra.mxu1 %vm366_vm1, %v477_v48 }
 0x2d9   : > { %1194 = vmatpush3.bf16.msra.mxu1 %v597_v49  ;;  %v474_v52 = vpop.f32.mrf.mxu1  ;;  %1195 = vmatprep.mubr.msk.bf16.mxu1 %vm1317_vm0, %v1316_v0 }
 0x2da   : > { %1205 = vmatprep.subr.bf16.mxu1 %v1316_v0 }
 0x2db   : > { %v1180_v54 = vpop.f32.mrf.mxu1 }
 0x2e0   : > { %1196 = vmatmul.mubr.msk.bf16.vlgmr.msra.gmra.mxu1 %vm366_vm1, %v590_v57 }
 0x2e1   : > { %1206 = vmatpush3.bf16.xpose.msra.mxu1 %v696_v56  ;;  %1207 = vmatprep.mubr.msk.bf16.mxu1 %vm1317_vm0, %v1316_v0 }
 0x2e2   : > { %1217 = vmatprep.subr.bf16.mxu1 %v1316_v0 }
 0x2e8   : > { %1208 = vmatmul.mubr.msk.bf16.vlgmr.msra.gmra.mxu1 %vm366_vm1, %v689_v58 }
 0x2e9   : > { %1219 = vmatprep.mubr.msk.bf16.mxu1 %vm1317_vm0, %v1316_v0  ;;  %1218 = vmatpush3.bf16.msra.mxu1 %v804_v39 }
 0x2ea   : > { %1229 = vmatprep.subr.bf16.mxu1 %v1316_v0 }
 0x398   : > { %v519_v61 = vpop.f32.mrf.mxu1 }
 0x399   : > { %v525_v26 = vadd.f32 %v519_v61, %v365_v25 }
 0x39a   : > { %v1185_v62 = vpop.f32.mrf.mxu1 }
 0x39c   : > { %v522_v63 = vpop.f32.mrf.mxu1 }
 0x39e   : > { %v1186_v1 = vpop.f32.mrf.mxu1 }
 0x3a0   : > { %v633_v2 = vpop.f32.mrf.mxu1 }
 0x3a1   : > { %v639_v4 = vpack.c.bf16 %v633_v2, %v633_v2 }
 0x3a2   : > { %v1197_v6 = vpop.f32.mrf.mxu1 }
 0x3a3   : > { %1202 = vmatmul.mubr.msk.bf16.vlgmr.msra.gmra.mxu0 %vm366_vm1, %v639_v4 }
 0x3a4   : > { %v636_v7 = vpop.f32.mrf.mxu1  ;;  %1213 = vmatprep.mubr.msk.bf16.mxu0 %vm1317_vm0, %v1316_v0  ;;  %1212 = vmatpush3.bf16.msra.mxu0 %v756_v17 }
 0x3a5   : > { %1223 = vmatprep.subr.bf16.mxu0 %v1316_v0 }
 0x3a6   : > { %v1198_v8 = vpop.f32.mrf.mxu1 }
 0x3a8   : > { %v732_v9 = vpop.f32.mrf.mxu1 }
 0x3a9   : > { %v733_v10 = vadd.f32 %v732_v9, %v1414_v14 }
 0x3aa   : > { %v1209_v11 = vpop.f32.mrf.mxu1 }
 0x3ab   : > { %v738_v12 = vsel %vm366_vm1, %v733_v10, -inf }
 0x3ac   : > { %739 = vmax.xlane.f32.xlu1 %v738_v12  ;;  %v735_v13 = vpop.f32.mrf.mxu1 }
 0x3ae   : > { %v1210_v15 = vpop.f32.mrf.mxu1 }
 0x435   : > { %v740_v18 = vpop.xlane.xlu1 %739 }
 0x436   : > { %v741_v19 = vsub.f32 %v733_v10, %v740_v18 }
 0x438   : > { %v742_v20 = vmul.f32 1.442695, %v741_v19 }
 0x43a   : > { %1284 = vpow2.f32 %v742_v20 }
 0x447   : > { %v1285_v21 = vpop.eup %1284 }
 0x448   : > { %v744_v22 = vsel %vm366_vm1, %v1285_v21, 0.0 }
 0x449   : > { %745 = vadd.xlane.f32.xlu0 %v744_v22 }
 0x45f   : > { %849 = vrot.lane.b32.xlu0 %v1394_v3, %s1323_s30 }
 0x463   : > { %v681_v27 = vpop.f32.mrf.mxu0  ;;  %847 = vrot.lane.b32.xlu0 %v1397_v5, %s1323_s30 }
 0x464   : > { %v687_v28 = vadd.f32 %v681_v27, %v525_v26 }
 0x465   : > { %v1203_v29 = vpop.f32.mrf.mxu0 }
 0x467   : > { %v684_v30 = vpop.f32.mrf.mxu0 }
 0x469   : > { %v1204_v31 = vpop.f32.mrf.mxu0 }
 0x4d2   : > { %v746_v32 = vpop.xlane.xlu0 %745 }
 0x4d3   : > { %1286 = vrcp.f32 %v746_v32 }
 0x4d6   : > { %v850_v34 = vpop.permute.xlu0 %849 }
 0x4d7   : > { %v855_v36 = vsel %vm366_vm1, %v850_v34, 0 }
 0x4da   : > { %v848_v5 = vpop.permute.xlu0 %847 }
 0x4e0   : > { %v1287_v33 = vpop.eup %1286 }
 0x4e1   : > { %v748_v35 = vmul.f32 %v1287_v33, %v1285_v21 }
 0x4e3   : > { %v749_v37 = vpack.c.bf16 %v748_v35, %v748_v35 }
 0x4e5   : > { %1214 = vmatmul.mubr.msk.bf16.vlgmr.msra.gmra.mxu0 %vm366_vm1, %v749_v37 }
 0x4e6   : > { %1224 = vmatpush3.bf16.xpose.msra.mxu0 %v855_v36  ;;  %1225 = vmatprep.mubr.msk.bf16.mxu0 %vm1317_vm0, %v1316_v0 }
 0x4e7   : > { %1235 = vmatprep.subr.bf16.mxu0 %v1316_v0 }
 0x4ed   : > { %1226 = vmatmul.mubr.msk.bf16.vlgmr.msra.gmra.mxu0 %vm366_vm1, %v848_v5 }
 0x4ee   : > { %1237 = vmatprep.mubr.msk.bf16.mxu0 %vm1317_vm0, %v1316_v0 }
 0x5a5   : > { %v792_v40 = vpop.f32.mrf.mxu0 }
 0x5a6   : > { %v798_v41 = vpack.c.bf16 %v792_v40, %v792_v40 }
 0x5a7   : > { %v1215_v42 = vpop.f32.mrf.mxu0 }
 0x5a8   : > { %1220 = vmatmul.mubr.msk.bf16.vlgmr.msra.gmra.mxu1 %vm366_vm1, %v798_v41 }
 0x5a9   : > { %v795_v43 = vpop.f32.mrf.mxu0  ;;  %1231 = vmatprep.mubr.msk.bf16.mxu1 %vm1317_vm0, %v1316_v0 }
 0x5ab   : > { %v1216_v44 = vpop.f32.mrf.mxu0 }
 0x5ad   : > { %v891_v45 = vpop.f32.mrf.mxu0 }
 0x5ae   : > { %v892_v46 = vadd.f32 %v891_v45, %v1414_v14 }
 0x5af   : > { %v1227_v47 = vpop.f32.mrf.mxu0 }
 0x5b0   : > { %v897_v48 = vsel %vm366_vm1, %v892_v46, -inf }
 0x5b1   : > { %898 = vmax.xlane.f32.xlu1 %v897_v48  ;;  %v894_v49 = vpop.f32.mrf.mxu0 }
 0x5b3   : > { %v1228_v50 = vpop.f32.mrf.mxu0 }
 0x5c2   : > { %909 = vrot.lane.b32.xlu1 %v1394_v3, %s1324_s9  ;;  %v963_v3 = vsel %vm433_vm3, %v958_v59, 0 }
 0x5c3   : > { %1236 = vmatpush3.bf16.msra.mxu0 %v963_v3 }
 0x63a   : > { %v899_v51 = vpop.xlane.xlu1 %898 }
 0x63b   : > { %v900_v52 = vsub.f32 %v892_v46, %v899_v51 }
 0x63d   : > { %v901_v53 = vmul.f32 1.442695, %v900_v52 }
 0x63e   : > { %v910_v55 = vpop.permute.xlu1 %909 }
 0x63f   : > { %1288 = vpow2.f32 %v901_v53  ;;  %v915_v14 = vsel %vm433_vm3, %v910_v55, 0 }
 0x640   : > { %1230 = vmatpush3.bf16.msra.mxu1 %v915_v14 }
 0x64c   : > { %v1289_v54 = vpop.eup %1288 }
 0x64d   : > { %v903_v0 = vsel %vm366_vm1, %v1289_v54, 0.0 }
 0x64e   : > { %904 = vadd.xlane.f32.xlu0 %v903_v0 }
 0x668   : > { %v840_v56 = vpop.f32.mrf.mxu1 }
 0x669   : > { %v846_v57 = vadd.f32 %v840_v56, %v687_v28 }
 0x66a   : > { %v1221_v58 = vpop.f32.mrf.mxu1 }
 0x66c   : > { %v843_v60 = vpop.f32.mrf.mxu1 }
 0x66e   : > { %v1222_v61 = vpop.f32.mrf.mxu1 }
 0x6d7   : > { %v905_v62 = vpop.xlane.xlu0 %904 }
 0x6d8   : > { %1290 = vrcp.f32 %v905_v62 }
 0x6e5   : > { %v1291_v63 = vpop.eup %1290 }
 0x6e6   : > { %v907_v1 = vmul.f32 %v1291_v63, %v1289_v54 }
 0x6e8   : > { %v908_v2 = vpack.c.bf16 %v907_v1, %v907_v1 }
 0x6ea   : > { %1232 = vmatmul.mubr.msk.bf16.vlgmr.msra.gmra.mxu1 %vm366_vm1, %v908_v2 }
 0x7aa   : > { %v951_v4 = vpop.f32.mrf.mxu1 }
 0x7ab   : > { %v957_v6 = vpack.c.bf16 %v951_v4, %v951_v4 }
 0x7ac   : > { %v1233_v7 = vpop.f32.mrf.mxu1 }
 0x7ad   : > { %1238 = vmatmul.mubr.msk.bf16.vlgmr.msra.gmra.mxu0 %vm366_vm1, %v957_v6 }
 0x7ae   : > { %v954_v8 = vpop.f32.mrf.mxu1 }
 0x7b0   : > { %v1234_v9 = vpop.f32.mrf.mxu1 }
 0x86d   : > { %v999_v10 = vpop.f32.mrf.mxu0 }
 0x86e   : > { %v1005_v11 = vadd.f32 %v999_v10, %v846_v57 }
 0x86f   : > { %v1239_v12 = vpop.f32.mrf.mxu0 }
 0x870   : > { %1007 = vst.msk [vmem:[%s336_s14] sm:$0xff] %vm1006_vm4, %v1005_v11 }
 0x871   : > { %v1002_v13 = vpop.f32.mrf.mxu0 }
 0x873   : > { %v1240_v15 = vpop.f32.mrf.mxu0 }
 0x874 PF: > { %s16_s23 = sadd.s32 1, %s1314_s23   ;;  %s1522_s21 = smov %s1310_s22 }
 0x875   : > { %p13_p5 = scmp.ge.s32.totalorder %s16_s23, 4   ;;  %s1523_s22 = smov %s1525_s24 }
 0x877   :  { %15 = sbr.rel (!%p13_p5) target bundleno = 2 (0x2), region = 83 }

// kernel: transformer_forward.32
= control target key start
LH: loop header
LB: loop body
LE: loop exit
PB: predicated region body
PF: predicated region fallthrough
CT: control target
= control target key end

     0   :  { %s1351_s21 = smov 0   ;;  %s1353_s22 = smov 0   ;;  %s1498_s0 = inlined_call_operand.vmem [shape: bf16[2,8,32], index: 0, kind: input, shape index: {}]   ;;  %s1499_s1 = inlined_call_operand.vmem [shape: bf16[2,16,64], index: 1, kind: input, shape index: {}]   ;;  %s1500_s2 = inlined_call_operand.vmem [shape: f32[2,1,16], index: 2, kind: input, shape index: {}]   ;;  %s1501_s3 = inlined_call_operand.vmem [shape: bf16[32,32], index: 3, kind: input, shape index: {}]   ;;  %s1502_s4 = inlined_call_operand.vmem [shape: f32[1,32], index: 4, kind: input, shape index: {}]   ;;  %s1503_s5 = inlined_call_operand.vmem [shape: f32[2,8,32], index: 5, kind: input, shape index: {}]   ;;  %s1504_s6 = inlined_call_operand.vmem [shape: f32[2,8,32], index: 6, kind: output, shape index: {}]  }
   0x1   :  { %s1355_s23 = smov 0  }
   0x2 LB: > { %s28_s24 = sadd.s32 1, %s1301_s22  ;;  %p1111_p0 = scmp.ge.s32.totalorder %s1305_s23, 1  ;;  %s1305_s23 = sphi %s1355_s23, %s16_s23   ;;  %s1301_s22 = sphi %s1353_s22, %s1506_s22   ;;  %s1297_s21 = sphi %s1351_s21, %s1505_s21  }
   0x3   : > { %p30_p1 = scmp.ge.s32.totalorder %s28_s24, 2  ;;  %p262_p2 = scmp.lt.s32.totalorder %s1305_s23, 3 }
   0x5   : > { %s1508_s24 = smov (%p30_p1, %s28_s24), 0  ;;  %p263_p3 = pnand %p1111_p0, %p262_p2 }
   0x6   : > { %p311_p4 = scmp.lt.s32.totalorder (!%p263_p3), %s1297_s21, 1  ;;  %s1309_s9 = smov (!%p263_p3), 120  }
   0x7   : > { %266 = sbr.rel (%p263_p3) target bundleno = 2164 (0x874), region = 44  ;;  %s1310_s13 = smov (!%p263_p3), 96  }
   0x8   : > { %s1311_s14 = smov (!%p263_p3), 88   ;;  %s1312_s15 = smov (!%p263_p3), 112  }
   0x9   : > { %s1313_s20 = smov (!%p263_p3), 80   ;;  %s1314_s30 = smov (!%p263_p3), 104  }
   0xc   : > { %v1307_v0 = vmov 0.0   ;;  %vm1308_vm0 = vmmov 0   ;;  %s1510_s21 = smov (!%p311_p4, %s1297_s21), 1  ;;  %vm365_vm1 = vcmask 64512   ;;  %vm412_vm2 = vcmask 130048  }
   0xd   : > { %1160 = vmatprep.subr.bf16.mxu0 %v1307_v0  ;;  %1162 = vmatprep.mubr.msk.bf16.mxu0 %vm1308_vm0, %v1307_v0  ;;  %s1375_s25 = sshll.u32 %s1510_s21, 3  ;;  %s1112_s26 = sshll.u32 %s1510_s21, 2  ;;  %v472_v36 = vld [vmem:[%s1501_s3] sm:$0xf]  ;;  %vm476_vm3 = vcmask 1043456   ;;  %vm995_vm4 = vcmask 261120  }
   0xe   : > { %1166 = vmatprep.subr.bf16.mxu1 %v1307_v0  ;;  %1168 = vmatprep.mubr.msk.bf16.mxu1 %vm1308_vm0, %v1307_v0  ;;  %s322_s29 = scalar_lea.vmem %s1499_s1, %s1375_s25  ;;  %s317_s8 = scalar_lea.vmem %s1498_s0, %s1112_s26  ;;  %v478_v37 = vsel %vm476_vm3, %v472_v36, 0  ;;  %v633_v51 = vld [vmem:[%s1501_s3 + $0x4] sm:$0xf] }
   0xf   : > { %v1384_v1 = vld [vmem:[%s322_s29] sm:$0xff]   ;;  %s325_s12 = scalar_lea.vmem %s1500_s2, %s1510_s21  ;;  %v638_v52 = vsel %vm476_vm3, %v633_v51, 0  ;;  %s332_s27 = scalar_lea.vmem %s1503_s5, %s1375_s25 }
  0x10   : > { %v341_v2 = vld [vmem:[%s317_s8] sm:$0xf]  ;;  %v370_v3 = vsel %vm365_vm1, %v1384_v1, 0  ;;  %526 = vrot.lane.b32.xlu0 %v1384_v1, %s1309_s9 }
  0x11   : > { %v1389_v4 = vcombine.low %v341_v2, %v341_v2  ;;  %1161 = vmatpush3.bf16.xpose.msra.mxu0 %v370_v3  ;;  %v1404_v8 = vld [vmem:[%s325_s12] ss:$0 sm:$0xff] }
  0x12   : > { %1178 = vmatprep.subr.bf16.mxu0 %v1307_v0 }
  0x14   : > { %524 = vrot.lane.b32.xlu0 %v1389_v4, %s1309_s9  ;;  %s1315_s9 = smov 72  }
  0x18   : > { %1163 = vmatmul.mubr.msk.bf16.vlgmr.msra.gmra.mxu0 %vm365_vm1, %v341_v2  ;;  %425 = vrot.lane.b32.xlu0 %v1384_v1, %s1310_s13 }
  0x19   : > { %1180 = vmatprep.mubr.msk.bf16.mxu0 %vm1308_vm0, %v1307_v0 }
  0x82   : > { %v527_v5 = vpop.permute.xlu0 %526 }
  0x83   : > { %v532_v6 = vsel %vm365_vm1, %v527_v5, 0 }
  0x84   : > { %1179 = vmatpush3.bf16.xpose.msra.mxu0 %v532_v6 }
  0x85   : > { %1190 = vmatprep.subr.bf16.mxu0 %v1307_v0 }
  0x86   : > { %v525_v7 = vpop.permute.xlu0 %524 }
  0x8a   : > { %v426_v26 = vpop.permute.xlu0 %425 }
  0x8b   : > { %1181 = vmatmul.mubr.msk.bf16.vlgmr.msra.gmra.mxu0 %vm365_vm1, %v525_v7  ;;  %1167 = vmatpush3.bf16.msra.mxu1 %v426_v26 }
  0x8c   : > { %1192 = vmatprep.mubr.msk.bf16.mxu0 %vm1308_vm0, %v1307_v0  ;;  %1172 = vmatprep.subr.bf16.mxu1 %v1307_v0 }
  0x8d   : > { %1191 = vmatpush3.bf16.msra.mxu0 %v638_v52 }
  0x8e   : > { %1202 = vmatprep.subr.bf16.mxu0 %v1307_v0 }
  0xd8   : > { %v406_v9 = vpop.f32.mrf.mxu0 }
  0xd9   : > { %v407_v10 = vadd.f32 %v1404_v8, %v406_v9 }
  0xda   : > { %v1164_v11 = vpop.f32.mrf.mxu0 }
  0xdb   : > { %v413_v12 = vsel %vm412_vm2, %v407_v10, -inf }
  0xdc   : > { %414 = vmax.xlane.f32.xlu1 %v413_v12  ;;  %v409_v13 = vpop.f32.mrf.mxu0 }
  0xde   : > { %v1165_v14 = vpop.f32.mrf.mxu0 }
  0xdf   : > { %v345_v14 = vld [vmem:[%s332_s27] sm:$0xff] }
 0x14b   : > { %v568_v15 = vpop.f32.mrf.mxu0 }
 0x14c   : > { %v569_v22 = vadd.f32 %v1404_v8, %v568_v15  ;;  %v1117_v15 = vld [vmem:[%s1502_s4] ss:$0 sm:$0xff] }
 0x14d   : > { %v1182_v16 = vpop.f32.mrf.mxu0 }
 0x14e   : > { %v574_v25 = vsel %vm412_vm2, %v569_v22, -inf  ;;  %v353_v16 = vadd.f32 %v1117_v15, %v345_v14 }
 0x14f   : > { %v571_v17 = vpop.f32.mrf.mxu0 }
 0x151   : > { %v1183_v18 = vpop.f32.mrf.mxu0 }
 0x165   : > { %v415_v19 = vpop.xlane.xlu1 %414 }
 0x166   : > { %v416_v20 = vsub.f32 %v407_v10, %v415_v19 }
 0x168   : > { %v417_v21 = vmul.f32 1.442695, %v416_v20 }
 0x16a   : > { %1267 = vpow2.f32 %v417_v21 }
 0x177   : > { %v1268_v23 = vpop.eup %1267 }
 0x178   : > { %v419_v24 = vsel %vm412_vm2, %v1268_v23, 0.0 }
 0x179   : > { %420 = vadd.xlane.f32.xlu1 %v419_v24 }
 0x17d   : > { %575 = vmax.xlane.f32.xlu1 %v574_v25 }
 0x18e   : > { %586 = vrot.lane.b32.xlu1 %v1384_v1, %s1311_s14  ;;  %s339_s14 = scalar_lea.vmem %s1504_s6, %s1375_s25 }
 0x192   : > { %683 = vrot.lane.b32.xlu1 %v1384_v1, %s1312_s15 }
 0x196   : > { %681 = vrot.lane.b32.xlu1 %v1389_v4, %s1312_s15 }
 0x202   : > { %v421_v27 = vpop.xlane.xlu1 %420 }
 0x203   : > { %1269 = vrcp.f32 %v421_v27 }
 0x206   : > { %v576_v28 = vpop.xlane.xlu1 %575 }
 0x207   : > { %v577_v29 = vsub.f32 %v569_v22, %v576_v28 }
 0x209   : > { %v578_v30 = vmul.f32 1.442695, %v577_v29  ;;  %v790_v29 = vld [vmem:[%s1501_s3 + $0x8] sm:$0xf] }
 0x20a   : > { %v587_v40 = vpop.permute.xlu1 %586 }
 0x20b   : > { %1271 = vpow2.f32 %v578_v30  ;;  %v795_v30 = vsel %vm476_vm3, %v790_v29, 0 }
 0x20e   : > { %v684_v47 = vpop.permute.xlu1 %683 }
 0x20f   : > { %v689_v48 = vsel %vm365_vm1, %v684_v47, 0 }
 0x210   : > { %v1270_v31 = vpop.eup %1269 }
 0x211   : > { %v423_v32 = vmul.f32 %v1270_v31, %v1268_v23 }
 0x212   : > { %v682_v50 = vpop.permute.xlu1 %681 }
 0x213   : > { %v424_v33 = vpack.c.bf16 %v423_v32, %v423_v32 }
 0x215   : > { %1169 = vmatmul.mubr.msk.bf16.vlgmr.msra.gmra.mxu1 %vm412_vm2, %v424_v33 }
 0x216   : > { %1174 = vmatprep.mubr.msk.bf16.mxu1 %vm1308_vm0, %v1307_v0  ;;  %1173 = vmatpush3.bf16.msra.mxu1 %v478_v37 }
 0x217   : > { %1184 = vmatprep.subr.bf16.mxu1 %v1307_v0 }
 0x218   : > { %v1272_v34 = vpop.eup %1271 }
 0x219   : > { %v580_v35 = vsel %vm412_vm2, %v1272_v34, 0.0 }
 0x21a   : > { %581 = vadd.xlane.f32.xlu0 %v580_v35 }
 0x230   : > { %743 = vrot.lane.b32.xlu0 %v1384_v1, %s1313_s20 }
 0x2a3   : > { %v582_v38 = vpop.xlane.xlu0 %581 }
 0x2a4   : > { %1273 = vrcp.f32 %v582_v38 }
 0x2a7   : > { %v744_v7 = vpop.permute.xlu0 %743 }
 0x2b1   : > { %v1274_v42 = vpop.eup %1273 }
 0x2b2   : > { %v584_v45 = vmul.f32 %v1274_v42, %v1272_v34 }
 0x2b4   : > { %v585_v49 = vpack.c.bf16 %v584_v45, %v584_v45 }
 0x2d5   : > { %v465_v39 = vpop.f32.mrf.mxu1 }
 0x2d6   : > { %v471_v41 = vpack.c.bf16 %v465_v39, %v465_v39 }
 0x2d7   : > { %v1170_v43 = vpop.f32.mrf.mxu1 }
 0x2d8   : > { %1175 = vmatmul.mubr.msk.bf16.vlgmr.msra.gmra.mxu1 %vm365_vm1, %v471_v41 }
 0x2d9   : > { %1185 = vmatpush3.bf16.msra.mxu1 %v587_v40  ;;  %v468_v44 = vpop.f32.mrf.mxu1  ;;  %1186 = vmatprep.mubr.msk.bf16.mxu1 %vm1308_vm0, %v1307_v0 }
 0x2da   : > { %1196 = vmatprep.subr.bf16.mxu1 %v1307_v0 }
 0x2db   : > { %v1171_v46 = vpop.f32.mrf.mxu1 }
 0x2e0   : > { %1187 = vmatmul.mubr.msk.bf16.vlgmr.msra.gmra.mxu1 %vm412_vm2, %v585_v49  ;;  %v947_v49 = vld [vmem:[%s1501_s3 + $0xc] sm:$0xf] }
 0x2e1   : > { %1197 = vmatpush3.bf16.xpose.msra.mxu1 %v689_v48  ;;  %1198 = vmatprep.mubr.msk.bf16.mxu1 %vm1308_vm0, %v1307_v0 }
 0x2e2   : > { %1208 = vmatprep.subr.bf16.mxu1 %v1307_v0 }
 0x2e8   : > { %1199 = vmatmul.mubr.msk.bf16.vlgmr.msra.gmra.mxu1 %vm365_vm1, %v682_v50  ;;  %v952_v50 = vsel %vm476_vm3, %v947_v49, 0 }
 0x2e9   : > { %1210 = vmatprep.mubr.msk.bf16.mxu1 %vm1308_vm0, %v1307_v0  ;;  %1209 = vmatpush3.bf16.msra.mxu1 %v795_v30 }
 0x2ea   : > { %1220 = vmatprep.subr.bf16.mxu1 %v1307_v0 }
 0x398   : > { %v514_v53 = vpop.f32.mrf.mxu1 }
 0x399   : > { %v520_v17 = vadd.f32 %v514_v53, %v353_v16 }
 0x39a   : > { %v1176_v54 = vpop.f32.mrf.mxu1 }
 0x39c   : > { %v517_v55 = vpop.f32.mrf.mxu1 }
 0x39e   : > { %v1177_v56 = vpop.f32.mrf.mxu1 }
 0x3a0   : > { %v626_v57 = vpop.f32.mrf.mxu1 }
 0x3a1   : > { %v632_v58 = vpack.c.bf16 %v626_v57, %v626_v57 }
 0x3a2   : > { %v1188_v59 = vpop.f32.mrf.mxu1 }
 0x3a3   : > { %1193 = vmatmul.mubr.msk.bf16.vlgmr.msra.gmra.mxu0 %vm365_vm1, %v632_v58 }
 0x3a4   : > { %v629_v60 = vpop.f32.mrf.mxu1  ;;  %1204 = vmatprep.mubr.msk.bf16.mxu0 %vm1308_vm0, %v1307_v0  ;;  %1203 = vmatpush3.bf16.msra.mxu0 %v744_v7 }
 0x3a5   : > { %1214 = vmatprep.subr.bf16.mxu0 %v1307_v0 }
 0x3a6   : > { %v1189_v61 = vpop.f32.mrf.mxu1 }
 0x3a8   : > { %v725_v62 = vpop.f32.mrf.mxu1 }
 0x3a9   : > { %v726_v63 = vadd.f32 %v1404_v8, %v725_v62 }
 0x3aa   : > { %v1200_v2 = vpop.f32.mrf.mxu1 }
 0x3ab   : > { %v731_v3 = vsel %vm412_vm2, %v726_v63, -inf }
 0x3ac   : > { %732 = vmax.xlane.f32.xlu1 %v731_v3  ;;  %v728_v5 = vpop.f32.mrf.mxu1 }
 0x3ae   : > { %v1201_v6 = vpop.f32.mrf.mxu1 }
 0x435   : > { %v733_v9 = vpop.xlane.xlu1 %732 }
 0x436   : > { %v734_v10 = vsub.f32 %v726_v63, %v733_v9 }
 0x438   : > { %v735_v11 = vmul.f32 1.442695, %v734_v10 }
 0x43a   : > { %1275 = vpow2.f32 %v735_v11 }
 0x447   : > { %v1276_v12 = vpop.eup %1275 }
 0x448   : > { %v737_v13 = vsel %vm412_vm2, %v1276_v12, 0.0 }
 0x449   : > { %738 = vadd.xlane.f32.xlu0 %v737_v13 }
 0x45f   : > { %840 = vrot.lane.b32.xlu0 %v1384_v1, %s1314_s30 }
 0x463   : > { %v674_v18 = vpop.f32.mrf.mxu0  ;;  %838 = vrot.lane.b32.xlu0 %v1389_v4, %s1314_s30 }
 0x464   : > { %v680_v19 = vadd.f32 %v674_v18, %v520_v17 }
 0x465   : > { %v1194_v20 = vpop.f32.mrf.mxu0 }
 0x467   : > { %v677_v21 = vpop.f32.mrf.mxu0 }
 0x469   : > { %v1195_v22 = vpop.f32.mrf.mxu0 }
 0x4d2   : > { %v739_v23 = vpop.xlane.xlu0 %738 }
 0x4d3   : > { %1277 = vrcp.f32 %v739_v23 }
 0x4d6   : > { %v841_v25 = vpop.permute.xlu0 %840 }
 0x4d7   : > { %v846_v27 = vsel %vm365_vm1, %v841_v25, 0 }
 0x4da   : > { %v839_v4 = vpop.permute.xlu0 %838 }
 0x4e0   : > { %v1278_v24 = vpop.eup %1277 }
 0x4e1   : > { %v741_v26 = vmul.f32 %v1278_v24, %v1276_v12 }
 0x4e3   : > { %v742_v28 = vpack.c.bf16 %v741_v26, %v741_v26 }
 0x4e5   : > { %1205 = vmatmul.mubr.msk.bf16.vlgmr.msra.gmra.mxu0 %vm412_vm2, %v742_v28 }
 0x4e6   : > { %1215 = vmatpush3.bf16.xpose.msra.mxu0 %v846_v27  ;;  %1216 = vmatprep.mubr.msk.bf16.mxu0 %vm1308_vm0, %v1307_v0 }
 0x4e7   : > { %1226 = vmatprep.subr.bf16.mxu0 %v1307_v0 }
 0x4ed   : > { %1217 = vmatmul.mubr.msk.bf16.vlgmr.msra.gmra.mxu0 %vm365_vm1, %v839_v4 }
 0x4ee   : > { %1228 = vmatprep.mubr.msk.bf16.mxu0 %vm1308_vm0, %v1307_v0  ;;  %1227 = vmatpush3.bf16.msra.mxu0 %v952_v50 }
 0x5a5   : > { %v783_v31 = vpop.f32.mrf.mxu0 }
 0x5a6   : > { %v789_v32 = vpack.c.bf16 %v783_v31, %v783_v31 }
 0x5a7   : > { %v1206_v33 = vpop.f32.mrf.mxu0 }
 0x5a8   : > { %1211 = vmatmul.mubr.msk.bf16.vlgmr.msra.gmra.mxu1 %vm365_vm1, %v789_v32 }
 0x5a9   : > { %v786_v34 = vpop.f32.mrf.mxu0  ;;  %1222 = vmatprep.mubr.msk.bf16.mxu1 %vm1308_vm0, %v1307_v0 }
 0x5ab   : > { %v1207_v35 = vpop.f32.mrf.mxu0 }
 0x5ad   : > { %v882_v36 = vpop.f32.mrf.mxu0 }
 0x5ae   : > { %v883_v37 = vadd.f32 %v1404_v8, %v882_v36 }
 0x5af   : > { %v1218_v38 = vpop.f32.mrf.mxu0 }
 0x5b0   : > { %v888_v39 = vsel %vm412_vm2, %v883_v37, -inf }
 0x5b1   : > { %889 = vmax.xlane.f32.xlu1 %v888_v39  ;;  %v885_v40 = vpop.f32.mrf.mxu0 }
 0x5b3   : > { %v1219_v41 = vpop.f32.mrf.mxu0 }
 0x5c2   : > { %900 = vrot.lane.b32.xlu1 %v1384_v1, %s1315_s9 }
 0x63a   : > { %v890_v42 = vpop.xlane.xlu1 %889 }
 0x63b   : > { %v891_v43 = vsub.f32 %v883_v37, %v890_v42 }
 0x63d   : > { %v892_v44 = vmul.f32 1.442695, %v891_v43 }
 0x63e   : > { %v901_v46 = vpop.permute.xlu1 %900 }
 0x63f   : > { %1279 = vpow2.f32 %v892_v44  ;;  %1221 = vmatpush3.bf16.msra.mxu1 %v901_v46 }
 0x64c   : > { %v1280_v45 = vpop.eup %1279 }
 0x64d   : > { %v894_v0 = vsel %vm412_vm2, %v1280_v45, 0.0 }
 0x64e   : > { %895 = vadd.xlane.f32.xlu0 %v894_v0 }
 0x668   : > { %v831_v8 = vpop.f32.mrf.mxu1 }
 0x669   : > { %v837_v47 = vadd.f32 %v831_v8, %v680_v19 }
 0x66a   : > { %v1212_v48 = vpop.f32.mrf.mxu1 }
 0x66c   : > { %v834_v1 = vpop.f32.mrf.mxu1 }
 0x66e   : > { %v1213_v51 = vpop.f32.mrf.mxu1 }
 0x6d7   : > { %v896_v52 = vpop.xlane.xlu0 %895 }
 0x6d8   : > { %1281 = vrcp.f32 %v896_v52 }
 0x6e5   : > { %v1282_v53 = vpop.eup %1281 }
 0x6e6   : > { %v898_v54 = vmul.f32 %v1282_v53, %v1280_v45 }
 0x6e8   : > { %v899_v55 = vpack.c.bf16 %v898_v54, %v898_v54 }
 0x6ea   : > { %1223 = vmatmul.mubr.msk.bf16.vlgmr.msra.gmra.mxu1 %vm412_vm2, %v899_v55 }
 0x7aa   : > { %v940_v56 = vpop.f32.mrf.mxu1 }
 0x7ab   : > { %v946_v57 = vpack.c.bf16 %v940_v56, %v940_v56 }
 0x7ac   : > { %v1224_v58 = vpop.f32.mrf.mxu1 }
 0x7ad   : > { %1229 = vmatmul.mubr.msk.bf16.vlgmr.msra.gmra.mxu0 %vm365_vm1, %v946_v57 }
 0x7ae   : > { %v943_v59 = vpop.f32.mrf.mxu1 }
 0x7b0   : > { %v1225_v60 = vpop.f32.mrf.mxu1 }
 0x86d   : > { %v988_v61 = vpop.f32.mrf.mxu0 }
 0x86e   : > { %v994_v62 = vadd.f32 %v988_v61, %v837_v47 }
 0x86f   : > { %v1230_v63 = vpop.f32.mrf.mxu0 }
 0x870   : > { %996 = vst.msk [vmem:[%s339_s14] sm:$0xff] %vm995_vm4, %v994_v62 }
 0x871   : > { %v991_v2 = vpop.f32.mrf.mxu0 }
 0x873   : > { %v1231_v3 = vpop.f32.mrf.mxu0 }
 0x874 PF: > { %s16_s23 = sadd.s32 1, %s1305_s23   ;;  %s1505_s21 = smov %s1301_s22 }
 0x875   : > { %p13_p5 = scmp.ge.s32.totalorder %s16_s23, 4   ;;  %s1506_s22 = smov %s1508_s24 }
 0x877   :  { %15 = sbr.rel (!%p13_p5) target bundleno = 2 (0x2), region = 83 }

// kernel: transformer_forward.40
= control target key start
LH: loop header
LB: loop body
LE: loop exit
PB: predicated region body
PF: predicated region fallthrough
CT: control target
= control target key end

     0   :  { %vm16_vm0 = vcmask 261120   ;;  %s118_s0 = inlined_call_operand.vmem [shape: f32[16,32], index: 0, kind: input, shape index: {}]   ;;  %s119_s1 = inlined_call_operand.vmem [shape: f32[1,32], index: 1, kind: input, shape index: {}]   ;;  %s120_s2 = inlined_call_operand.vmem [shape: f32[1,32], index: 2, kind: input, shape index: {}]   ;;  %s121_s3 = inlined_call_operand.vmem [shape: f32[16,32], index: 3, kind: output, shape index: {}]  }
   0x1   :  { %v14_v0 = vld [vmem:[%s118_s0] sm:$0xff]  ;;  %v15_v1 = vld [vmem:[%s118_s0 + $0x8] sm:$0xff] }
   0x2   :  { %v17_v2 = vsel %vm16_vm0, %v14_v0, 0.0  ;;  %v20_v3 = vsel %vm16_vm0, %v15_v1, 0.0  ;;  %v68_v21 = vld [vmem:[%s119_s1] ss:$0 sm:$0xff] }
   0x3   :  { %18 = vadd.xlane.f32.xlu0 %v17_v2  ;;  %v69_v23 = vld [vmem:[%s120_s2] ss:$0 sm:$0xff] }
   0x7   :  { %21 = vadd.xlane.f32.xlu0 %v20_v3 }
  0x8c   :  { %v19_v4 = vpop.xlane.xlu0 %18 }
  0x8d   :  { %v24_v5 = vmul.f32 0.03125, %v19_v4 }
  0x8f   :  { %v26_v6 = vsub.f32 %v14_v0, %v24_v5 }
  0x90   :  { %v22_v7 = vpop.xlane.xlu0 %21 }
  0x91   :  { %v25_v8 = vmul.f32 0.03125, %v22_v7  ;;  %v28_v9 = vmul.f32 %v26_v6, %v26_v6 }
  0x93   :  { %v27_v10 = vsub.f32 %v15_v1, %v25_v8  ;;  %v30_v11 = vsel %vm16_vm0, %v28_v9, 0.0 }
  0x94   :  { %31 = vadd.xlane.f32.xlu1 %v30_v11 }
  0x95   :  { %v29_v12 = vmul.f32 %v27_v10, %v27_v10 }
  0x97   :  { %v33_v13 = vsel %vm16_vm0, %v29_v12, 0.0 }
  0x98   :  { %34 = vadd.xlane.f32.xlu1 %v33_v13 }
 0x11d   :  { %v32_v14 = vpop.xlane.xlu1 %31 }
 0x11e   :  { %v36_v15 = vmul.f32 0.03125, %v32_v14 }
 0x120   :  { %v38_v16 = vadd.f32 1e-05, %v36_v15 }
 0x121   :  { %v35_v17 = vpop.xlane.xlu1 %34 }
 0x122   :  { %70 = vrsqrt.f32 %v38_v16  ;;  %v37_v18 = vmul.f32 0.03125, %v35_v17 }
 0x124   :  { %v39_v19 = vadd.f32 1e-05, %v37_v18 }
 0x126   :  { %72 = vrsqrt.f32 %v39_v19 }
 0x12f   :  { %v71_v20 = vpop.eup %70 }
 0x130   :  { %v42_v22 = vmul.f32 %v71_v20, %v26_v6 }
 0x132   :  { %v51_v24 = vmul.f32 %v68_v21, %v42_v22 }
 0x133   :  { %v73_v25 = vpop.eup %72 }
 0x134   :  { %v60_v26 = vadd.f32 %v69_v23, %v51_v24  ;;  %v43_v27 = vmul.f32 %v73_v25, %v27_v10 }
 0x136   :  { %62 = vst.msk [vmem:[%s121_s3] sm:$0xff] %vm16_vm0, %v60_v26  ;;  %v52_v28 = vmul.f32 %v68_v21, %v43_v27 }
 0x138   :  { %v61_v29 = vadd.f32 %v69_v23, %v52_v28 }
 0x13a   :  { %63 = vst.msk [vmem:[%s121_s3 + $0x8] sm:$0xff] %vm16_vm0, %v61_v29 }

// kernel: transformer_forward.33
= control target key start
LH: loop header
LB: loop body
LE: loop exit
PB: predicated region body
PF: predicated region fallthrough
CT: control target
= control target key end

     0   :  { %vm29_vm0 = vcmask 261120   ;;  %v290_v14 = vmov 0.0   ;;  %vm291_vm1 = vmmov 0   ;;  %vm185_vm2 = vcmask 523264   ;;  %s391_s0 = inlined_call_operand.vmem [shape: f32[16,32], index: 0, kind: input, shape index: {}]   ;;  %s392_s3 = inlined_call_operand.vmem [shape: bf16[32,64], index: 3, kind: input, shape index: {}]   ;;  %s393_s5 = inlined_call_operand.vmem [shape: bf16[64,32], index: 5, kind: input, shape index: {}]   ;;  %s394_s1 = inlined_call_operand.vmem [shape: f32[1,32], index: 1, kind: input, shape index: {}]   ;;  %s395_s2 = inlined_call_operand.vmem [shape: f32[1,32], index: 2, kind: input, shape index: {}]   ;;  %s396_s4 = inlined_call_operand.vmem [shape: f32[1,64], index: 4, kind: input, shape index: {}]   ;;  %s397_s6 = inlined_call_operand.vmem [shape: f32[1,32], index: 6, kind: input, shape index: {}]   ;;  %s398_s7 = inlined_call_operand.vmem [shape: f32[16,32], index: 7, kind: output, shape index: {}]  }
   0x1   :  { %v335_v0 = vld [vmem:[%s391_s0] sm:$0xff]  ;;  %v340_v1 = vld [vmem:[%s391_s0 + $0x8] sm:$0xff]  ;;  %258 = vmatprep.subr.bf16.mxu0 %v290_v14  ;;  %262 = vmatprep.mubr.msk.bf16.mxu0 %vm291_vm1, %v290_v14  ;;  %v282_v17 = vld [vmem:[%s393_s5 + $0x18] sm:$0xff]  }
   0x2   :  { %v30_v2 = vsel %vm29_vm0, %v335_v0, 0.0  ;;  %v33_v3 = vsel %vm29_vm0, %v340_v1, 0.0  ;;  %v280_v15 = vld [vmem:[%s392_s3 + $0x8] sm:$0xff]   ;;  %266 = vmatprep.subr.bf16.mxu1 %v290_v14  ;;  %274 = vmatprep.mubr.msk.bf16.mxu1 %vm291_vm1, %v290_v14  ;;  %v281_v16 = vld [vmem:[%s392_s3] sm:$0xff]   ;;  %v283_v35 = vld [vmem:[%s393_s5 + $0x10] sm:$0xff]  }
   0x3   :  { %31 = vadd.xlane.f32.xlu0 %v30_v2  ;;  %259 = vmatpush3.bf16.msra.mxu0 %v280_v15  ;;  %v238_v26 = vld [vmem:[%s394_s1] ss:$0 sm:$0xff]  ;;  %v284_v36 = vld [vmem:[%s393_s5 + $0x8] sm:$0xff]  }
   0x4   :  { %260 = vmatprep.subr.bf16.mxu0 %v290_v14  ;;  %267 = vmatpush3.bf16.msra.mxu1 %v282_v17  ;;  %v239_v30 = vld [vmem:[%s395_s2] ss:$0 sm:$0xff] }
   0x5   :  { %268 = vmatprep.subr.bf16.mxu1 %v290_v14  ;;  %v285_v37 = vld [vmem:[%s393_s5] sm:$0xff]  }
   0x6   :  { %v240_v38 = vld [vmem:[%s396_s4] ss:$0 sm:$0xff] }
   0x7   :  { %34 = vadd.xlane.f32.xlu0 %v33_v3  ;;  %261 = vmatpush3.bf16.msra.mxu0 %v281_v16  ;;  %v244_v48 = vld [vmem:[%s397_s6] ss:$0 sm:$0xff] }
   0x8   :  { %269 = vmatpush3.bf16.msra.mxu1 %v283_v35 }
   0x9   :  { %270 = vmatprep.subr.bf16.mxu1 %v290_v14 }
   0xc   :  { %271 = vmatpush3.bf16.msra.mxu1 %v284_v36 }
   0xd   :  { %272 = vmatprep.subr.bf16.mxu1 %v290_v14 }
  0x10   :  { %273 = vmatpush3.bf16.msra.mxu1 %v285_v37 }
  0x8c   :  { %v32_v4 = vpop.xlane.xlu0 %31 }
  0x8d   :  { %v37_v5 = vmul.f32 0.03125, %v32_v4 }
  0x8f   :  { %v39_v6 = vsub.f32 %v335_v0, %v37_v5 }
  0x90   :  { %v35_v7 = vpop.xlane.xlu0 %34 }
  0x91   :  { %v38_v8 = vmul.f32 0.03125, %v35_v7  ;;  %v41_v9 = vmul.f32 %v39_v6, %v39_v6 }
  0x93   :  { %v40_v10 = vsub.f32 %v340_v1, %v38_v8  ;;  %v43_v11 = vsel %vm29_vm0, %v41_v9, 0.0 }
  0x94   :  { %44 = vadd.xlane.f32.xlu1 %v43_v11 }
  0x95   :  { %v42_v12 = vmul.f32 %v40_v10, %v40_v10 }
  0x97   :  { %v46_v13 = vsel %vm29_vm0, %v42_v12, 0.0 }
  0x98   :  { %47 = vadd.xlane.f32.xlu1 %v46_v13 }
 0x11d   :  { %v45_v18 = vpop.xlane.xlu1 %44 }
 0x11e   :  { %v49_v19 = vmul.f32 0.03125, %v45_v18 }
 0x120   :  { %v51_v20 = vadd.f32 1e-05, %v49_v19 }
 0x121   :  { %v48_v21 = vpop.xlane.xlu1 %47 }
 0x122   :  { %286 = vrsqrt.f32 %v51_v20  ;;  %v50_v22 = vmul.f32 0.03125, %v48_v21 }
 0x124   :  { %v52_v23 = vadd.f32 1e-05, %v50_v22 }
 0x126   :  { %288 = vrsqrt.f32 %v52_v23 }
 0x12f   :  { %v287_v24 = vpop.eup %286 }
 0x130   :  { %v55_v25 = vmul.f32 %v287_v24, %v39_v6 }
 0x132   :  { %v64_v29 = vmul.f32 %v238_v26, %v55_v25 }
 0x133   :  { %v289_v27 = vpop.eup %288 }
 0x134   :  { %v56_v28 = vmul.f32 %v289_v27, %v40_v10  ;;  %v73_v32 = vadd.f32 %v239_v30, %v64_v29 }
 0x136   :  { %v65_v31 = vmul.f32 %v238_v26, %v56_v28 }
 0x138   :  { %v74_v33 = vadd.f32 %v239_v30, %v65_v31 }
 0x13a   :  { %v75_v34 = vpack.c.bf16 %v74_v33, %v73_v32 }
 0x13c   :  { %263 = vmatmul.mubr.msk.bf16.vlgmr.msra.gmra.mxu0 %vm29_vm0, %v75_v34 }
 0x1fc   :  { %v136_v39 = vpop.f32.mrf.mxu0 }
 0x1fd   :  { %v137_v41 = vadd.f32 %v240_v38, %v136_v39 }
 0x1fe   :  { %v264_v40 = vpop.f32.mrf.mxu0 }
 0x1ff   :  { %v143_v45 = vmax.f32 %v137_v41, 0.0 }
 0x200   :  { %v139_v42 = vpop.f32.mrf.mxu0 }
 0x201   :  { %v140_v43 = vadd.f32 %v240_v38, %v139_v42 }
 0x202   :  { %v265_v44 = vpop.f32.mrf.mxu0 }
 0x203   :  { %v144_v46 = vmax.f32 %v140_v43, 0.0 }
 0x205   :  { %v145_v47 = vpack.c.bf16 %v144_v46, %v143_v45 }
 0x207   :  { %275 = vmatmul.mubr.msk.bf16.vlgmr.msra.gmra.mxu1 %vm185_vm2, %v145_v47 }
 0x2c7   :  { %v223_v49 = vpop.f32.mrf.mxu1 }
 0x2c8   :  { %v224_v50 = vadd.f32 %v244_v48, %v223_v49 }
 0x2c9   :  { %v276_v51 = vpop.f32.mrf.mxu1 }
 0x2ca   :  { %v230_v52 = vadd.f32 %v224_v50, %v335_v0 }
 0x2cb   :  { %v226_v53 = vpop.f32.mrf.mxu1 }
 0x2cc   :  { %232 = vst.msk [vmem:[%s398_s7] sm:$0xff] %vm29_vm0, %v230_v52  ;;  %v227_v54 = vadd.f32 %v244_v48, %v226_v53 }
 0x2cd   :  { %v277_v55 = vpop.f32.mrf.mxu1 }
 0x2ce   :  { %v231_v56 = vadd.f32 %v227_v54, %v340_v1 }
 0x2d0   :  { %233 = vst.msk [vmem:[%s398_s7 + $0x8] sm:$0xff] %vm29_vm0, %v231_v56 }

// kernel: transformer_forward.41
= control target key start
LH: loop header
LB: loop body
LE: loop exit
PB: predicated region body
PF: predicated region fallthrough
CT: control target
= control target key end

     0   :  { %v150_v1 = vmov 0.0   ;;  %vm151_vm0 = vmmov 0   ;;  %s193_s0 = inlined_call_operand.vmem [shape: f32[16,32], index: 0, kind: input, shape index: {}]   ;;  %s194_s1 = inlined_call_operand.vmem [shape: bf16[32,19], index: 1, kind: input, shape index: {}]   ;;  %s195_s2 = inlined_call_operand.vmem [shape: f32[1,19], index: 2, kind: input, shape index: {}]   ;;  %s196_s3 = inlined_call_operand.hbm [shape: f32[16,19], index: 3, kind: output, shape index: {}]  }
   0x1   :  { %v126_v0 = vld [vmem:[%s194_s1 + $0x8] sm:$0xff]   ;;  %113 = vmatprep.subr.bf16.mxu0 %v150_v1  ;;  %v127_v2 = vld [vmem:[%s194_s1] sm:$0xff]   ;;  %117 = vmatprep.mubr.msk.bf16.mxu0 %vm151_vm0, %v150_v1 }
   0x2   :  { %114 = vmatpush3.bf16.msra.mxu0 %v126_v0  ;;  %v16_v3 = vld [vmem:[%s193_s0] sm:$0xff]  ;;  %v17_v4 = vld [vmem:[%s193_s0 + $0x8] sm:$0xff] }
   0x3   :  { %115 = vmatprep.subr.bf16.mxu0 %v150_v1 }
   0x4   :  { %8 = vsyncpa [#allocation3], 0  ;;  %v18_v5 = vpack.c.bf16 %v17_v4, %v16_v3  ;;  %vm42_vm1 = vcmask 261120   ;;  %v106_v6 = vld [vmem:[%s195_s2] ss:$0 sm:$0xff]  ;;  %vm87_vm2 = vcmask 154624  }
   0x5   :  { %s152_s1 = smov [#allocation2]  }
   0x6   :  { %116 = vmatpush3.bf16.msra.mxu0 %v127_v2  ;;  %s95_s22 = sshll.u32 %s152_s1, 4  ;;  %s96_s22 = int_to_ptr.vmem [resolvable:$true] %s95_s22 }
   0x7   :  { %s128_s0 = scalar_lea.vmem %s96_s22, 256  ;;  %p133_p1 = scmp.lt.s32.totalorder %s96_s22, %s96_s22 }
   0x8   :  { %p129_p0 = scmp.ne.s32.totalorder %s96_s22, %s128_s0  ;;  %p134_p2 = scmp.lt.s32.totalorder %s128_s0, %s128_s0 }
   0x9   :  { %118 = vmatmul.mubr.msk.bf16.vlgmr.msra.gmra.mxu0 %vm42_vm1, %v18_v5 }
   0xa   :  { %p135_p3 = por %p134_p2, %p133_p1 }
   0xc   :  { %p136_p4 = pnand %p135_p3, %p129_p0 }
  0xc9   :  { %v80_v7 = vpop.f32.mrf.mxu0 }
  0xca   :  { %v81_v8 = vadd.f32 %v106_v6, %v80_v7 }
  0xcb   :  { %v119_v9 = vpop.f32.mrf.mxu0 }
  0xcc   :  { %88 = vst.msk [vmem:[#allocation2] sm:$0xff] %vm87_vm2, %v81_v8 }
  0xcd   :  { %v83_v10 = vpop.f32.mrf.mxu0 }
  0xce   :  { %v84_v11 = vadd.f32 %v106_v6, %v83_v10 }
  0xcf   :  { %v120_v12 = vpop.f32.mrf.mxu0 }
  0xd0   :  { %89 = vst.msk [vmem:[#allocation2 + $0x8] sm:$0xff] %vm87_vm2, %v84_v11 }
  0xd1   :  { %139 = shalt.err (!%p136_p4)
}
  0xd2   :  { %s153_s2 = smov 128   ;;  %s154_s23 = smov 8  }
  0xd3   :  { %101 = dma.vmem_to_hbm [thread:$0]  %s96_s22, 256, %s196_s3, [#allocation3], %s153_s2, %s153_s2, %s154_s23  }
  0xd4   :  { %148 = dma.done.wait [#allocation3], 256  }
  0xd5   :  { %149 = vsyncadd [#allocation3], 4294967040 }
  0xd6   :  { %105 = vsyncpa [#allocation3], 1 }

</bundles_post_ra>
